<compile_context>
chip_gen: v7x
topology: tpu7x:2x2x1
jax: 0.10.0
libtpu: 0.0.40
codegen_flags: <defaults>
</compile_context>

<pallas_src>
import functools

import jax
import jax.numpy as jnp
import numpy as np
from jax.experimental import pallas as pl
from jax.experimental.pallas import tpu as pltpu


# ---------------------------------------------------------------------------
# Pallas kernel: full (unrolled) Euler time loop for one lane-tile of the batch.
# Layout: batch on lanes, hidden (both branches packed) on sublanes.
# ---------------------------------------------------------------------------
def _sanode_kernel(u_ref, p_ref, traj_ref, *, dt, steps):
    # u_ref   : (3, tn)           initial state tile, rows [x, y, rho]
    # p_ref   : (2H, 5 + steps)   packed parameter columns (see wrapper)
    # traj_ref: (steps, 3, tn)    state after Euler steps 1..steps (lane-dense)
    u = u_ref[...].astype(jnp.float32)      # one load; slice rows in registers
    x1 = u[0:1, :]                          # (1, tn)
    x2 = u[1:2, :]
    rho = u[2:3, :]

    wx1 = p_ref[:, 0:1]    # (2H, 1): [W1a[:,0] ; W1b[:,0]]
    wx2 = p_ref[:, 1:2]    #          [W1a[:,1] ; W1b[:,1]]
    v1z = p_ref[:, 2:3]    #          [w2a ; 0]
    zv2 = p_ref[:, 3:4]    #          [0 ; w2b]
    cc = p_ref[:, 4:5]     #          [c1 ; c2]

    dt_f = jnp.float32(dt)

    # steps is small and static -> fully unroll; the carried state (x1,x2,rho)
    # is only 3 lane-rows so live vregs stay far below the spill threshold at
    # tn <= 256 (each (2H, tn) intermediate is <= 16 vregs).
    for n in range(steps):
        b = p_ref[:, 5 + n:6 + n]          # (2H, 1): [b1(t_n) ; b2(t_n)]
        z = wx1 * x1 + wx2 * x2 + b        # (2H, tn): both branches on sublanes
        a = jnp.tanh(z)
        d = 1.0 - a * a
        dx1 = jnp.sum(a * v1z, axis=0, keepdims=True)   # (1, tn)
        dx2 = jnp.sum(a * zv2, axis=0, keepdims=True)
        g = jnp.sum(d * cc, axis=0, keepdims=True)
        x1 = x1 + dt_f * dx1
        x2 = x2 + dt_f * dx2
        rho = rho + dt_f * (-g * rho)
        # lane-dense row stores (no masked 3-lane partials, no sublane concat)
        traj_ref[n, 0:1, :] = x1
        traj_ref[n, 1:2, :] = x2
        traj_ref[n, 2:3, :] = rho


# ---------------------------------------------------------------------------
# Wrapper: parameter packing + pallas_call
# ---------------------------------------------------------------------------
def _choose_tile(n, cap=256):
    """Lane tile over the batch.

    Single program when the whole batch fits the vreg-safe cap (no pointless
    grid splitting on single-TC v5e/v6e).  Otherwise the largest 128-multiple
    divisor of n up to the cap (lane-tiling rule), preferring an even program
    count so both TensorCores get equal work on v7x.
    """
    if n <= cap:
        return n
    cands = [t for t in range(128, cap + 1, 128) if n % t == 0]
    if not cands:
        # TODO(synk): batches > cap with no 128-multiple divisor should be
        # padded to a multiple of 128 on the host instead of this fallback.
        return n
    even = [t for t in cands if (n // t) % 2 == 0]
    pool = even if even else cands
    return max(pool)


def sanode_transport_forward(u, params, *, T=10.0, time_steps=10, backward=0):
    """Forward pass of SANODE_transport. Returns (features, traj)."""
    if backward != 0:
        # TODO(synk): backward=1 (time-reversed integration path) not implemented.
        raise NotImplementedError("backward=1 path is not implemented")

    w1_1, w1_2, wb1, bb1, wb2, bb2, w2_1, w2_2 = (
        params["w1_1"], params["w1_2"], params["wb1"], params["bb1"],
        params["wb2"], params["bb2"], params["w2_1"], params["w2_2"])
    N = u.shape[0]
    H = w1_1.shape[0]
    steps = time_steps - 1
    dt = float(T) / float(steps)
    f32 = jnp.float32

    # continuity-equation coefficient vectors
    c1 = (w1_1 * w2_1.T).sum(axis=1)   # (H,)
    c2 = (w1_2 * w2_2.T).sum(axis=1)   # (H,)
    zeros_h = jnp.zeros((H,), f32)

    # precompute per-step biases b1(t_n), b2(t_n) on the host (hidden on rows)
    t_vals = (jnp.arange(steps, dtype=f32) * f32(dt))[None, :]      # (1, steps)
    b1_all = wb1[:, 0][:, None] * t_vals + bb1[:, None]             # (H, steps)
    b2_all = wb2[:, 0][:, None] * t_vals + bb2[:, None]             # (H, steps)

    head = jnp.stack([
        jnp.concatenate([w1_1[:, 0], w1_2[:, 0]]),   # col 0: wx1
        jnp.concatenate([w1_1[:, 1], w1_2[:, 1]]),   # col 1: wx2
        jnp.concatenate([w2_1[0], zeros_h]),         # col 2: [v1 | 0]
        jnp.concatenate([zeros_h, w2_2[0]]),         # col 3: [0 | v2]
        jnp.concatenate([c1, c2]),                   # col 4: [c1 | c2]
    ], axis=1)                                       # (2H, 5)
    btab = jnp.concatenate([b1_all, b2_all], axis=0)                # (2H, steps)
    packed = jnp.concatenate([head, btab], axis=1).astype(f32)      # (2H, 5+steps)
    n_cols = 5 + steps

    tn = _choose_tile(N)
    u_t = u.astype(f32).T                            # (3, N): batch on lanes

    kernel = functools.partial(_sanode_kernel, dt=dt, steps=steps)

    traj_t = pl.pallas_call(
        kernel,
        out_shape=jax.ShapeDtypeStruct((steps, 3, N), jnp.float32),
        grid=(N // tn,),
        in_specs=[
            pl.BlockSpec((3, tn), lambda i: (0, i)),
            pl.BlockSpec((2 * H, n_cols), lambda i: (0, 0)),
        ],
        out_specs=pl.BlockSpec((steps, 3, tn), lambda i: (0, 0, i)),
        compiler_params=pltpu.CompilerParams(
            dimension_semantics=("parallel",)),
    )(u_t, packed)

    # restore module-facing layout: traj (steps, N, 3); features = state at t=T
    traj = jnp.transpose(traj_t, (0, 2, 1))
    feat = traj[-1]
    return feat, traj


# ---------------------------------------------------------------------------
# Pure-JAX reference (mirrors the PyTorch dynamics + torchdiffeq euler grid)
# ---------------------------------------------------------------------------
def sanode_reference(u, params, *, T=10.0, time_steps=10):
    w1_1, w1_2, wb1, bb1, wb2, bb2, w2_1, w2_2 = (
        params["w1_1"], params["w1_2"], params["wb1"], params["bb1"],
        params["wb2"], params["bb2"], params["w2_1"], params["w2_2"])
    steps = time_steps - 1
    dt = float(T) / float(steps)
    X = u[:, 0:2].astype(jnp.float32)
    Rho = u[:, 2:3].astype(jnp.float32)
    c1 = (w1_1 * w2_1.T).sum(axis=1, keepdims=True)  # (H,1)
    c2 = (w1_2 * w2_2.T).sum(axis=1, keepdims=True)
    traj = []
    for n in range(steps):
        t = n * dt
        b1 = wb1[:, 0] * t + bb1
        b2 = wb2[:, 0] * t + bb2
        a1 = jnp.tanh(X @ w1_1.T + b1)
        a2 = jnp.tanh(X @ w1_2.T + b2)
        o1 = a1 @ w2_1.T
        o2 = a2 @ w2_2.T
        dX = jnp.concatenate([o1, o2], axis=1)
        g = (1.0 - a1 ** 2) @ c1 + (1.0 - a2 ** 2) @ c2
        dRho = -g * Rho
        X = X + dt * dX
        Rho = Rho + dt * dRho
        traj.append(jnp.concatenate([X, Rho], axis=1))
    traj = jnp.stack(traj, axis=0)
    return traj[-1], traj


# ---------------------------------------------------------------------------
# Deterministic parameter construction (xavier_normal-style, synthetic)
# ---------------------------------------------------------------------------
def make_params(key, data_dim, hidden_dim):
    k = jax.random.split(key, 6)
    xav = lambda shape, kk: (jax.random.normal(kk, shape, jnp.float32)
                             * np.sqrt(2.0 / (shape[0] + shape[1])))
    return {
        "w1_1": xav((hidden_dim, data_dim), k[0]),  # fc1_time_1.weight
        "w1_2": xav((hidden_dim, data_dim), k[1]),  # fc1_time_2.weight
        "wb1": xav((hidden_dim, 1), k[2]),          # b_time_1.weight
        "bb1": jnp.zeros((hidden_dim,), jnp.float32),
        "wb2": xav((hidden_dim, 1), k[3]),          # b_time_2.weight
        "bb2": jnp.zeros((hidden_dim,), jnp.float32),
        "w2_1": xav((1, hidden_dim), k[4]),         # fc3_time_1.weight
        "w2_2": xav((1, hidden_dim), k[5]),         # fc3_time_2.weight
    }


if __name__ == "__main__":
    key = jax.random.PRNGKey(0)
    ku, kp = jax.random.split(key)

    N = 16            # batch of particles
    DATA_DIM = 2      # spatial dims
    HIDDEN = 32
    T = 10.0
    TIME_STEPS = 10

    params = make_params(kp, DATA_DIM, HIDDEN)
    xy = jax.random.normal(ku, (N, DATA_DIM), jnp.float32)
    rho0 = jnp.abs(jax.random.normal(jax.random.fold_in(ku, 1), (N, 1), jnp.float32)) + 0.5
    u = jnp.concatenate([xy, rho0], axis=1)   # (N, 3) = [x, y, rho]

    feat, traj = sanode_transport_forward(u, params, T=T, time_steps=TIME_STEPS)
    jax.block_until_ready(feat)
    jax.block_until_ready(traj)

    feat_ref, traj_ref = sanode_reference(u, params, T=T, time_steps=TIME_STEPS)
    np.testing.assert_allclose(np.asarray(feat), np.asarray(feat_ref), rtol=2e-3, atol=2e-3)
    np.testing.assert_allclose(np.asarray(traj), np.asarray(traj_ref), rtol=2e-3, atol=2e-3)

    print("KERNEL_OK")
</pallas_src>

<mosaic_0001>
module attributes {stable_mosaic.version = 11 : i64} {
  func.func @_sanode_kernel(%arg0: i32, %arg1: memref<3x16xf32, #tpu.memory_space<vmem>>, %arg2: memref<64x14xf32, #tpu.memory_space<vmem>>, %arg3: memref<9x3x16xf32, #tpu.memory_space<vmem>>) attributes {dimension_semantics = [#tpu.dimension_semantics<parallel>], iteration_bounds = array<i64: 1>, scalar_prefetch = 0 : i64, scratch_operands = 0 : i64, tpu.core_type = #tpu.core_type<tc>, window_params = [{transform_indices = @transform_0, window_bounds = array<i64: 3, 16>}, {pipeline_mode = #tpu.pipeline_mode<synchronous>, transform_indices = @transform_1, window_bounds = array<i64: 64, 14>}, {transform_indices = @transform_2, window_bounds = array<i64: 9, 3, 16>}]} {
    %c0 = arith.constant 0 : index
    %c0_0 = arith.constant 0 : index
    %0 = vector.load %arg1[%c0, %c0_0] : memref<3x16xf32, #tpu.memory_space<vmem>>, vector<3x16xf32>
    %1 = vector.extract_strided_slice %0 {offsets = [0, 0], sizes = [1, 16], strides = [1, 1]} : vector<3x16xf32> to vector<1x16xf32>
    %2 = vector.extract_strided_slice %0 {offsets = [1, 0], sizes = [1, 16], strides = [1, 1]} : vector<3x16xf32> to vector<1x16xf32>
    %3 = vector.extract_strided_slice %0 {offsets = [2, 0], sizes = [1, 16], strides = [1, 1]} : vector<3x16xf32> to vector<1x16xf32>
    %c0_1 = arith.constant 0 : index
    %c0_2 = arith.constant 0 : index
    %4 = vector.load %arg2[%c0_1, %c0_2] : memref<64x14xf32, #tpu.memory_space<vmem>>, vector<64x1xf32>
    %c0_3 = arith.constant 0 : index
    %c1 = arith.constant 1 : index
    %5 = vector.load %arg2[%c0_3, %c1] : memref<64x14xf32, #tpu.memory_space<vmem>>, vector<64x1xf32>
    %c0_4 = arith.constant 0 : index
    %c2 = arith.constant 2 : index
    %6 = vector.load %arg2[%c0_4, %c2] : memref<64x14xf32, #tpu.memory_space<vmem>>, vector<64x1xf32>
    %c0_5 = arith.constant 0 : index
    %c3 = arith.constant 3 : index
    %7 = vector.load %arg2[%c0_5, %c3] : memref<64x14xf32, #tpu.memory_space<vmem>>, vector<64x1xf32>
    %c0_6 = arith.constant 0 : index
    %c4 = arith.constant 4 : index
    %8 = vector.load %arg2[%c0_6, %c4] : memref<64x14xf32, #tpu.memory_space<vmem>>, vector<64x1xf32>
    %c0_7 = arith.constant 0 : index
    %c5 = arith.constant 5 : index
    %9 = vector.load %arg2[%c0_7, %c5] : memref<64x14xf32, #tpu.memory_space<vmem>>, vector<64x1xf32>
    %10 = vector.broadcast %4 : vector<64x1xf32> to vector<64x16xf32>
    %11 = vector.broadcast %1 : vector<1x16xf32> to vector<64x16xf32>
    %12 = arith.mulf %10, %11 : vector<64x16xf32>
    %13 = vector.broadcast %5 : vector<64x1xf32> to vector<64x16xf32>
    %14 = vector.broadcast %2 : vector<1x16xf32> to vector<64x16xf32>
    %15 = arith.mulf %13, %14 : vector<64x16xf32>
    %16 = arith.addf %12, %15 : vector<64x16xf32>
    %17 = vector.broadcast %9 : vector<64x1xf32> to vector<64x16xf32>
    %18 = arith.addf %16, %17 : vector<64x16xf32>
    %19 = math.tanh %18 : vector<64x16xf32>
    %20 = arith.mulf %19, %19 : vector<64x16xf32>
    %cst = arith.constant 1.000000e+00 : f32
    %21 = vector.broadcast %cst : f32 to vector<64x16xf32>
    %22 = arith.subf %21, %20 : vector<64x16xf32>
    %23 = vector.broadcast %6 : vector<64x1xf32> to vector<64x16xf32>
    %24 = arith.mulf %19, %23 : vector<64x16xf32>
    %cst_8 = arith.constant dense<0.000000e+00> : vector<16xf32>
    %25 = vector.multi_reduction <add>, %24, %cst_8 [0] : vector<64x16xf32> to vector<16xf32>
    %26 = vector.shape_cast %25 : vector<16xf32> to vector<1x16xf32>
    %27 = vector.broadcast %7 : vector<64x1xf32> to vector<64x16xf32>
    %28 = arith.mulf %19, %27 : vector<64x16xf32>
    %cst_9 = arith.constant dense<0.000000e+00> : vector<16xf32>
    %29 = vector.multi_reduction <add>, %28, %cst_9 [0] : vector<64x16xf32> to vector<16xf32>
    %30 = vector.shape_cast %29 : vector<16xf32> to vector<1x16xf32>
    %31 = vector.broadcast %8 : vector<64x1xf32> to vector<64x16xf32>
    %32 = arith.mulf %22, %31 : vector<64x16xf32>
    %cst_10 = arith.constant dense<0.000000e+00> : vector<16xf32>
    %33 = vector.multi_reduction <add>, %32, %cst_10 [0] : vector<64x16xf32> to vector<16xf32>
    %34 = vector.shape_cast %33 : vector<16xf32> to vector<1x16xf32>
    %cst_11 = arith.constant 1.11111116 : f32
    %35 = vector.broadcast %cst_11 : f32 to vector<1x16xf32>
    %36 = arith.mulf %35, %26 : vector<1x16xf32>
    %37 = arith.addf %1, %36 : vector<1x16xf32>
    %cst_12 = arith.constant 1.11111116 : f32
    %38 = vector.broadcast %cst_12 : f32 to vector<1x16xf32>
    %39 = arith.mulf %38, %30 : vector<1x16xf32>
    %40 = arith.addf %2, %39 : vector<1x16xf32>
    %cst_13 = arith.constant 0.000000e+00 : f32
    %41 = vector.broadcast %cst_13 : f32 to vector<1x16xf32>
    %42 = arith.subf %41, %34 : vector<1x16xf32>
    %43 = arith.mulf %42, %3 : vector<1x16xf32>
    %cst_14 = arith.constant 1.11111116 : f32
    %44 = vector.broadcast %cst_14 : f32 to vector<1x16xf32>
    %45 = arith.mulf %44, %43 : vector<1x16xf32>
    %46 = arith.addf %3, %45 : vector<1x16xf32>
    %c0_15 = arith.constant 0 : index
    %c0_16 = arith.constant 0 : index
    %c0_17 = arith.constant 0 : index
    %47 = vector.load %arg3[%c0_15, %c0_16, %c0_17] : memref<9x3x16xf32, #tpu.memory_space<vmem>>, vector<1x1x16xf32>
    %48 = vector.shape_cast %47 : vector<1x1x16xf32> to vector<1x16xf32>
    %49 = vector.shape_cast %37 : vector<1x16xf32> to vector<1x1x16xf32>
    tpu.vector_store %arg3[%c0_15, %c0_16, %c0_17], %49 {strides = array<i32>} : memref<9x3x16xf32, #tpu.memory_space<vmem>>, vector<1x1x16xf32>,
    %c0_18 = arith.constant 0 : index
    %c1_19 = arith.constant 1 : index
    %c0_20 = arith.constant 0 : index
    %50 = vector.load %arg3[%c0_18, %c1_19, %c0_20] : memref<9x3x16xf32, #tpu.memory_space<vmem>>, vector<1x1x16xf32>
    %51 = vector.shape_cast %50 : vector<1x1x16xf32> to vector<1x16xf32>
    %52 = vector.shape_cast %40 : vector<1x16xf32> to vector<1x1x16xf32>
    tpu.vector_store %arg3[%c0_18, %c1_19, %c0_20], %52 {strides = array<i32>} : memref<9x3x16xf32, #tpu.memory_space<vmem>>, vector<1x1x16xf32>,
    %c0_21 = arith.constant 0 : index
    %c2_22 = arith.constant 2 : index
    %c0_23 = arith.constant 0 : index
    %53 = vector.load %arg3[%c0_21, %c2_22, %c0_23] : memref<9x3x16xf32, #tpu.memory_space<vmem>>, vector<1x1x16xf32>
    %54 = vector.shape_cast %53 : vector<1x1x16xf32> to vector<1x16xf32>
    %55 = vector.shape_cast %46 : vector<1x16xf32> to vector<1x1x16xf32>
    tpu.vector_store %arg3[%c0_21, %c2_22, %c0_23], %55 {strides = array<i32>} : memref<9x3x16xf32, #tpu.memory_space<vmem>>, vector<1x1x16xf32>,
    %c0_24 = arith.constant 0 : index
    %c6 = arith.constant 6 : index
    %56 = vector.load %arg2[%c0_24, %c6] : memref<64x14xf32, #tpu.memory_space<vmem>>, vector<64x1xf32>
    %57 = vector.broadcast %4 : vector<64x1xf32> to vector<64x16xf32>
    %58 = vector.broadcast %37 : vector<1x16xf32> to vector<64x16xf32>
    %59 = arith.mulf %57, %58 : vector<64x16xf32>
    %60 = vector.broadcast %5 : vector<64x1xf32> to vector<64x16xf32>
    %61 = vector.broadcast %40 : vector<1x16xf32> to vector<64x16xf32>
    %62 = arith.mulf %60, %61 : vector<64x16xf32>
    %63 = arith.addf %59, %62 : vector<64x16xf32>
    %64 = vector.broadcast %56 : vector<64x1xf32> to vector<64x16xf32>
    %65 = arith.addf %63, %64 : vector<64x16xf32>
    %66 = math.tanh %65 : vector<64x16xf32>
    %67 = arith.mulf %66, %66 : vector<64x16xf32>
    %cst_25 = arith.constant 1.000000e+00 : f32
    %68 = vector.broadcast %cst_25 : f32 to vector<64x16xf32>
    %69 = arith.subf %68, %67 : vector<64x16xf32>
    %70 = vector.broadcast %6 : vector<64x1xf32> to vector<64x16xf32>
    %71 = arith.mulf %66, %70 : vector<64x16xf32>
    %cst_26 = arith.constant dense<0.000000e+00> : vector<16xf32>
    %72 = vector.multi_reduction <add>, %71, %cst_26 [0] : vector<64x16xf32> to vector<16xf32>
    %73 = vector.shape_cast %72 : vector<16xf32> to vector<1x16xf32>
    %74 = vector.broadcast %7 : vector<64x1xf32> to vector<64x16xf32>
    %75 = arith.mulf %66, %74 : vector<64x16xf32>
    %cst_27 = arith.constant dense<0.000000e+00> : vector<16xf32>
    %76 = vector.multi_reduction <add>, %75, %cst_27 [0] : vector<64x16xf32> to vector<16xf32>
    %77 = vector.shape_cast %76 : vector<16xf32> to vector<1x16xf32>
    %78 = vector.broadcast %8 : vector<64x1xf32> to vector<64x16xf32>
    %79 = arith.mulf %69, %78 : vector<64x16xf32>
    %cst_28 = arith.constant dense<0.000000e+00> : vector<16xf32>
    %80 = vector.multi_reduction <add>, %79, %cst_28 [0] : vector<64x16xf32> to vector<16xf32>
    %81 = vector.shape_cast %80 : vector<16xf32> to vector<1x16xf32>
    %cst_29 = arith.constant 1.11111116 : f32
    %82 = vector.broadcast %cst_29 : f32 to vector<1x16xf32>
    %83 = arith.mulf %82, %73 : vector<1x16xf32>
    %84 = arith.addf %37, %83 : vector<1x16xf32>
    %cst_30 = arith.constant 1.11111116 : f32
    %85 = vector.broadcast %cst_30 : f32 to vector<1x16xf32>
    %86 = arith.mulf %85, %77 : vector<1x16xf32>
    %87 = arith.addf %40, %86 : vector<1x16xf32>
    %cst_31 = arith.constant 0.000000e+00 : f32
    %88 = vector.broadcast %cst_31 : f32 to vector<1x16xf32>
    %89 = arith.subf %88, %81 : vector<1x16xf32>
    %90 = arith.mulf %89, %46 : vector<1x16xf32>
    %cst_32 = arith.constant 1.11111116 : f32
    %91 = vector.broadcast %cst_32 : f32 to vector<1x16xf32>
    %92 = arith.mulf %91, %90 : vector<1x16xf32>
    %93 = arith.addf %46, %92 : vector<1x16xf32>
    %c1_33 = arith.constant 1 : index
    %c0_34 = arith.constant 0 : index
    %c0_35 = arith.constant 0 : index
    %94 = vector.load %arg3[%c1_33, %c0_34, %c0_35] : memref<9x3x16xf32, #tpu.memory_space<vmem>>, vector<1x1x16xf32>
    %95 = vector.shape_cast %94 : vector<1x1x16xf32> to vector<1x16xf32>
    %96 = vector.shape_cast %84 : vector<1x16xf32> to vector<1x1x16xf32>
    tpu.vector_store %arg3[%c1_33, %c0_34, %c0_35], %96 {strides = array<i32>} : memref<9x3x16xf32, #tpu.memory_space<vmem>>, vector<1x1x16xf32>,
    %c1_36 = arith.constant 1 : index
    %c1_37 = arith.constant 1 : index
    %c0_38 = arith.constant 0 : index
    %97 = vector.load %arg3[%c1_36, %c1_37, %c0_38] : memref<9x3x16xf32, #tpu.memory_space<vmem>>, vector<1x1x16xf32>
    %98 = vector.shape_cast %97 : vector<1x1x16xf32> to vector<1x16xf32>
    %99 = vector.shape_cast %87 : vector<1x16xf32> to vector<1x1x16xf32>
    tpu.vector_store %arg3[%c1_36, %c1_37, %c0_38], %99 {strides = array<i32>} : memref<9x3x16xf32, #tpu.memory_space<vmem>>, vector<1x1x16xf32>,
    %c1_39 = arith.constant 1 : index
    %c2_40 = arith.constant 2 : index
    %c0_41 = arith.constant 0 : index
    %100 = vector.load %arg3[%c1_39, %c2_40, %c0_41] : memref<9x3x16xf32, #tpu.memory_space<vmem>>, vector<1x1x16xf32>
    %101 = vector.shape_cast %100 : vector<1x1x16xf32> to vector<1x16xf32>
    %102 = vector.shape_cast %93 : vector<1x16xf32> to vector<1x1x16xf32>
    tpu.vector_store %arg3[%c1_39, %c2_40, %c0_41], %102 {strides = array<i32>} : memref<9x3x16xf32, #tpu.memory_space<vmem>>, vector<1x1x16xf32>,
    %c0_42 = arith.constant 0 : index
    %c7 = arith.constant 7 : index
    %103 = vector.load %arg2[%c0_42, %c7] : memref<64x14xf32, #tpu.memory_space<vmem>>, vector<64x1xf32>
    %104 = vector.broadcast %4 : vector<64x1xf32> to vector<64x16xf32>
    %105 = vector.broadcast %84 : vector<1x16xf32> to vector<64x16xf32>
    %106 = arith.mulf %104, %105 : vector<64x16xf32>
    %107 = vector.broadcast %5 : vector<64x1xf32> to vector<64x16xf32>
    %108 = vector.broadcast %87 : vector<1x16xf32> to vector<64x16xf32>
    %109 = arith.mulf %107, %108 : vector<64x16xf32>
    %110 = arith.addf %106, %109 : vector<64x16xf32>
    %111 = vector.broadcast %103 : vector<64x1xf32> to vector<64x16xf32>
    %112 = arith.addf %110, %111 : vector<64x16xf32>
    %113 = math.tanh %112 : vector<64x16xf32>
    %114 = arith.mulf %113, %113 : vector<64x16xf32>
    %cst_43 = arith.constant 1.000000e+00 : f32
    %115 = vector.broadcast %cst_43 : f32 to vector<64x16xf32>
    %116 = arith.subf %115, %114 : vector<64x16xf32>
    %117 = vector.broadcast %6 : vector<64x1xf32> to vector<64x16xf32>
    %118 = arith.mulf %113, %117 : vector<64x16xf32>
    %cst_44 = arith.constant dense<0.000000e+00> : vector<16xf32>
    %119 = vector.multi_reduction <add>, %118, %cst_44 [0] : vector<64x16xf32> to vector<16xf32>
    %120 = vector.shape_cast %119 : vector<16xf32> to vector<1x16xf32>
    %121 = vector.broadcast %7 : vector<64x1xf32> to vector<64x16xf32>
    %122 = arith.mulf %113, %121 : vector<64x16xf32>
    %cst_45 = arith.constant dense<0.000000e+00> : vector<16xf32>
    %123 = vector.multi_reduction <add>, %122, %cst_45 [0] : vector<64x16xf32> to vector<16xf32>
    %124 = vector.shape_cast %123 : vector<16xf32> to vector<1x16xf32>
    %125 = vector.broadcast %8 : vector<64x1xf32> to vector<64x16xf32>
    %126 = arith.mulf %116, %125 : vector<64x16xf32>
    %cst_46 = arith.constant dense<0.000000e+00> : vector<16xf32>
    %127 = vector.multi_reduction <add>, %126, %cst_46 [0] : vector<64x16xf32> to vector<16xf32>
    %128 = vector.shape_cast %127 : vector<16xf32> to vector<1x16xf32>
    %cst_47 = arith.constant 1.11111116 : f32
    %129 = vector.broadcast %cst_47 : f32 to vector<1x16xf32>
    %130 = arith.mulf %129, %120 : vector<1x16xf32>
    %131 = arith.addf %84, %130 : vector<1x16xf32>
    %cst_48 = arith.constant 1.11111116 : f32
    %132 = vector.broadcast %cst_48 : f32 to vector<1x16xf32>
    %133 = arith.mulf %132, %124 : vector<1x16xf32>
    %134 = arith.addf %87, %133 : vector<1x16xf32>
    %cst_49 = arith.constant 0.000000e+00 : f32
    %135 = vector.broadcast %cst_49 : f32 to vector<1x16xf32>
    %136 = arith.subf %135, %128 : vector<1x16xf32>
    %137 = arith.mulf %136, %93 : vector<1x16xf32>
    %cst_50 = arith.constant 1.11111116 : f32
    %138 = vector.broadcast %cst_50 : f32 to vector<1x16xf32>
    %139 = arith.mulf %138, %137 : vector<1x16xf32>
    %140 = arith.addf %93, %139 : vector<1x16xf32>
    %c2_51 = arith.constant 2 : index
    %c0_52 = arith.constant 0 : index
    %c0_53 = arith.constant 0 : index
    %141 = vector.load %arg3[%c2_51, %c0_52, %c0_53] : memref<9x3x16xf32, #tpu.memory_space<vmem>>, vector<1x1x16xf32>
    %142 = vector.shape_cast %141 : vector<1x1x16xf32> to vector<1x16xf32>
    %143 = vector.shape_cast %131 : vector<1x16xf32> to vector<1x1x16xf32>
    tpu.vector_store %arg3[%c2_51, %c0_52, %c0_53], %143 {strides = array<i32>} : memref<9x3x16xf32, #tpu.memory_space<vmem>>, vector<1x1x16xf32>,
    %c2_54 = arith.constant 2 : index
    %c1_55 = arith.constant 1 : index
    %c0_56 = arith.constant 0 : index
    %144 = vector.load %arg3[%c2_54, %c1_55, %c0_56] : memref<9x3x16xf32, #tpu.memory_space<vmem>>, vector<1x1x16xf32>
    %145 = vector.shape_cast %144 : vector<1x1x16xf32> to vector<1x16xf32>
    %146 = vector.shape_cast %134 : vector<1x16xf32> to vector<1x1x16xf32>
    tpu.vector_store %arg3[%c2_54, %c1_55, %c0_56], %146 {strides = array<i32>} : memref<9x3x16xf32, #tpu.memory_space<vmem>>, vector<1x1x16xf32>,
    %c2_57 = arith.constant 2 : index
    %c2_58 = arith.constant 2 : index
    %c0_59 = arith.constant 0 : index
    %147 = vector.load %arg3[%c2_57, %c2_58, %c0_59] : memref<9x3x16xf32, #tpu.memory_space<vmem>>, vector<1x1x16xf32>
    %148 = vector.shape_cast %147 : vector<1x1x16xf32> to vector<1x16xf32>
    %149 = vector.shape_cast %140 : vector<1x16xf32> to vector<1x1x16xf32>
    tpu.vector_store %arg3[%c2_57, %c2_58, %c0_59], %149 {strides = array<i32>} : memref<9x3x16xf32, #tpu.memory_space<vmem>>, vector<1x1x16xf32>,
    %c0_60 = arith.constant 0 : index
    %c8 = arith.constant 8 : index
    %150 = vector.load %arg2[%c0_60, %c8] : memref<64x14xf32, #tpu.memory_space<vmem>>, vector<64x1xf32>
    %151 = vector.broadcast %4 : vector<64x1xf32> to vector<64x16xf32>
    %152 = vector.broadcast %131 : vector<1x16xf32> to vector<64x16xf32>
    %153 = arith.mulf %151, %152 : vector<64x16xf32>
    %154 = vector.broadcast %5 : vector<64x1xf32> to vector<64x16xf32>
    %155 = vector.broadcast %134 : vector<1x16xf32> to vector<64x16xf32>
    %156 = arith.mulf %154, %155 : vector<64x16xf32>
    %157 = arith.addf %153, %156 : vector<64x16xf32>
    %158 = vector.broadcast %150 : vector<64x1xf32> to vector<64x16xf32>
    %159 = arith.addf %157, %158 : vector<64x16xf32>
    %160 = math.tanh %159 : vector<64x16xf32>
    %161 = arith.mulf %160, %160 : vector<64x16xf32>
    %cst_61 = arith.constant 1.000000e+00 : f32
    %162 = vector.broadcast %cst_61 : f32 to vector<64x16xf32>
    %163 = arith.subf %162, %161 : vector<64x16xf32>
    %164 = vector.broadcast %6 : vector<64x1xf32> to vector<64x16xf32>
    %165 = arith.mulf %160, %164 : vector<64x16xf32>
    %cst_62 = arith.constant dense<0.000000e+00> : vector<16xf32>
    %166 = vector.multi_reduction <add>, %165, %cst_62 [0] : vector<64x16xf32> to vector<16xf32>
    %167 = vector.shape_cast %166 : vector<16xf32> to vector<1x16xf32>
    %168 = vector.broadcast %7 : vector<64x1xf32> to vector<64x16xf32>
    %169 = arith.mulf %160, %168 : vector<64x16xf32>
    %cst_63 = arith.constant dense<0.000000e+00> : vector<16xf32>
    %170 = vector.multi_reduction <add>, %169, %cst_63 [0] : vector<64x16xf32> to vector<16xf32>
    %171 = vector.shape_cast %170 : vector<16xf32> to vector<1x16xf32>
    %172 = vector.broadcast %8 : vector<64x1xf32> to vector<64x16xf32>
    %173 = arith.mulf %163, %172 : vector<64x16xf32>
    %cst_64 = arith.constant dense<0.000000e+00> : vector<16xf32>
    %174 = vector.multi_reduction <add>, %173, %cst_64 [0] : vector<64x16xf32> to vector<16xf32>
    %175 = vector.shape_cast %174 : vector<16xf32> to vector<1x16xf32>
    %cst_65 = arith.constant 1.11111116 : f32
    %176 = vector.broadcast %cst_65 : f32 to vector<1x16xf32>
    %177 = arith.mulf %176, %167 : vector<1x16xf32>
    %178 = arith.addf %131, %177 : vector<1x16xf32>
    %cst_66 = arith.constant 1.11111116 : f32
    %179 = vector.broadcast %cst_66 : f32 to vector<1x16xf32>
    %180 = arith.mulf %179, %171 : vector<1x16xf32>
    %181 = arith.addf %134, %180 : vector<1x16xf32>
    %cst_67 = arith.constant 0.000000e+00 : f32
    %182 = vector.broadcast %cst_67 : f32 to vector<1x16xf32>
    %183 = arith.subf %182, %175 : vector<1x16xf32>
    %184 = arith.mulf %183, %140 : vector<1x16xf32>
    %cst_68 = arith.constant 1.11111116 : f32
    %185 = vector.broadcast %cst_68 : f32 to vector<1x16xf32>
    %186 = arith.mulf %185, %184 : vector<1x16xf32>
    %187 = arith.addf %140, %186 : vector<1x16xf32>
    %c3_69 = arith.constant 3 : index
    %c0_70 = arith.constant 0 : index
    %c0_71 = arith.constant 0 : index
    %188 = vector.load %arg3[%c3_69, %c0_70, %c0_71] : memref<9x3x16xf32, #tpu.memory_space<vmem>>, vector<1x1x16xf32>
    %189 = vector.shape_cast %188 : vector<1x1x16xf32> to vector<1x16xf32>
    %190 = vector.shape_cast %178 : vector<1x16xf32> to vector<1x1x16xf32>
    tpu.vector_store %arg3[%c3_69, %c0_70, %c0_71], %190 {strides = array<i32>} : memref<9x3x16xf32, #tpu.memory_space<vmem>>, vector<1x1x16xf32>,
    %c3_72 = arith.constant 3 : index
    %c1_73 = arith.constant 1 : index
    %c0_74 = arith.constant 0 : index
    %191 = vector.load %arg3[%c3_72, %c1_73, %c0_74] : memref<9x3x16xf32, #tpu.memory_space<vmem>>, vector<1x1x16xf32>
    %192 = vector.shape_cast %191 : vector<1x1x16xf32> to vector<1x16xf32>
    %193 = vector.shape_cast %181 : vector<1x16xf32> to vector<1x1x16xf32>
    tpu.vector_store %arg3[%c3_72, %c1_73, %c0_74], %193 {strides = array<i32>} : memref<9x3x16xf32, #tpu.memory_space<vmem>>, vector<1x1x16xf32>,
    %c3_75 = arith.constant 3 : index
    %c2_76 = arith.constant 2 : index
    %c0_77 = arith.constant 0 : index
    %194 = vector.load %arg3[%c3_75, %c2_76, %c0_77] : memref<9x3x16xf32, #tpu.memory_space<vmem>>, vector<1x1x16xf32>
    %195 = vector.shape_cast %194 : vector<1x1x16xf32> to vector<1x16xf32>
    %196 = vector.shape_cast %187 : vector<1x16xf32> to vector<1x1x16xf32>
    tpu.vector_store %arg3[%c3_75, %c2_76, %c0_77], %196 {strides = array<i32>} : memref<9x3x16xf32, #tpu.memory_space<vmem>>, vector<1x1x16xf32>,
    %c0_78 = arith.constant 0 : index
    %c9 = arith.constant 9 : index
    %197 = vector.load %arg2[%c0_78, %c9] : memref<64x14xf32, #tpu.memory_space<vmem>>, vector<64x1xf32>
    %198 = vector.broadcast %4 : vector<64x1xf32> to vector<64x16xf32>
    %199 = vector.broadcast %178 : vector<1x16xf32> to vector<64x16xf32>
    %200 = arith.mulf %198, %199 : vector<64x16xf32>
    %201 = vector.broadcast %5 : vector<64x1xf32> to vector<64x16xf32>
    %202 = vector.broadcast %181 : vector<1x16xf32> to vector<64x16xf32>
    %203 = arith.mulf %201, %202 : vector<64x16xf32>
    %204 = arith.addf %200, %203 : vector<64x16xf32>
    %205 = vector.broadcast %197 : vector<64x1xf32> to vector<64x16xf32>
    %206 = arith.addf %204, %205 : vector<64x16xf32>
    %207 = math.tanh %206 : vector<64x16xf32>
    %208 = arith.mulf %207, %207 : vector<64x16xf32>
    %cst_79 = arith.constant 1.000000e+00 : f32
    %209 = vector.broadcast %cst_79 : f32 to vector<64x16xf32>
    %210 = arith.subf %209, %208 : vector<64x16xf32>
    %211 = vector.broadcast %6 : vector<64x1xf32> to vector<64x16xf32>
    %212 = arith.mulf %207, %211 : vector<64x16xf32>
    %cst_80 = arith.constant dense<0.000000e+00> : vector<16xf32>
    %213 = vector.multi_reduction <add>, %212, %cst_80 [0] : vector<64x16xf32> to vector<16xf32>
    %214 = vector.shape_cast %213 : vector<16xf32> to vector<1x16xf32>
    %215 = vector.broadcast %7 : vector<64x1xf32> to vector<64x16xf32>
    %216 = arith.mulf %207, %215 : vector<64x16xf32>
    %cst_81 = arith.constant dense<0.000000e+00> : vector<16xf32>
    %217 = vector.multi_reduction <add>, %216, %cst_81 [0] : vector<64x16xf32> to vector<16xf32>
    %218 = vector.shape_cast %217 : vector<16xf32> to vector<1x16xf32>
    %219 = vector.broadcast %8 : vector<64x1xf32> to vector<64x16xf32>
    %220 = arith.mulf %210, %219 : vector<64x16xf32>
    %cst_82 = arith.constant dense<0.000000e+00> : vector<16xf32>
    %221 = vector.multi_reduction <add>, %220, %cst_82 [0] : vector<64x16xf32> to vector<16xf32>
    %222 = vector.shape_cast %221 : vector<16xf32> to vector<1x16xf32>
    %cst_83 = arith.constant 1.11111116 : f32
    %223 = vector.broadcast %cst_83 : f32 to vector<1x16xf32>
    %224 = arith.mulf %223, %214 : vector<1x16xf32>
    %225 = arith.addf %178, %224 : vector<1x16xf32>
    %cst_84 = arith.constant 1.11111116 : f32
    %226 = vector.broadcast %cst_84 : f32 to vector<1x16xf32>
    %227 = arith.mulf %226, %218 : vector<1x16xf32>
    %228 = arith.addf %181, %227 : vector<1x16xf32>
    %cst_85 = arith.constant 0.000000e+00 : f32
    %229 = vector.broadcast %cst_85 : f32 to vector<1x16xf32>
    %230 = arith.subf %229, %222 : vector<1x16xf32>
    %231 = arith.mulf %230, %187 : vector<1x16xf32>
    %cst_86 = arith.constant 1.11111116 : f32
    %232 = vector.broadcast %cst_86 : f32 to vector<1x16xf32>
    %233 = arith.mulf %232, %231 : vector<1x16xf32>
    %234 = arith.addf %187, %233 : vector<1x16xf32>
    %c4_87 = arith.constant 4 : index
    %c0_88 = arith.constant 0 : index
    %c0_89 = arith.constant 0 : index
    %235 = vector.load %arg3[%c4_87, %c0_88, %c0_89] : memref<9x3x16xf32, #tpu.memory_space<vmem>>, vector<1x1x16xf32>
    %236 = vector.shape_cast %235 : vector<1x1x16xf32> to vector<1x16xf32>
    %237 = vector.shape_cast %225 : vector<1x16xf32> to vector<1x1x16xf32>
    tpu.vector_store %arg3[%c4_87, %c0_88, %c0_89], %237 {strides = array<i32>} : memref<9x3x16xf32, #tpu.memory_space<vmem>>, vector<1x1x16xf32>,
    %c4_90 = arith.constant 4 : index
    %c1_91 = arith.constant 1 : index
    %c0_92 = arith.constant 0 : index
    %238 = vector.load %arg3[%c4_90, %c1_91, %c0_92] : memref<9x3x16xf32, #tpu.memory_space<vmem>>, vector<1x1x16xf32>
    %239 = vector.shape_cast %238 : vector<1x1x16xf32> to vector<1x16xf32>
    %240 = vector.shape_cast %228 : vector<1x16xf32> to vector<1x1x16xf32>
    tpu.vector_store %arg3[%c4_90, %c1_91, %c0_92], %240 {strides = array<i32>} : memref<9x3x16xf32, #tpu.memory_space<vmem>>, vector<1x1x16xf32>,
    %c4_93 = arith.constant 4 : index
    %c2_94 = arith.constant 2 : index
    %c0_95 = arith.constant 0 : index
    %241 = vector.load %arg3[%c4_93, %c2_94, %c0_95] : memref<9x3x16xf32, #tpu.memory_space<vmem>>, vector<1x1x16xf32>
    %242 = vector.shape_cast %241 : vector<1x1x16xf32> to vector<1x16xf32>
    %243 = vector.shape_cast %234 : vector<1x16xf32> to vector<1x1x16xf32>
    tpu.vector_store %arg3[%c4_93, %c2_94, %c0_95], %243 {strides = array<i32>} : memref<9x3x16xf32, #tpu.memory_space<vmem>>, vector<1x1x16xf32>,
    %c0_96 = arith.constant 0 : index
    %c10 = arith.constant 10 : index
    %244 = vector.load %arg2[%c0_96, %c10] : memref<64x14xf32, #tpu.memory_space<vmem>>, vector<64x1xf32>
    %245 = vector.broadcast %4 : vector<64x1xf32> to vector<64x16xf32>
    %246 = vector.broadcast %225 : vector<1x16xf32> to vector<64x16xf32>
    %247 = arith.mulf %245, %246 : vector<64x16xf32>
    %248 = vector.broadcast %5 : vector<64x1xf32> to vector<64x16xf32>
    %249 = vector.broadcast %228 : vector<1x16xf32> to vector<64x16xf32>
    %250 = arith.mulf %248, %249 : vector<64x16xf32>
    %251 = arith.addf %247, %250 : vector<64x16xf32>
    %252 = vector.broadcast %244 : vector<64x1xf32> to vector<64x16xf32>
    %253 = arith.addf %251, %252 : vector<64x16xf32>
    %254 = math.tanh %253 : vector<64x16xf32>
    %255 = arith.mulf %254, %254 : vector<64x16xf32>
    %cst_97 = arith.constant 1.000000e+00 : f32
    %256 = vector.broadcast %cst_97 : f32 to vector<64x16xf32>
    %257 = arith.subf %256, %255 : vector<64x16xf32>
    %258 = vector.broadcast %6 : vector<64x1xf32> to vector<64x16xf32>
    %259 = arith.mulf %254, %258 : vector<64x16xf32>
    %cst_98 = arith.constant dense<0.000000e+00> : vector<16xf32>
    %260 = vector.multi_reduction <add>, %259, %cst_98 [0] : vector<64x16xf32> to vector<16xf32>
    %261 = vector.shape_cast %260 : vector<16xf32> to vector<1x16xf32>
    %262 = vector.broadcast %7 : vector<64x1xf32> to vector<64x16xf32>
    %263 = arith.mulf %254, %262 : vector<64x16xf32>
    %cst_99 = arith.constant dense<0.000000e+00> : vector<16xf32>
    %264 = vector.multi_reduction <add>, %263, %cst_99 [0] : vector<64x16xf32> to vector<16xf32>
    %265 = vector.shape_cast %264 : vector<16xf32> to vector<1x16xf32>
    %266 = vector.broadcast %8 : vector<64x1xf32> to vector<64x16xf32>
    %267 = arith.mulf %257, %266 : vector<64x16xf32>
    %cst_100 = arith.constant dense<0.000000e+00> : vector<16xf32>
    %268 = vector.multi_reduction <add>, %267, %cst_100 [0] : vector<64x16xf32> to vector<16xf32>
    %269 = vector.shape_cast %268 : vector<16xf32> to vector<1x16xf32>
    %cst_101 = arith.constant 1.11111116 : f32
    %270 = vector.broadcast %cst_101 : f32 to vector<1x16xf32>
    %271 = arith.mulf %270, %261 : vector<1x16xf32>
    %272 = arith.addf %225, %271 : vector<1x16xf32>
    %cst_102 = arith.constant 1.11111116 : f32
    %273 = vector.broadcast %cst_102 : f32 to vector<1x16xf32>
    %274 = arith.mulf %273, %265 : vector<1x16xf32>
    %275 = arith.addf %228, %274 : vector<1x16xf32>
    %cst_103 = arith.constant 0.000000e+00 : f32
    %276 = vector.broadcast %cst_103 : f32 to vector<1x16xf32>
    %277 = arith.subf %276, %269 : vector<1x16xf32>
    %278 = arith.mulf %277, %234 : vector<1x16xf32>
    %cst_104 = arith.constant 1.11111116 : f32
    %279 = vector.broadcast %cst_104 : f32 to vector<1x16xf32>
    %280 = arith.mulf %279, %278 : vector<1x16xf32>
    %281 = arith.addf %234, %280 : vector<1x16xf32>
    %c5_105 = arith.constant 5 : index
    %c0_106 = arith.constant 0 : index
    %c0_107 = arith.constant 0 : index
    %282 = vector.load %arg3[%c5_105, %c0_106, %c0_107] : memref<9x3x16xf32, #tpu.memory_space<vmem>>, vector<1x1x16xf32>
    %283 = vector.shape_cast %282 : vector<1x1x16xf32> to vector<1x16xf32>
    %284 = vector.shape_cast %272 : vector<1x16xf32> to vector<1x1x16xf32>
    tpu.vector_store %arg3[%c5_105, %c0_106, %c0_107], %284 {strides = array<i32>} : memref<9x3x16xf32, #tpu.memory_space<vmem>>, vector<1x1x16xf32>,
    %c5_108 = arith.constant 5 : index
    %c1_109 = arith.constant 1 : index
    %c0_110 = arith.constant 0 : index
    %285 = vector.load %arg3[%c5_108, %c1_109, %c0_110] : memref<9x3x16xf32, #tpu.memory_space<vmem>>, vector<1x1x16xf32>
    %286 = vector.shape_cast %285 : vector<1x1x16xf32> to vector<1x16xf32>
    %287 = vector.shape_cast %275 : vector<1x16xf32> to vector<1x1x16xf32>
    tpu.vector_store %arg3[%c5_108, %c1_109, %c0_110], %287 {strides = array<i32>} : memref<9x3x16xf32, #tpu.memory_space<vmem>>, vector<1x1x16xf32>,
    %c5_111 = arith.constant 5 : index
    %c2_112 = arith.constant 2 : index
    %c0_113 = arith.constant 0 : index
    %288 = vector.load %arg3[%c5_111, %c2_112, %c0_113] : memref<9x3x16xf32, #tpu.memory_space<vmem>>, vector<1x1x16xf32>
    %289 = vector.shape_cast %288 : vector<1x1x16xf32> to vector<1x16xf32>
    %290 = vector.shape_cast %281 : vector<1x16xf32> to vector<1x1x16xf32>
    tpu.vector_store %arg3[%c5_111, %c2_112, %c0_113], %290 {strides = array<i32>} : memref<9x3x16xf32, #tpu.memory_space<vmem>>, vector<1x1x16xf32>,
    %c0_114 = arith.constant 0 : index
    %c11 = arith.constant 11 : index
    %291 = vector.load %arg2[%c0_114, %c11] : memref<64x14xf32, #tpu.memory_space<vmem>>, vector<64x1xf32>
    %292 = vector.broadcast %4 : vector<64x1xf32> to vector<64x16xf32>
    %293 = vector.broadcast %272 : vector<1x16xf32> to vector<64x16xf32>
    %294 = arith.mulf %292, %293 : vector<64x16xf32>
    %295 = vector.broadcast %5 : vector<64x1xf32> to vector<64x16xf32>
    %296 = vector.broadcast %275 : vector<1x16xf32> to vector<64x16xf32>
    %297 = arith.mulf %295, %296 : vector<64x16xf32>
    %298 = arith.addf %294, %297 : vector<64x16xf32>
    %299 = vector.broadcast %291 : vector<64x1xf32> to vector<64x16xf32>
    %300 = arith.addf %298, %299 : vector<64x16xf32>
    %301 = math.tanh %300 : vector<64x16xf32>
    %302 = arith.mulf %301, %301 : vector<64x16xf32>
    %cst_115 = arith.constant 1.000000e+00 : f32
    %303 = vector.broadcast %cst_115 : f32 to vector<64x16xf32>
    %304 = arith.subf %303, %302 : vector<64x16xf32>
    %305 = vector.broadcast %6 : vector<64x1xf32> to vector<64x16xf32>
    %306 = arith.mulf %301, %305 : vector<64x16xf32>
    %cst_116 = arith.constant dense<0.000000e+00> : vector<16xf32>
    %307 = vector.multi_reduction <add>, %306, %cst_116 [0] : vector<64x16xf32> to vector<16xf32>
    %308 = vector.shape_cast %307 : vector<16xf32> to vector<1x16xf32>
    %309 = vector.broadcast %7 : vector<64x1xf32> to vector<64x16xf32>
    %310 = arith.mulf %301, %309 : vector<64x16xf32>
    %cst_117 = arith.constant dense<0.000000e+00> : vector<16xf32>
    %311 = vector.multi_reduction <add>, %310, %cst_117 [0] : vector<64x16xf32> to vector<16xf32>
    %312 = vector.shape_cast %311 : vector<16xf32> to vector<1x16xf32>
    %313 = vector.broadcast %8 : vector<64x1xf32> to vector<64x16xf32>
    %314 = arith.mulf %304, %313 : vector<64x16xf32>
    %cst_118 = arith.constant dense<0.000000e+00> : vector<16xf32>
    %315 = vector.multi_reduction <add>, %314, %cst_118 [0] : vector<64x16xf32> to vector<16xf32>
    %316 = vector.shape_cast %315 : vector<16xf32> to vector<1x16xf32>
    %cst_119 = arith.constant 1.11111116 : f32
    %317 = vector.broadcast %cst_119 : f32 to vector<1x16xf32>
    %318 = arith.mulf %317, %308 : vector<1x16xf32>
    %319 = arith.addf %272, %318 : vector<1x16xf32>
    %cst_120 = arith.constant 1.11111116 : f32
    %320 = vector.broadcast %cst_120 : f32 to vector<1x16xf32>
    %321 = arith.mulf %320, %312 : vector<1x16xf32>
    %322 = arith.addf %275, %321 : vector<1x16xf32>
    %cst_121 = arith.constant 0.000000e+00 : f32
    %323 = vector.broadcast %cst_121 : f32 to vector<1x16xf32>
    %324 = arith.subf %323, %316 : vector<1x16xf32>
    %325 = arith.mulf %324, %281 : vector<1x16xf32>
    %cst_122 = arith.constant 1.11111116 : f32
    %326 = vector.broadcast %cst_122 : f32 to vector<1x16xf32>
    %327 = arith.mulf %326, %325 : vector<1x16xf32>
    %328 = arith.addf %281, %327 : vector<1x16xf32>
    %c6_123 = arith.constant 6 : index
    %c0_124 = arith.constant 0 : index
    %c0_125 = arith.constant 0 : index
    %329 = vector.load %arg3[%c6_123, %c0_124, %c0_125] : memref<9x3x16xf32, #tpu.memory_space<vmem>>, vector<1x1x16xf32>
    %330 = vector.shape_cast %329 : vector<1x1x16xf32> to vector<1x16xf32>
    %331 = vector.shape_cast %319 : vector<1x16xf32> to vector<1x1x16xf32>
    tpu.vector_store %arg3[%c6_123, %c0_124, %c0_125], %331 {strides = array<i32>} : memref<9x3x16xf32, #tpu.memory_space<vmem>>, vector<1x1x16xf32>,
    %c6_126 = arith.constant 6 : index
    %c1_127 = arith.constant 1 : index
    %c0_128 = arith.constant 0 : index
    %332 = vector.load %arg3[%c6_126, %c1_127, %c0_128] : memref<9x3x16xf32, #tpu.memory_space<vmem>>, vector<1x1x16xf32>
    %333 = vector.shape_cast %332 : vector<1x1x16xf32> to vector<1x16xf32>
    %334 = vector.shape_cast %322 : vector<1x16xf32> to vector<1x1x16xf32>
    tpu.vector_store %arg3[%c6_126, %c1_127, %c0_128], %334 {strides = array<i32>} : memref<9x3x16xf32, #tpu.memory_space<vmem>>, vector<1x1x16xf32>,
    %c6_129 = arith.constant 6 : index
    %c2_130 = arith.constant 2 : index
    %c0_131 = arith.constant 0 : index
    %335 = vector.load %arg3[%c6_129, %c2_130, %c0_131] : memref<9x3x16xf32, #tpu.memory_space<vmem>>, vector<1x1x16xf32>
    %336 = vector.shape_cast %335 : vector<1x1x16xf32> to vector<1x16xf32>
    %337 = vector.shape_cast %328 : vector<1x16xf32> to vector<1x1x16xf32>
    tpu.vector_store %arg3[%c6_129, %c2_130, %c0_131], %337 {strides = array<i32>} : memref<9x3x16xf32, #tpu.memory_space<vmem>>, vector<1x1x16xf32>,
    %c0_132 = arith.constant 0 : index
    %c12 = arith.constant 12 : index
    %338 = vector.load %arg2[%c0_132, %c12] : memref<64x14xf32, #tpu.memory_space<vmem>>, vector<64x1xf32>
    %339 = vector.broadcast %4 : vector<64x1xf32> to vector<64x16xf32>
    %340 = vector.broadcast %319 : vector<1x16xf32> to vector<64x16xf32>
    %341 = arith.mulf %339, %340 : vector<64x16xf32>
    %342 = vector.broadcast %5 : vector<64x1xf32> to vector<64x16xf32>
    %343 = vector.broadcast %322 : vector<1x16xf32> to vector<64x16xf32>
    %344 = arith.mulf %342, %343 : vector<64x16xf32>
    %345 = arith.addf %341, %344 : vector<64x16xf32>
    %346 = vector.broadcast %338 : vector<64x1xf32> to vector<64x16xf32>
    %347 = arith.addf %345, %346 : vector<64x16xf32>
    %348 = math.tanh %347 : vector<64x16xf32>
    %349 = arith.mulf %348, %348 : vector<64x16xf32>
    %cst_133 = arith.constant 1.000000e+00 : f32
    %350 = vector.broadcast %cst_133 : f32 to vector<64x16xf32>
    %351 = arith.subf %350, %349 : vector<64x16xf32>
    %352 = vector.broadcast %6 : vector<64x1xf32> to vector<64x16xf32>
    %353 = arith.mulf %348, %352 : vector<64x16xf32>
    %cst_134 = arith.constant dense<0.000000e+00> : vector<16xf32>
    %354 = vector.multi_reduction <add>, %353, %cst_134 [0] : vector<64x16xf32> to vector<16xf32>
    %355 = vector.shape_cast %354 : vector<16xf32> to vector<1x16xf32>
    %356 = vector.broadcast %7 : vector<64x1xf32> to vector<64x16xf32>
    %357 = arith.mulf %348, %356 : vector<64x16xf32>
    %cst_135 = arith.constant dense<0.000000e+00> : vector<16xf32>
    %358 = vector.multi_reduction <add>, %357, %cst_135 [0] : vector<64x16xf32> to vector<16xf32>
    %359 = vector.shape_cast %358 : vector<16xf32> to vector<1x16xf32>
    %360 = vector.broadcast %8 : vector<64x1xf32> to vector<64x16xf32>
    %361 = arith.mulf %351, %360 : vector<64x16xf32>
    %cst_136 = arith.constant dense<0.000000e+00> : vector<16xf32>
    %362 = vector.multi_reduction <add>, %361, %cst_136 [0] : vector<64x16xf32> to vector<16xf32>
    %363 = vector.shape_cast %362 : vector<16xf32> to vector<1x16xf32>
    %cst_137 = arith.constant 1.11111116 : f32
    %364 = vector.broadcast %cst_137 : f32 to vector<1x16xf32>
    %365 = arith.mulf %364, %355 : vector<1x16xf32>
    %366 = arith.addf %319, %365 : vector<1x16xf32>
    %cst_138 = arith.constant 1.11111116 : f32
    %367 = vector.broadcast %cst_138 : f32 to vector<1x16xf32>
    %368 = arith.mulf %367, %359 : vector<1x16xf32>
    %369 = arith.addf %322, %368 : vector<1x16xf32>
    %cst_139 = arith.constant 0.000000e+00 : f32
    %370 = vector.broadcast %cst_139 : f32 to vector<1x16xf32>
    %371 = arith.subf %370, %363 : vector<1x16xf32>
    %372 = arith.mulf %371, %328 : vector<1x16xf32>
    %cst_140 = arith.constant 1.11111116 : f32
    %373 = vector.broadcast %cst_140 : f32 to vector<1x16xf32>
    %374 = arith.mulf %373, %372 : vector<1x16xf32>
    %375 = arith.addf %328, %374 : vector<1x16xf32>
    %c7_141 = arith.constant 7 : index
    %c0_142 = arith.constant 0 : index
    %c0_143 = arith.constant 0 : index
    %376 = vector.load %arg3[%c7_141, %c0_142, %c0_143] : memref<9x3x16xf32, #tpu.memory_space<vmem>>, vector<1x1x16xf32>
    %377 = vector.shape_cast %376 : vector<1x1x16xf32> to vector<1x16xf32>
    %378 = vector.shape_cast %366 : vector<1x16xf32> to vector<1x1x16xf32>
    tpu.vector_store %arg3[%c7_141, %c0_142, %c0_143], %378 {strides = array<i32>} : memref<9x3x16xf32, #tpu.memory_space<vmem>>, vector<1x1x16xf32>,
    %c7_144 = arith.constant 7 : index
    %c1_145 = arith.constant 1 : index
    %c0_146 = arith.constant 0 : index
    %379 = vector.load %arg3[%c7_144, %c1_145, %c0_146] : memref<9x3x16xf32, #tpu.memory_space<vmem>>, vector<1x1x16xf32>
    %380 = vector.shape_cast %379 : vector<1x1x16xf32> to vector<1x16xf32>
    %381 = vector.shape_cast %369 : vector<1x16xf32> to vector<1x1x16xf32>
    tpu.vector_store %arg3[%c7_144, %c1_145, %c0_146], %381 {strides = array<i32>} : memref<9x3x16xf32, #tpu.memory_space<vmem>>, vector<1x1x16xf32>,
    %c7_147 = arith.constant 7 : index
    %c2_148 = arith.constant 2 : index
    %c0_149 = arith.constant 0 : index
    %382 = vector.load %arg3[%c7_147, %c2_148, %c0_149] : memref<9x3x16xf32, #tpu.memory_space<vmem>>, vector<1x1x16xf32>
    %383 = vector.shape_cast %382 : vector<1x1x16xf32> to vector<1x16xf32>
    %384 = vector.shape_cast %375 : vector<1x16xf32> to vector<1x1x16xf32>
    tpu.vector_store %arg3[%c7_147, %c2_148, %c0_149], %384 {strides = array<i32>} : memref<9x3x16xf32, #tpu.memory_space<vmem>>, vector<1x1x16xf32>,
    %c0_150 = arith.constant 0 : index
    %c13 = arith.constant 13 : index
    %385 = vector.load %arg2[%c0_150, %c13] : memref<64x14xf32, #tpu.memory_space<vmem>>, vector<64x1xf32>
    %386 = vector.broadcast %4 : vector<64x1xf32> to vector<64x16xf32>
    %387 = vector.broadcast %366 : vector<1x16xf32> to vector<64x16xf32>
    %388 = arith.mulf %386, %387 : vector<64x16xf32>
    %389 = vector.broadcast %5 : vector<64x1xf32> to vector<64x16xf32>
    %390 = vector.broadcast %369 : vector<1x16xf32> to vector<64x16xf32>
    %391 = arith.mulf %389, %390 : vector<64x16xf32>
    %392 = arith.addf %388, %391 : vector<64x16xf32>
    %393 = vector.broadcast %385 : vector<64x1xf32> to vector<64x16xf32>
    %394 = arith.addf %392, %393 : vector<64x16xf32>
    %395 = math.tanh %394 : vector<64x16xf32>
    %396 = arith.mulf %395, %395 : vector<64x16xf32>
    %cst_151 = arith.constant 1.000000e+00 : f32
    %397 = vector.broadcast %cst_151 : f32 to vector<64x16xf32>
    %398 = arith.subf %397, %396 : vector<64x16xf32>
    %399 = vector.broadcast %6 : vector<64x1xf32> to vector<64x16xf32>
    %400 = arith.mulf %395, %399 : vector<64x16xf32>
    %cst_152 = arith.constant dense<0.000000e+00> : vector<16xf32>
    %401 = vector.multi_reduction <add>, %400, %cst_152 [0] : vector<64x16xf32> to vector<16xf32>
    %402 = vector.shape_cast %401 : vector<16xf32> to vector<1x16xf32>
    %403 = vector.broadcast %7 : vector<64x1xf32> to vector<64x16xf32>
    %404 = arith.mulf %395, %403 : vector<64x16xf32>
    %cst_153 = arith.constant dense<0.000000e+00> : vector<16xf32>
    %405 = vector.multi_reduction <add>, %404, %cst_153 [0] : vector<64x16xf32> to vector<16xf32>
    %406 = vector.shape_cast %405 : vector<16xf32> to vector<1x16xf32>
    %407 = vector.broadcast %8 : vector<64x1xf32> to vector<64x16xf32>
    %408 = arith.mulf %398, %407 : vector<64x16xf32>
    %cst_154 = arith.constant dense<0.000000e+00> : vector<16xf32>
    %409 = vector.multi_reduction <add>, %408, %cst_154 [0] : vector<64x16xf32> to vector<16xf32>
    %410 = vector.shape_cast %409 : vector<16xf32> to vector<1x16xf32>
    %cst_155 = arith.constant 1.11111116 : f32
    %411 = vector.broadcast %cst_155 : f32 to vector<1x16xf32>
    %412 = arith.mulf %411, %402 : vector<1x16xf32>
    %413 = arith.addf %366, %412 : vector<1x16xf32>
    %cst_156 = arith.constant 1.11111116 : f32
    %414 = vector.broadcast %cst_156 : f32 to vector<1x16xf32>
    %415 = arith.mulf %414, %406 : vector<1x16xf32>
    %416 = arith.addf %369, %415 : vector<1x16xf32>
    %cst_157 = arith.constant 0.000000e+00 : f32
    %417 = vector.broadcast %cst_157 : f32 to vector<1x16xf32>
    %418 = arith.subf %417, %410 : vector<1x16xf32>
    %419 = arith.mulf %418, %375 : vector<1x16xf32>
    %cst_158 = arith.constant 1.11111116 : f32
    %420 = vector.broadcast %cst_158 : f32 to vector<1x16xf32>
    %421 = arith.mulf %420, %419 : vector<1x16xf32>
    %422 = arith.addf %375, %421 : vector<1x16xf32>
    %c8_159 = arith.constant 8 : index
    %c0_160 = arith.constant 0 : index
    %c0_161 = arith.constant 0 : index
    %423 = vector.load %arg3[%c8_159, %c0_160, %c0_161] : memref<9x3x16xf32, #tpu.memory_space<vmem>>, vector<1x1x16xf32>
    %424 = vector.shape_cast %423 : vector<1x1x16xf32> to vector<1x16xf32>
    %425 = vector.shape_cast %413 : vector<1x16xf32> to vector<1x1x16xf32>
    tpu.vector_store %arg3[%c8_159, %c0_160, %c0_161], %425 {strides = array<i32>} : memref<9x3x16xf32, #tpu.memory_space<vmem>>, vector<1x1x16xf32>,
    %c8_162 = arith.constant 8 : index
    %c1_163 = arith.constant 1 : index
    %c0_164 = arith.constant 0 : index
    %426 = vector.load %arg3[%c8_162, %c1_163, %c0_164] : memref<9x3x16xf32, #tpu.memory_space<vmem>>, vector<1x1x16xf32>
    %427 = vector.shape_cast %426 : vector<1x1x16xf32> to vector<1x16xf32>
    %428 = vector.shape_cast %416 : vector<1x16xf32> to vector<1x1x16xf32>
    tpu.vector_store %arg3[%c8_162, %c1_163, %c0_164], %428 {strides = array<i32>} : memref<9x3x16xf32, #tpu.memory_space<vmem>>, vector<1x1x16xf32>,
    %c8_165 = arith.constant 8 : index
    %c2_166 = arith.constant 2 : index
    %c0_167 = arith.constant 0 : index
    %429 = vector.load %arg3[%c8_165, %c2_166, %c0_167] : memref<9x3x16xf32, #tpu.memory_space<vmem>>, vector<1x1x16xf32>
    %430 = vector.shape_cast %429 : vector<1x1x16xf32> to vector<1x16xf32>
    %431 = vector.shape_cast %422 : vector<1x16xf32> to vector<1x1x16xf32>
    tpu.vector_store %arg3[%c8_165, %c2_166, %c0_167], %431 {strides = array<i32>} : memref<9x3x16xf32, #tpu.memory_space<vmem>>, vector<1x1x16xf32>,
    return
  }
  func.func @transform_0(%arg0: i32) -> (i32, i32) {
    %c0_i32 = arith.constant 0 : i32
    %c0_i32_0 = arith.constant 0 : i32
    return %c0_i32, %arg0 : i32, i32
  }
  func.func @transform_1(%arg0: i32) -> (i32, i32) {
    %c0_i32 = arith.constant 0 : i32
    %c0_i32_0 = arith.constant 0 : i32
    %c0_i32_1 = arith.constant 0 : i32
    return %c0_i32, %c0_i32_0 : i32, i32
  }
  func.func @transform_2(%arg0: i32) -> (i32, i32, i32) {
    %c0_i32 = arith.constant 0 : i32
    %c0_i32_0 = arith.constant 0 : i32
    %c0_i32_1 = arith.constant 0 : i32
    return %c0_i32, %c0_i32_0, %arg0 : i32, i32, i32
  }
}

</mosaic_0001>

<bundles_post_ra>
// kernel: tpu_custom_call.1
= control target key start
LH: loop header
LB: loop body
LE: loop exit
PB: predicated region body
PF: predicated region fallthrough
CT: control target
= control target key end

     0   :  { %v2318_v2 = vmov 1   ;;  %s3822_s0 = inlined_call_operand.vmem [shape: f32[3,16], index: 0, kind: input, shape index: {}]   ;;  %s3823_s1 = inlined_call_operand.vmem [shape: f32[64,14], index: 1, kind: input, shape index: {}]   ;;  %s3824_s2 = inlined_call_operand.hbm [shape: f32[9,3,16], index: 2, kind: output, shape index: {}]  }
   0x1   :  { %v2353_v0 = vld [vmem:[%s3823_s1 + $0x20] sm:$0xff]  ;;  %2111 = vset.pattern.permute.xlu0 %v2318_v2  ;;  %2108 = vset.pattern.permute.xlu1 %v2318_v2  ;;  %v2365_v3 = vld [vmem:[%s3823_s1 + $0x28] sm:$0xff] }
   0x2   :  { %v2358_v1 = vld [vmem:[%s3823_s1] sm:$0xff]  ;;  %90 = vperm.xlu0 %2111, %v2353_v0   ;;  %v2370_v4 = vld [vmem:[%s3823_s1 + $0x8] sm:$0xff] }
   0x3   :  { %74 = vperm.xlu1 %2108, %v2358_v1  }
   0x4   :  { %7 = vsyncpa [#allocation3], 0  ;;  %v2377_v5 = vld [vmem:[%s3823_s1 + $0x10] sm:$0xff]  ;;  %v2319_v6 = vmov 0   ;;  %v2384_v7 = vld [vmem:[%s3823_s1 + $0x18] sm:$0xff]  ;;  %v2320_v8 = vmov 5   ;;  %v61_v45 = vlaneseq }
   0x5   :  { %v2395_v9 = vld [vmem:[%s3823_s1 + $0x30] sm:$0xff]  ;;  %v2401_v10 = vld [vmem:[%s3823_s1 + $0x38] sm:$0xff]  ;;  %v2321_v11 = vmov 3   ;;  %v2322_v12 = vmov 2   ;;  %v2323_v13 = vmov 6   ;;  %v2324_v14 = vmov 7  }
   0x6   :  { %94 = vperm.xlu0 %2111, %v2365_v3   ;;  %v2325_v15 = vmov 8   ;;  %v2326_v16 = vmov 9   ;;  %v2327_v17 = vmov 10   ;;  %v2328_v26 = vmov 11   ;;  %v2533_v52 = vld [vmem:[%s3822_s0] sm:$0x7] }
   0x7   :  { %78 = vperm.xlu1 %2108, %v2370_v4   ;;  %v3826_v33 = vmov 12   ;;  %v3825_v41 = vmov 4   ;;  %v62_v46 = vshrl.u32 %v61_v45, 7  ;;  %vm229_vm0 = vcmask 130048  }
   0x8   :  { %vm383_vm1 = vcmask 123905   ;;  %vm381_vm2 = vcmask 122880   ;;  %vm385_vm3 = vcmask 124930  }
   0x9   :  { %v2525_v49 = vsub.s32 0, %v62_v46  ;;  %v2527_v50 = vsub.s32 1, %v62_v46 }
   0xa   :  { %2114 = vset.pattern.permute.xlu0 %v2319_v6 }
   0xb   :  { %82 = vperm.xlu1 %2108, %v2377_v5   ;;  %23 = vperm.xlu0 %2114, %v2358_v1   ;;  %3912 = vst [vmem:[#allocation20_spill] sm:$0xff] %v2525_v49  ;;  %3913 = vst [vmem:[#allocation21_spill] sm:$0xff] %v2527_v50  ;;  %v64_v53 = vrot.slane %v2533_v52, %v2525_v49  ;;  %v108_v55 = vrot.slane %v2533_v52, %v2527_v50 }
   0xf   :  { %86 = vperm.xlu1 %2108, %v2384_v7   ;;  %28 = vperm.xlu0 %2114, %v2370_v4  }
  0x13   :  { %2109 = vset.pattern.permute.xlu1 %v2320_v8  ;;  %33 = vperm.xlu0 %2114, %v2377_v5  }
  0x14   :  { %130 = vperm.xlu1 %2109, %v2370_v4  }
  0x17   :  { %38 = vperm.xlu0 %2114, %v2384_v7  }
  0x18   :  { %2110 = vset.pattern.permute.xlu1 %v2319_v6 }
  0x19   :  { %43 = vperm.xlu1 %2110, %v2353_v0  }
  0x1b   :  { %53 = vperm.xlu0 %2114, %v2395_v9  }
  0x1d   :  { %2112 = vset.pattern.permute.xlu1 %v2320_v8 }
  0x1e   :  { %134 = vperm.xlu1 %2112, %v2377_v5  }
  0x1f   :  { %58 = vperm.xlu0 %2114, %v2401_v10  }
  0x22   :  { %2113 = vset.pattern.permute.xlu1 %v2319_v6 }
  0x23   :  { %48 = vperm.xlu1 %2113, %v2365_v3   ;;  %2118 = vset.pattern.permute.xlu0 %v2320_v8 }
  0x24   :  { %126 = vperm.xlu0 %2118, %v2358_v1  }
  0x27   :  { %2115 = vset.pattern.permute.xlu1 %v2320_v8 }
  0x28   :  { %138 = vperm.xlu1 %2115, %v2384_v7   ;;  %146 = vperm.xlu0 %2118, %v2365_v3  }
  0x2c   :  { %2116 = vset.pattern.permute.xlu1 %v2318_v2  ;;  %2123 = vset.pattern.permute.xlu0 %v2321_v11 }
  0x2d   :  { %98 = vperm.xlu1 %2116, %v2395_v9   ;;  %256 = vperm.xlu0 %2123, %v2370_v4  }
  0x31   :  { %2117 = vset.pattern.permute.xlu1 %v2320_v8  ;;  %268 = vperm.xlu0 %2123, %v2353_v0  }
  0x32   :  { %142 = vperm.xlu1 %2117, %v2353_v0  }
  0x35   :  { %2127 = vset.pattern.permute.xlu0 %v2322_v12 }
  0x36   :  { %2119 = vset.pattern.permute.xlu1 %v2318_v2  ;;  %190 = vperm.xlu0 %2127, %v2358_v1  }
  0x37   :  { %102 = vperm.xlu1 %2119, %v2401_v10  }
  0x3a   :  { %202 = vperm.xlu0 %2127, %v2384_v7  }
  0x3b   :  { %2120 = vset.pattern.permute.xlu1 %v2320_v8 }
  0x3c   :  { %150 = vperm.xlu1 %2120, %v2395_v9  }
  0x3e   :  { %214 = vperm.xlu0 %2127, %v2395_v9  }
  0x40   :  { %154 = vperm.xlu1 %2120, %v2401_v10  }
  0x42   :  { %2130 = vset.pattern.permute.xlu0 %v2321_v11 }
  0x43   :  { %280 = vperm.xlu0 %2130, %v2401_v10  }
  0x44   :  { %2121 = vset.pattern.permute.xlu1 %v2322_v12 }
  0x45   :  { %194 = vperm.xlu1 %2121, %v2370_v4  }
  0x47   :  { %2132 = vset.pattern.permute.xlu0 %v2323_v13 }
  0x48   :  { %439 = vperm.xlu0 %2132, %v2377_v5  }
  0x49   :  { %2122 = vset.pattern.permute.xlu1 %v2321_v11 }
  0x4a   :  { %252 = vperm.xlu1 %2122, %v2358_v1  }
  0x4c   :  { %454 = vperm.xlu0 %2132, %v2365_v3  }
  0x4e   :  { %2124 = vset.pattern.permute.xlu1 %v2322_v12 }
  0x4f   :  { %198 = vperm.xlu1 %2124, %v2377_v5  }
  0x50   :  { %464 = vperm.xlu0 %2132, %v2401_v10  }
  0x53   :  { %2125 = vset.pattern.permute.xlu1 %v2321_v11 }
  0x54   :  { %260 = vperm.xlu1 %2125, %v2377_v5   ;;  %2134 = vset.pattern.permute.xlu0 %v2324_v14 }
  0x55   :  { %645 = vperm.xlu0 %2134, %v2370_v4  }
  0x58   :  { %264 = vperm.xlu1 %2125, %v2384_v7  }
  0x59   :  { %660 = vperm.xlu0 %2134, %v2353_v0  }
  0x5c   :  { %2126 = vset.pattern.permute.xlu1 %v2322_v12 }
  0x5d   :  { %206 = vperm.xlu1 %2126, %v2353_v0   ;;  %670 = vperm.xlu0 %2134, %v2395_v9  }
  0x61   :  { %210 = vperm.xlu1 %2126, %v2365_v3   ;;  %2135 = vset.pattern.permute.xlu0 %v2325_v15 }
  0x62   :  { %851 = vperm.xlu0 %2135, %v2358_v1  }
  0x65   :  { %2128 = vset.pattern.permute.xlu1 %v2321_v11 }
  0x66   :  { %272 = vperm.xlu1 %2128, %v2365_v3   ;;  %866 = vperm.xlu0 %2135, %v2384_v7  }
  0x6a   :  { %276 = vperm.xlu1 %2128, %v2395_v9   ;;  %876 = vperm.xlu0 %2135, %v2365_v3  }
  0x6e   :  { %2129 = vset.pattern.permute.xlu1 %v2322_v12  ;;  %886 = vperm.xlu0 %2135, %v2401_v10  }
  0x6f   :  { %218 = vperm.xlu1 %2129, %v2401_v10  }
  0x72   :  { %2138 = vset.pattern.permute.xlu0 %v2326_v16 }
  0x73   :  { %2131 = vset.pattern.permute.xlu1 %v2323_v13  ;;  %1067 = vperm.xlu0 %2138, %v2370_v4  }
  0x74   :  { %429 = vperm.xlu1 %2131, %v2358_v1  }
  0x77   :  { %1082 = vperm.xlu0 %2138, %v2353_v0  }
  0x78   :  { %434 = vperm.xlu1 %2131, %v2370_v4  }
  0x7b   :  { %1092 = vperm.xlu0 %2138, %v2395_v9  }
  0x7c   :  { %444 = vperm.xlu1 %2131, %v2384_v7  }
  0x7f   :  { %2139 = vset.pattern.permute.xlu0 %v2327_v17 }
  0x80   :  { %449 = vperm.xlu1 %2131, %v2353_v0   ;;  %1273 = vperm.xlu0 %2139, %v2358_v1  }
  0x81   :  { %v2451_v19 = vpop.permute.xlu0 %90 }
  0x82   :  { %v2449_v18 = vpop.permute.xlu1 %74  ;;  %3898 = vst [vmem:[#allocation6_spill] sm:$0xff] %v2451_v19 }
  0x83   :  { %3897 = vst [vmem:[#allocation5_spill] sm:$0xff] %v2449_v18  ;;  %v109_v62 = vmul.f32 %v108_v55, %v2449_v18 }
  0x84   :  { %459 = vperm.xlu1 %2131, %v2395_v9   ;;  %1288 = vperm.xlu0 %2139, %v2384_v7  }
  0x85   :  { %v2457_v21 = vpop.permute.xlu0 %94 }
  0x86   :  { %v2455_v20 = vpop.permute.xlu1 %78  ;;  %3900 = vst [vmem:[#allocation8_spill] sm:$0xff] %v2457_v21 }
  0x87   :  { %3899 = vst [vmem:[#allocation7_spill] sm:$0xff] %v2455_v20  ;;  %v110_v60 = vmul.f32 %v108_v55, %v2455_v20 }
  0x88   :  { %2133 = vset.pattern.permute.xlu1 %v2324_v14  ;;  %1298 = vperm.xlu0 %2139, %v2365_v3  }
  0x89   :  { %640 = vperm.xlu1 %2133, %v2358_v1  }
  0x8a   :  { %v2461_v22 = vpop.permute.xlu1 %82  ;;  %v2463_v23 = vpop.permute.xlu0 %23 }
  0x8b   :  { %3901 = vst [vmem:[#allocation9_spill] sm:$0xff] %v2461_v22  ;;  %3902 = vst [vmem:[#allocation10_spill] sm:$0xff] %v2463_v23  ;;  %v65_v58 = vmul.f32 %v64_v53, %v2463_v23  ;;  %v111_v2 = vmul.f32 %v108_v55, %v2461_v22 }
  0x8c   :  { %1308 = vperm.xlu0 %2139, %v2401_v10  }
  0x8d   :  { %650 = vperm.xlu1 %2133, %v2377_v5   ;;  %v117_v6 = vadd.f32 %v109_v62, %v65_v58 }
  0x8e   :  { %v2467_v24 = vpop.permute.xlu1 %86  ;;  %v2469_v25 = vpop.permute.xlu0 %28 }
  0x8f   :  { %3903 = vst [vmem:[#allocation11_spill] sm:$0xff] %v2467_v24  ;;  %3904 = vst [vmem:[#allocation12_spill] sm:$0xff] %v2469_v25  ;;  %v66_v56 = vmul.f32 %v64_v53, %v2469_v25  ;;  %v112_v14 = vmul.f32 %v108_v55, %v2467_v24 }
  0x90   :  { %2142 = vset.pattern.permute.xlu0 %v2328_v26 }
  0x91   :  { %655 = vperm.xlu1 %2133, %v2384_v7   ;;  %1489 = vperm.xlu0 %2142, %v2370_v4   ;;  %v118_v63 = vadd.f32 %v110_v60, %v66_v56  ;;  %v113_v56 = vmul.f32 %v108_v55, %v2451_v19 }
  0x92   :  { %v2474_v27 = vpop.permute.xlu0 %33 }
  0x93   :  { %3905 = vst [vmem:[#allocation13_spill] sm:$0xff] %v2474_v27  ;;  %v2476_v28 = vpop.permute.xlu1 %130  ;;  %v67_v61 = vmul.f32 %v64_v53, %v2474_v27 }
  0x95   :  { %665 = vperm.xlu1 %2133, %v2365_v3   ;;  %1504 = vperm.xlu0 %2142, %v2353_v0   ;;  %v119_v12 = vadd.f32 %v111_v2, %v67_v61  ;;  %v114_v61 = vmul.f32 %v108_v55, %v2457_v21 }
  0x96   :  { %v2480_v29 = vpop.permute.xlu0 %38 }
  0x97   :  { %3906 = vst [vmem:[#allocation14_spill] sm:$0xff] %v2480_v29  ;;  %v68_v8 = vmul.f32 %v64_v53, %v2480_v29 }
  0x98   :  { %v2482_v30 = vpop.permute.xlu1 %43 }
  0x99   :  { %3907 = vst [vmem:[#allocation15_spill] sm:$0xff] %v2482_v30  ;;  %675 = vperm.xlu1 %2133, %v2401_v10   ;;  %1514 = vperm.xlu0 %2142, %v2395_v9   ;;  %v120_v45 = vadd.f32 %v112_v14, %v68_v8  ;;  %v69_v46 = vmul.f32 %v64_v53, %v2482_v30 }
  0x9a   :  { %v2486_v31 = vpop.permute.xlu0 %53 }
  0x9b   :  { %3908 = vst [vmem:[#allocation16_spill] sm:$0xff] %v2486_v31  ;;  %v71_v8 = vmul.f32 %v64_v53, %v2486_v31 }
  0x9d   :  { %2136 = vset.pattern.permute.xlu1 %v2325_v15  ;;  %v2488_v32 = vpop.permute.xlu1 %134  ;;  %2143 = vset.pattern.permute.xlu0 %v3826_v33 }
  0x9e   :  { %856 = vperm.xlu1 %2136, %v2370_v4   ;;  %1695 = vperm.xlu0 %2143, %v2358_v1   ;;  %v2493_v34 = vpop.permute.xlu0 %58 }
  0xa2   :  { %861 = vperm.xlu1 %2136, %v2377_v5   ;;  %v2496_v35 = vpop.permute.xlu1 %48  ;;  %1710 = vperm.xlu0 %2143, %v2384_v7  }
  0xa3   :  { %3909 = vst [vmem:[#allocation17_spill] sm:$0xff] %v2496_v35  ;;  %v127_v36 = vpop.permute.xlu0 %126 }
  0xa4   :  { %v157_v13 = vadd.f32 %v127_v36, %v117_v6  ;;  %v70_v36 = vmul.f32 %v64_v53, %v2496_v35 }
  0xa6   :  { %871 = vperm.xlu1 %2136, %v2353_v0   ;;  %1720 = vperm.xlu0 %2143, %v2365_v3   ;;  %2149 = vtanh.f32 %v157_v13 }
  0xa7   :  { %v139_v37 = vpop.permute.xlu1 %138  ;;  %v2501_v38 = vpop.permute.xlu0 %146 }
  0xa8   :  { %v160_v60 = vadd.f32 %v139_v37, %v120_v45  ;;  %v122_v37 = vadd.f32 %v114_v61, %v70_v36 }
  0xaa   :  { %881 = vperm.xlu1 %2136, %v2395_v9   ;;  %1730 = vperm.xlu0 %2143, %v2401_v10   ;;  %v162_v13 = vadd.f32 %v2501_v38, %v122_v37 }
  0xac   :  { %v2505_v39 = vpop.permute.xlu1 %98  ;;  %v2507_v40 = vpop.permute.xlu0 %256 }
  0xad   :  { %3910 = vst [vmem:[#allocation18_spill] sm:$0xff] %v2505_v39 }
  0xae   :  { %2137 = vset.pattern.permute.xlu1 %v2326_v16  ;;  %2146 = vset.pattern.permute.xlu0 %v3825_v41  ;;  %v158_v16 = vadd.f32 %v2476_v28, %v118_v63  ;;  %v121_v28 = vadd.f32 %v113_v56, %v69_v46  ;;  %v72_v63 = vmul.f32 %v64_v53, %v2493_v34 }
  0xaf   :  { %1062 = vperm.xlu1 %2137, %v2358_v1   ;;  %317 = vperm.xlu0 %2146, %v2370_v4  }
  0xb0   :  { %v2514_v43 = vpop.permute.xlu0 %268  ;;  %2151 = vtanh.f32 %v158_v16  ;;  %v2585_v45 = vpop.eup %2149 }
  0xb1   :  { %v143_v42 = vpop.permute.xlu1 %142  ;;  %3911 = vst [vmem:[#allocation19_spill] sm:$0xff] %v2514_v43  ;;  %3917 = vst [vmem:[#allocation25_spill] sm:$0xff] %v2585_v45 }
  0xb3   :  { %1072 = vperm.xlu1 %2137, %v2377_v5   ;;  %329 = vperm.xlu0 %2146, %v2353_v0  }
  0xb5   :  { %v2520_v47 = vpop.permute.xlu0 %190 }
  0xb6   :  { %v2516_v44 = vpop.permute.xlu1 %102 }
  0xb7   :  { %1077 = vperm.xlu1 %2137, %v2384_v7   ;;  %337 = vperm.xlu0 %2146, %v2395_v9   ;;  %v116_v2 = vmul.f32 %v108_v55, %v2516_v44 }
  0xb9   :  { %v2537_v54 = vpop.permute.xlu0 %202  ;;  %v124_v14 = vadd.f32 %v116_v2, %v72_v63 }
  0xba   :  { %v2588_v53 = vpop.eup %2151 }
  0xbb   :  { %1087 = vperm.xlu1 %2137, %v2365_v3   ;;  %v2523_v48 = vpop.permute.xlu1 %150  ;;  %3918 = vst [vmem:[#allocation26_spill] sm:$0xff] %v2588_v53 }
  0xbd   :  { %v2547_v59 = vpop.permute.xlu0 %214 }
  0xbe   :  { %3914 = vst [vmem:[#allocation22_spill] sm:$0xff] %v2547_v59 }
  0xbf   :  { %1097 = vperm.xlu1 %2137, %v2401_v10   ;;  %v155_v51 = vpop.permute.xlu1 %154 }
  0xc0   :  { %v164_v46 = vadd.f32 %v155_v51, %v124_v14 }
  0xc2   :  { %v2558_v15 = vpop.permute.xlu0 %280 }
  0xc3   :  { %2140 = vset.pattern.permute.xlu1 %v2327_v17  ;;  %3915 = vst [vmem:[#allocation23_spill] sm:$0xff] %v2558_v15  ;;  %v159_v17 = vadd.f32 %v2488_v32, %v119_v12  ;;  %v161_v32 = vadd.f32 %v143_v42, %v121_v28  ;;  %v115_v12 = vmul.f32 %v108_v55, %v2505_v39 }
  0xc4   :  { %1278 = vperm.xlu1 %2140, %v2370_v4   ;;  %v2544_v57 = vpop.permute.xlu1 %194 }
  0xc5   :  { %2153 = vtanh.f32 %v159_v17  ;;  %v123_v17 = vadd.f32 %v115_v12, %v71_v8  ;;  %v222_v56 = vmul.f32 %v2588_v53, %v2544_v57 }
  0xc6   :  { %2155 = vtanh.f32 %v160_v60  ;;  %v284_v60 = vmul.f32 %v2588_v53, %v2507_v40  ;;  %v3929_v53 = vmov 12  }
  0xc7   :  { %v2570_v62 = vpop.permute.xlu0 %439  ;;  %2157 = vtanh.f32 %v161_v32  ;;  %v231_v37 = vsel %vm229_vm0, %v222_v56, 0.0 }
  0xc8   :  { %1283 = vperm.xlu1 %2140, %v2377_v5   ;;  %2159 = vtanh.f32 %v162_v13  ;;  %v292_v8 = vsel %vm229_vm0, %v284_v60, 0.0 }
  0xc9   :  { %v2555_v11 = vpop.permute.xlu1 %252  ;;  %2161 = vtanh.f32 %v164_v46 }
  0xca   :  { %v283_v38 = vmul.f32 %v2585_v45, %v2555_v11 }
  0xcb   :  { %v2581_v42 = vpop.permute.xlu0 %454 }
  0xcc   :  { %1293 = vperm.xlu1 %2140, %v2353_v0   ;;  %v291_v63 = vsel %vm229_vm0, %v283_v38, 0.0 }
  0xce   :  { %v2565_v58 = vpop.permute.xlu1 %198 }
  0xcf   :  { %v2593_v55 = vpop.eup %2153  ;;  %v2609_v32 = vpop.permute.xlu0 %464 }
  0xd0   :  { %1303 = vperm.xlu1 %2140, %v2395_v9   ;;  %3919 = vst [vmem:[#allocation27_spill] sm:$0xff] %v2593_v55  ;;  %v2603_v61 = vpop.eup %2155  ;;  %v223_v28 = vmul.f32 %v2593_v55, %v2565_v58 }
  0xd1   :  { %3920 = vst [vmem:[#allocation28_spill] sm:$0xff] %v2603_v61  ;;  %v2620_v14 = vpop.eup %2157  ;;  %v224_v56 = vmul.f32 %v2603_v61, %v2537_v54 }
  0xd2   :  { %3922 = vst [vmem:[#allocation30_spill] sm:$0xff] %v2620_v14  ;;  %v233_v46 = vsel %vm229_vm0, %v223_v28, 0.0 }
  0xd3   :  { %v2574_v6 = vpop.permute.xlu1 %260 }
  0xd4   :  { %2141 = vset.pattern.permute.xlu1 %v2328_v26  ;;  %v163_v26 = vadd.f32 %v2523_v48, %v123_v17  ;;  %v285_v51 = vmul.f32 %v2593_v55, %v2574_v6  ;;  %v221_v48 = vmul.f32 %v2585_v45, %v2520_v47  ;;  %v2628_v33 = vpop.permute.xlu0 %645  ;;  %v2632_v55 = vpop.eup %2159 }
  0xd5   :  { %1484 = vperm.xlu1 %2141, %v2358_v1   ;;  %3923 = vst [vmem:[#allocation31_spill] sm:$0xff] %v2628_v33  ;;  %3924 = vst [vmem:[#allocation32_spill] sm:$0xff] %v2632_v55 }
  0xd6   :  { %2163 = vtanh.f32 %v163_v26  ;;  %v294_v12 = vsel %vm229_vm0, %v285_v51, 0.0  ;;  %v230_v17 = vsel %vm229_vm0, %v221_v48, 0.0  ;;  %v293_v26 = vadd.f32 %v292_v8, %v291_v63 }
  0xd7   :  { %v2583_v16 = vpop.permute.xlu1 %264  ;;  %v232_v38 = vadd.f32 %v231_v37, %v230_v17  ;;  %v287_v48 = vmul.f32 %v2620_v14, %v2514_v43  ;;  %v235_v17 = vsel %vm229_vm0, %v224_v56, 0.0 }
  0xd8   :  { %3916 = vst [vmem:[#allocation24_spill] sm:$0xff] %v2583_v16  ;;  %v286_v2 = vmul.f32 %v2603_v61, %v2583_v16  ;;  %v295_v60 = vadd.f32 %v294_v12, %v293_v26  ;;  %v2643_v12 = vpop.eup %2161 }
  0xd9   :  { %1494 = vperm.xlu1 %2141, %v2377_v5   ;;  %v234_v28 = vadd.f32 %v233_v46, %v232_v38  ;;  %3926 = vst [vmem:[#allocation34_spill] sm:$0xff] %v2643_v12  ;;  %v290_v56 = vmul.f32 %v2643_v12, %v2558_v15 }
  0xda   :  { %v296_v41 = vsel %vm229_vm0, %v286_v2, 0.0 }
  0xdb   :  { %v297_v63 = vadd.f32 %v296_v41, %v295_v60  ;;  %v298_v41 = vsel %vm229_vm0, %v287_v48, 0.0  ;;  %v236_v46 = vadd.f32 %v235_v17, %v234_v28  ;;  %v2651_v60 = vpop.permute.xlu0 %660 }
  0xdc   :  { %v2601_v36 = vpop.permute.xlu1 %206  ;;  %3928 = vst [vmem:[#allocation36_spill] sm:$0xff] %v2651_v60 }
  0xdd   :  { %1499 = vperm.xlu1 %2141, %v2384_v7   ;;  %v225_v51 = vmul.f32 %v2620_v14, %v2601_v36  ;;  %v299_v45 = vadd.f32 %v298_v41, %v297_v63 }
  0xdf   :  { %v237_v26 = vsel %vm229_vm0, %v225_v51, 0.0  ;;  %v2670_v41 = vpop.permute.xlu0 %670 }
  0xe0   :  { %v2618_v13 = vpop.permute.xlu1 %210  ;;  %v2647_v61 = vpop.eup %2163  ;;  %v238_v51 = vadd.f32 %v237_v26, %v236_v46  ;;  %3932 = vst [vmem:[#allocation39_spill] sm:$0xff] %v2670_v41 }
  0xe1   :  { %3921 = vst [vmem:[#allocation29_spill] sm:$0xff] %v2618_v13  ;;  %1509 = vperm.xlu1 %2141, %v2365_v3   ;;  %v226_v37 = vmul.f32 %v2632_v55, %v2618_v13  ;;  %3927 = vst [vmem:[#allocation35_spill] sm:$0xff] %v2647_v61  ;;  %v227_v48 = vmul.f32 %v2647_v61, %v2547_v59 }
  0xe3   :  { %v239_v14 = vsel %vm229_vm0, %v226_v37, 0.0  ;;  %v241_v26 = vsel %vm229_vm0, %v227_v48, 0.0 }
  0xe5   :  { %1519 = vperm.xlu1 %2141, %v2401_v10   ;;  %v2639_v2 = vpop.permute.xlu1 %272 }
  0xe6   :  { %3925 = vst [vmem:[#allocation33_spill] sm:$0xff] %v2639_v2  ;;  %v288_v8 = vmul.f32 %v2632_v55, %v2639_v2 }
  0xe8   :  { %v300_v38 = vsel %vm229_vm0, %v288_v8, 0.0  ;;  %v240_v8 = vadd.f32 %v239_v14, %v238_v51 }
  0xe9   :  { %2144 = vset.pattern.permute.xlu1 %v3929_v53  ;;  %v2655_v55 = vpop.permute.xlu1 %276  ;;  %v301_v28 = vadd.f32 %v300_v38, %v299_v45  ;;  %v304_v53 = vsel %vm229_vm0, %v290_v56, 0.0 }
  0xea   :  { %3930 = vst [vmem:[#allocation37_spill] sm:$0xff] %v2655_v55  ;;  %v289_v33 = vmul.f32 %v2647_v61, %v2655_v55  ;;  %1700 = vperm.xlu1 %2144, %v2370_v4   ;;  %v242_v61 = vadd.f32 %v241_v26, %v240_v8  ;;  %v3934_v26 = vmov 4  }
  0xec   :  { %v302_v63 = vsel %vm229_vm0, %v289_v33, 0.0 }
  0xed   :  { %v303_v37 = vadd.f32 %v302_v63, %v301_v28  ;;  %v2676_v28 = vpop.permute.xlu0 %851 }
  0xee   :  { %1705 = vperm.xlu1 %2144, %v2377_v5   ;;  %v2667_v17 = vpop.permute.xlu1 %218  ;;  %3933 = vst [vmem:[#allocation40_spill] sm:$0xff] %v2676_v28 }
  0xef   :  { %3931 = vst [vmem:[#allocation38_spill] sm:$0xff] %v2667_v17  ;;  %v305_v46 = vadd.f32 %v304_v53, %v303_v37  ;;  %v228_v4 = vmul.f32 %v2643_v12, %v2667_v17 }
  0xf1   :  { %v306_v45 = vrot.slane %v305_v46, 4  ;;  %v243_v14 = vsel %vm229_vm0, %v228_v4, 0.0 }
  0xf2   :  { %v244_v33 = vadd.f32 %v243_v14, %v242_v61  ;;  %1715 = vperm.xlu1 %2144, %v2353_v0   ;;  %v2680_v61 = vpop.permute.xlu0 %866 }
  0xf3   :  { %v307_v38 = vadd.f32 %v306_v45, %v305_v46  ;;  %v430_v56 = vpop.permute.xlu1 %429  ;;  %3935 = vst [vmem:[#allocation41_spill] sm:$0xff] %v2680_v61 }
  0xf4   :  { %v245_v51 = vrot.slane %v244_v33, 4 }
  0xf5   :  { %v308_v63 = vrot.slane %v307_v38, 2 }
  0xf6   :  { %v246_v48 = vadd.f32 %v245_v51, %v244_v33  ;;  %1725 = vperm.xlu1 %2144, %v2395_v9  }
  0xf7   :  { %v309_v37 = vadd.f32 %v308_v63, %v307_v38  ;;  %v435_v53 = vpop.permute.xlu1 %434 }
  0xf8   :  { %v247_v41 = vrot.slane %v246_v48, 2 }
  0xf9   :  { %v310_v12 = vrot.slane %v309_v37, 1 }
  0xfa   :  { %v248_v8 = vadd.f32 %v247_v41, %v246_v48  ;;  %2145 = vset.pattern.permute.xlu1 %v3934_v26 }
  0xfb   :  { %v311_v4 = vadd.f32 %v310_v12, %v309_v37  ;;  %313 = vperm.xlu1 %2145, %v2358_v1   ;;  %v445_v0 = vpop.permute.xlu1 %444  ;;  %v2691_v1 = vpop.permute.xlu0 %876 }
  0xfc   :  { %v249_v46 = vrot.slane %v248_v8, 1  ;;  %3936 = vst [vmem:[#allocation42_spill] sm:$0xff] %v2691_v1 }
  0xfd   :  { %v375_v45 = vmul.f32 1.1111112, %v311_v4 }
  0xfe   :  { %v250_v14 = vadd.f32 %v249_v46, %v248_v8 }
  0xff   :  { %v2684_v33 = vadd.f32 %v375_v45, %v2533_v52  ;;  %321 = vperm.xlu1 %2145, %v2377_v5   ;;  %v450_v9 = vpop.permute.xlu1 %449  ;;  %v2708_v4 = vpop.permute.xlu0 %886 }
 0x100   :  { %v373_v38 = vmul.f32 1.1111112, %v250_v14  ;;  %3937 = vst [vmem:[#allocation43_spill] sm:$0xff] %v2708_v4 }
 0x101   :  { %384 = vst.msk [vmem:[#allocation2] sm:$0x2] %vm383_vm1, %v2684_v33  ;;  %v410_v12 = vrot.slane %v2684_v33, %v2527_v50 }
 0x102   :  { %v2694_v41 = vadd.f32 %v373_v38, %v2533_v52 }
 0x103   :  { %325 = vperm.xlu1 %2145, %v2384_v7   ;;  %v460_v51 = vpop.permute.xlu1 %459  ;;  %v411_v63 = vmul.f32 %v410_v12, %v2449_v18  ;;  %v412_v48 = vmul.f32 %v410_v12, %v2455_v20  ;;  %v413_v37 = vmul.f32 %v410_v12, %v2461_v22  ;;  %v414_v7 = vmul.f32 %v410_v12, %v2467_v24 }
 0x104   :  { %382 = vst.msk [vmem:[#allocation2] sm:$0x1] %vm381_vm2, %v2694_v41  ;;  %v398_v5 = vrot.slane %v2694_v41, %v2525_v49  ;;  %v415_v14 = vmul.f32 %v410_v12, %v2451_v19  ;;  %v416_v4 = vmul.f32 %v410_v12, %v2457_v21  ;;  %v417_v19 = vmul.f32 %v410_v12, %v2505_v39 }
 0x106   :  { %v399_v8 = vmul.f32 %v398_v5, %v2463_v23  ;;  %v400_v52 = vmul.f32 %v398_v5, %v2469_v25  ;;  %v401_v26 = vmul.f32 %v398_v5, %v2474_v27  ;;  %v402_v46 = vmul.f32 %v398_v5, %v2480_v29 }
 0x107   :  { %v403_v45 = vmul.f32 %v398_v5, %v2482_v30  ;;  %v404_v38 = vmul.f32 %v398_v5, %v2496_v35  ;;  %333 = vperm.xlu1 %2145, %v2365_v3   ;;  %v405_v60 = vmul.f32 %v398_v5, %v2486_v31  ;;  %v406_v18 = vmul.f32 %v398_v5, %v2493_v34 }
 0x108   :  { %v419_v1 = vadd.f32 %v411_v63, %v399_v8  ;;  %v420_v61 = vadd.f32 %v412_v48, %v400_v52  ;;  %v421_v28 = vadd.f32 %v413_v37, %v401_v26  ;;  %v2716_v22 = vpop.permute.xlu1 %640  ;;  %v422_v24 = vadd.f32 %v414_v7, %v402_v46  ;;  %v2726_v52 = vpop.permute.xlu0 %1067 }
 0x109   :  { %v423_v20 = vadd.f32 %v415_v14, %v403_v45  ;;  %v424_v3 = vadd.f32 %v416_v4, %v404_v38  ;;  %v418_v63 = vmul.f32 %v410_v12, %v2516_v44  ;;  %v425_v37 = vadd.f32 %v417_v19, %v405_v60  ;;  %3938 = vst [vmem:[#allocation44_spill] sm:$0xff] %v2726_v52 }
 0x10a   :  { %v467_v30 = vadd.f32 %v430_v56, %v419_v1  ;;  %v468_v29 = vadd.f32 %v435_v53, %v420_v61  ;;  %v469_v35 = vadd.f32 %v2570_v62, %v421_v28  ;;  %v470_v48 = vadd.f32 %v445_v0, %v422_v24 }
 0x10b   :  { %341 = vperm.xlu1 %2145, %v2401_v10   ;;  %v471_v26 = vadd.f32 %v450_v9, %v423_v20  ;;  %v426_v5 = vadd.f32 %v418_v63, %v406_v18  ;;  %v472_v56 = vadd.f32 %v2581_v42, %v424_v3  ;;  %v473_v62 = vadd.f32 %v460_v51, %v425_v37 }
 0x10c   :  { %v2724_v8 = vpop.permute.xlu1 %650  ;;  %2165 = vtanh.f32 %v467_v30  ;;  %v2732_v24 = vpop.permute.xlu0 %1082 }
 0x10d   :  { %2167 = vtanh.f32 %v468_v29  ;;  %v474_v10 = vadd.f32 %v2609_v32, %v426_v5  ;;  %3939 = vst [vmem:[#allocation45_spill] sm:$0xff] %v2732_v24 }
 0x10e   :  { %2169 = vtanh.f32 %v469_v35 }
 0x10f   :  { %2171 = vtanh.f32 %v470_v48 }
 0x110   :  { %v2729_v28 = vpop.permute.xlu1 %655  ;;  %2173 = vtanh.f32 %v471_v26  ;;  %v2752_v53 = vpop.permute.xlu0 %1092 }
 0x111   :  { %2175 = vtanh.f32 %v472_v56  ;;  %3940 = vst [vmem:[#allocation46_spill] sm:$0xff] %v2752_v53 }
 0x112   :  { %2177 = vtanh.f32 %v473_v62 }
 0x113   :  { %2179 = vtanh.f32 %v474_v10 }
 0x114   :  { %v2734_v19 = vpop.permute.xlu1 %665 }
 0x116   :  { %v2736_v20 = vpop.eup %2165 }
 0x117   :  { %v2738_v18 = vpop.eup %2167  ;;  %v499_v29 = vmul.f32 %v2736_v20, %v2520_v47  ;;  %v528_v30 = vmul.f32 %v2736_v20, %v2555_v11 }
 0x118   :  { %v2744_v35 = vpop.permute.xlu1 %675  ;;  %v2746_v42 = vpop.eup %2169  ;;  %v500_v32 = vmul.f32 %v2738_v18, %v2544_v57  ;;  %v529_v60 = vmul.f32 %v2738_v18, %v2507_v40 }
 0x119   :  { %v2754_v61 = vpop.eup %2171  ;;  %v507_v0 = vsel %vm229_vm0, %v499_v29, 0.0  ;;  %v536_v9 = vsel %vm229_vm0, %v528_v30, 0.0  ;;  %v501_v12 = vmul.f32 %v2746_v42, %v2565_v58  ;;  %v530_v3 = vmul.f32 %v2746_v42, %v2574_v6  ;;  %v2783_v29 = vpop.permute.xlu0 %1273 }
 0x11a   :  { %v2760_v1 = vpop.eup %2173  ;;  %v508_v51 = vsel %vm229_vm0, %v500_v32, 0.0  ;;  %v537_v7 = vsel %vm229_vm0, %v529_v60, 0.0  ;;  %v502_v45 = vmul.f32 %v2754_v61, %v2537_v54  ;;  %v531_v63 = vmul.f32 %v2754_v61, %v2583_v16  ;;  %3942 = vst [vmem:[#allocation48_spill] sm:$0xff] %v2783_v29 }
 0x11b   :  { %v509_v4 = vadd.f32 %v508_v51, %v507_v0  ;;  %v538_v46 = vadd.f32 %v537_v7, %v536_v9  ;;  %v2766_v14 = vpop.eup %2175  ;;  %v510_v38 = vsel %vm229_vm0, %v501_v12, 0.0  ;;  %v503_v5 = vmul.f32 %v2760_v1, %v2601_v36 }
 0x11c   :  { %v2775_v37 = vpop.eup %2177  ;;  %v512_v56 = vsel %vm229_vm0, %v502_v45, 0.0  ;;  %v539_v62 = vsel %vm229_vm0, %v530_v3, 0.0  ;;  %v532_v10 = vmul.f32 %v2760_v1, %v2514_v43  ;;  %v541_v0 = vsel %vm229_vm0, %v531_v63, 0.0 }
 0x11d   :  { %v2773_v48 = vpop.permute.xlu1 %856  ;;  %v511_v26 = vadd.f32 %v510_v38, %v509_v4  ;;  %v2785_v30 = vpop.eup %2179  ;;  %v540_v60 = vadd.f32 %v539_v62, %v538_v46  ;;  %v514_v9 = vsel %vm229_vm0, %v503_v5, 0.0  ;;  %v504_v12 = vmul.f32 %v2766_v14, %v2618_v13 }
 0x11e   :  { %3941 = vst [vmem:[#allocation47_spill] sm:$0xff] %v2773_v48  ;;  %v505_v51 = vmul.f32 %v2775_v37, %v2547_v59  ;;  %v533_v7 = vmul.f32 %v2766_v14, %v2639_v2  ;;  %v506_v46 = vmul.f32 %v2785_v30, %v2667_v17  ;;  %v543_v3 = vsel %vm229_vm0, %v532_v10, 0.0 }
 0x11f   :  { %v513_v32 = vadd.f32 %v512_v56, %v511_v26  ;;  %v542_v45 = vadd.f32 %v541_v0, %v540_v60  ;;  %v516_v63 = vsel %vm229_vm0, %v504_v12, 0.0  ;;  %v534_v26 = vmul.f32 %v2775_v37, %v2655_v55 }
 0x120   :  { %v518_v62 = vsel %vm229_vm0, %v505_v51, 0.0  ;;  %v535_v29 = vmul.f32 %v2785_v30, %v2558_v15  ;;  %v545_v60 = vsel %vm229_vm0, %v533_v7, 0.0  ;;  %v520_v12 = vsel %vm229_vm0, %v506_v46, 0.0 }
 0x121   :  { %v2795_v4 = vpop.permute.xlu1 %861  ;;  %v515_v38 = vadd.f32 %v514_v9, %v513_v32  ;;  %v544_v5 = vadd.f32 %v543_v3, %v542_v45  ;;  %v2807_v32 = vpop.permute.xlu0 %1288  ;;  %v547_v53 = vsel %vm229_vm0, %v534_v26, 0.0 }
 0x122   :  { %3943 = vst [vmem:[#allocation49_spill] sm:$0xff] %v2795_v4  ;;  %3944 = vst [vmem:[#allocation50_spill] sm:$0xff] %v2807_v32 }
 0x123   :  { %v517_v56 = vadd.f32 %v516_v63, %v515_v38  ;;  %v546_v10 = vadd.f32 %v545_v60, %v544_v5  ;;  %v549_v38 = vsel %vm229_vm0, %v535_v29, 0.0 }
 0x125   :  { %v2809_v0 = vpop.permute.xlu1 %871  ;;  %v519_v9 = vadd.f32 %v518_v62, %v517_v56  ;;  %v548_v45 = vadd.f32 %v547_v53, %v546_v10  ;;  %v2816_v52 = vpop.permute.xlu0 %1298 }
 0x126   :  { %3945 = vst [vmem:[#allocation51_spill] sm:$0xff] %v2809_v0  ;;  %3947 = vst [vmem:[#allocation53_spill] sm:$0xff] %v2816_v52  ;;  %v3960_v52 = vld [vmem:[#allocation9_spill] sm:$0xff] }
 0x127   :  { %v521_v24 = vadd.f32 %v520_v12, %v519_v9  ;;  %v550_v63 = vadd.f32 %v549_v38, %v548_v45 }
 0x129   :  { %v2814_v51 = vpop.permute.xlu1 %881  ;;  %v522_v3 = vrot.slane %v521_v24, 4  ;;  %v551_v32 = vrot.slane %v550_v63, 4  ;;  %v2820_v62 = vpop.permute.xlu0 %1308 }
 0x12a   :  { %3946 = vst [vmem:[#allocation52_spill] sm:$0xff] %v2814_v51  ;;  %3949 = vst [vmem:[#allocation55_spill] sm:$0xff] %v2820_v62  ;;  %v3963_v51 = vld [vmem:[#allocation6_spill] sm:$0xff] }
 0x12b   :  { %v523_v7 = vadd.f32 %v522_v3, %v521_v24  ;;  %v552_v0 = vadd.f32 %v551_v32, %v550_v63 }
 0x12d   :  { %v524_v4 = vrot.slane %v523_v7, 2  ;;  %v553_v46 = vrot.slane %v552_v0, 2  ;;  %v2826_v24 = vpop.permute.xlu0 %1489 }
 0x12e   :  { %v2818_v56 = vpop.permute.xlu1 %1062  ;;  %3952 = vst [vmem:[#allocation58_spill] sm:$0xff] %v2826_v24  ;;  %v3959_v24 = vld [vmem:[#allocation7_spill] sm:$0xff] }
 0x12f   :  { %3948 = vst [vmem:[#allocation54_spill] sm:$0xff] %v2818_v56  ;;  %v525_v5 = vadd.f32 %v524_v4, %v523_v7  ;;  %v554_v53 = vadd.f32 %v553_v46, %v552_v0 }
 0x131   :  { %v526_v26 = vrot.slane %v525_v5, 1  ;;  %v555_v9 = vrot.slane %v554_v53, 1 }
 0x132   :  { %v2822_v60 = vpop.permute.xlu1 %1072 }
 0x133   :  { %3950 = vst [vmem:[#allocation56_spill] sm:$0xff] %v2822_v60  ;;  %v527_v29 = vadd.f32 %v526_v26, %v525_v5  ;;  %v556_v10 = vadd.f32 %v555_v9, %v554_v53  ;;  %v3954_v5 = vld [vmem:[#allocation14_spill] sm:$0xff]  ;;  %v2848_v26 = vpop.permute.xlu0 %1504  ;;  %v3956_v53 = vld [vmem:[#allocation15_spill] sm:$0xff]  ;;  %v3957_v9 = vld [vmem:[#allocation17_spill] sm:$0xff] }
 0x134   :  { %3955 = vst [vmem:[#allocation60_spill] sm:$0xff] %v2848_v26 }
 0x135   :  { %v586_v12 = vmul.f32 1.1111112, %v527_v29  ;;  %v588_v38 = vmul.f32 1.1111112, %v556_v10 }
 0x136   :  { %v2824_v45 = vpop.permute.xlu1 %1077 }
 0x137   :  { %3951 = vst [vmem:[#allocation57_spill] sm:$0xff] %v2824_v45  ;;  %v2829_v32 = vadd.f32 %v586_v12, %v2694_v41  ;;  %v2832_v4 = vadd.f32 %v588_v38, %v2684_v33  ;;  %v3958_v12 = vld [vmem:[#allocation5_spill] sm:$0xff]  ;;  %v3961_v45 = vld [vmem:[#allocation11_spill] sm:$0xff] }
 0x139   :  { %595 = vst.msk [vmem:[#allocation2 + $0x4] sm:$0x1] %vm381_vm2, %v2829_v32  ;;  %v609_v0 = vrot.slane %v2829_v32, %v2525_v49  ;;  %v621_v7 = vrot.slane %v2832_v4, %v2527_v50  ;;  %v3964_v50 = vld [vmem:[#allocation31_spill] sm:$0xff]  ;;  %v2868_v49 = vpop.permute.xlu0 %1514 }
 0x13a   :  { %v2838_v3 = vpop.permute.xlu1 %1087  ;;  %596 = vst.msk [vmem:[#allocation2 + $0x4] sm:$0x2] %vm383_vm1, %v2832_v4  ;;  %3965 = vst [vmem:[#allocation31_spill] sm:$0xff] %v2868_v49 }
 0x13b   :  { %3953 = vst [vmem:[#allocation59_spill] sm:$0xff] %v2838_v3  ;;  %v610_v63 = vmul.f32 %v609_v0, %v2463_v23  ;;  %v611_v41 = vmul.f32 %v609_v0, %v2469_v25  ;;  %v612_v33 = vmul.f32 %v609_v0, %v2474_v27  ;;  %v613_v46 = vmul.f32 %v609_v0, %v3954_v5 }
 0x13c   :  { %v614_v29 = vmul.f32 %v609_v0, %v3956_v53  ;;  %v615_v10 = vmul.f32 %v609_v0, %v3957_v9  ;;  %v622_v38 = vmul.f32 %v621_v7, %v3958_v12  ;;  %v623_v62 = vmul.f32 %v621_v7, %v3959_v24 }
 0x13d   :  { %v624_v3 = vmul.f32 %v621_v7, %v3960_v52  ;;  %v625_v60 = vmul.f32 %v621_v7, %v3961_v45  ;;  %v626_v48 = vmul.f32 %v621_v7, %v3963_v51  ;;  %v627_v5 = vmul.f32 %v621_v7, %v2457_v21 }
 0x13e   :  { %v2856_v56 = vpop.permute.xlu1 %1097  ;;  %v616_v26 = vmul.f32 %v609_v0, %v2486_v31  ;;  %v628_v53 = vmul.f32 %v621_v7, %v2505_v39  ;;  %v630_v27 = vadd.f32 %v622_v38, %v610_v63  ;;  %v631_v9 = vadd.f32 %v623_v62, %v611_v41  ;;  %v3967_v62 = vld [vmem:[#allocation36_spill] sm:$0xff] }
 0x13f   :  { %3962 = vst [vmem:[#allocation61_spill] sm:$0xff] %v2856_v56  ;;  %v632_v25 = vadd.f32 %v624_v3, %v612_v33  ;;  %v633_v12 = vadd.f32 %v625_v60, %v613_v46  ;;  %v634_v23 = vadd.f32 %v626_v48, %v614_v29  ;;  %v635_v24 = vadd.f32 %v627_v5, %v615_v10 }
 0x140   :  { %v617_v52 = vmul.f32 %v609_v0, %v2493_v34  ;;  %v629_v45 = vmul.f32 %v621_v7, %v2516_v44  ;;  %v678_v56 = vadd.f32 %v2716_v22, %v630_v27  ;;  %v679_v51 = vadd.f32 %v3964_v50, %v631_v9 }
 0x141   :  { %v680_v21 = vadd.f32 %v2724_v8, %v632_v25  ;;  %v681_v31 = vadd.f32 %v2729_v28, %v633_v12  ;;  %v682_v48 = vadd.f32 %v3967_v62, %v634_v23  ;;  %v636_v60 = vadd.f32 %v628_v53, %v616_v26  ;;  %v3969_v25 = vld [vmem:[#allocation39_spill] sm:$0xff]  ;;  %v2878_v8 = vpop.permute.xlu0 %1695 }
 0x142   :  { %2181 = vtanh.f32 %v678_v56  ;;  %v683_v0 = vadd.f32 %v2734_v19, %v635_v24  ;;  %v637_v3 = vadd.f32 %v629_v45, %v617_v52  ;;  %3970 = vst [vmem:[#allocation39_spill] sm:$0xff] %v2878_v8 }
 0x143   :  { %v2870_v63 = vpop.permute.xlu1 %1278  ;;  %2183 = vtanh.f32 %v679_v51  ;;  %v684_v27 = vadd.f32 %v3969_v25, %v636_v60 }
 0x144   :  { %3966 = vst [vmem:[#allocation62_spill] sm:$0xff] %v2870_v63  ;;  %2185 = vtanh.f32 %v680_v21  ;;  %v685_v50 = vadd.f32 %v2744_v35, %v637_v3  ;;  %v4005_v63 = vld [vmem:[#allocation5_spill] sm:$0xff] }
 0x145   :  { %2187 = vtanh.f32 %v681_v31  ;;  %v2890_v52 = vpop.permute.xlu0 %1710 }
 0x146   :  { %2189 = vtanh.f32 %v682_v48  ;;  %3972 = vst [vmem:[#allocation64_spill] sm:$0xff] %v2890_v52 }
 0x147   :  { %v2874_v22 = vpop.permute.xlu1 %1283  ;;  %2191 = vtanh.f32 %v683_v0 }
 0x148   :  { %3968 = vst [vmem:[#allocation36_spill] sm:$0xff] %v2874_v22  ;;  %2193 = vtanh.f32 %v684_v27 }
 0x149   :  { %2195 = vtanh.f32 %v685_v50  ;;  %v2922_v25 = vpop.permute.xlu0 %1720 }
 0x14a   :  { %3975 = vst [vmem:[#allocation67_spill] sm:$0xff] %v2922_v25 }
 0x14b   :  { %v2880_v28 = vpop.permute.xlu1 %1293 }
 0x14c   :  { %3971 = vst [vmem:[#allocation63_spill] sm:$0xff] %v2880_v28  ;;  %v2882_v23 = vpop.eup %2181 }
 0x14d   :  { %v2884_v19 = vpop.eup %2183  ;;  %v710_v21 = vmul.f32 %v2882_v23, %v2520_v47  ;;  %v739_v31 = vmul.f32 %v2882_v23, %v2555_v11 }
 0x14e   :  { %v2894_v35 = vpop.eup %2185  ;;  %v711_v56 = vmul.f32 %v2884_v19, %v2544_v57  ;;  %v740_v45 = vmul.f32 %v2884_v19, %v2507_v40 }
 0x14f   :  { %v2892_v51 = vpop.permute.xlu1 %1303  ;;  %v2900_v24 = vpop.eup %2187  ;;  %v718_v41 = vsel %vm229_vm0, %v710_v21, 0.0  ;;  %v747_v7 = vsel %vm229_vm0, %v739_v31, 0.0  ;;  %v712_v26 = vmul.f32 %v2894_v35, %v2565_v58  ;;  %v741_v53 = vmul.f32 %v2894_v35, %v2574_v6 }
 0x150   :  { %3973 = vst [vmem:[#allocation65_spill] sm:$0xff] %v2892_v51  ;;  %v2904_v33 = vpop.eup %2189  ;;  %v719_v5 = vsel %vm229_vm0, %v711_v56, 0.0  ;;  %v748_v46 = vsel %vm229_vm0, %v740_v45, 0.0  ;;  %v713_v62 = vmul.f32 %v2900_v24, %v2537_v54  ;;  %v742_v48 = vmul.f32 %v2900_v24, %v2583_v16 }
 0x151   :  { %v2912_v29 = vpop.eup %2191  ;;  %v720_v9 = vadd.f32 %v719_v5, %v718_v41  ;;  %v749_v10 = vadd.f32 %v748_v46, %v747_v7  ;;  %v721_v12 = vsel %vm229_vm0, %v712_v26, 0.0  ;;  %v750_v38 = vsel %vm229_vm0, %v741_v53, 0.0 }
 0x152   :  { %v2924_v27 = vpop.eup %2193  ;;  %v723_v50 = vsel %vm229_vm0, %v713_v62, 0.0  ;;  %v752_v21 = vsel %vm229_vm0, %v742_v48, 0.0  ;;  %v714_v31 = vmul.f32 %v2904_v33, %v2601_v36  ;;  %v715_v56 = vmul.f32 %v2912_v29, %v2618_v13 }
 0x153   :  { %v722_v0 = vadd.f32 %v721_v12, %v720_v9  ;;  %v751_v3 = vadd.f32 %v750_v38, %v749_v10  ;;  %v2932_v45 = vpop.eup %2195  ;;  %v743_v5 = vmul.f32 %v2904_v33, %v2514_v43  ;;  %v744_v26 = vmul.f32 %v2912_v29, %v2639_v2 }
 0x154   :  { %v2920_v60 = vpop.permute.xlu1 %1484  ;;  %v725_v46 = vsel %vm229_vm0, %v714_v31, 0.0  ;;  %v716_v12 = vmul.f32 %v2924_v27, %v2547_v59  ;;  %v727_v38 = vsel %vm229_vm0, %v715_v56, 0.0  ;;  %v717_v48 = vmul.f32 %v2932_v45, %v2667_v17  ;;  %v2952_v31 = vpop.permute.xlu0 %1730 }
 0x155   :  { %3974 = vst [vmem:[#allocation66_spill] sm:$0xff] %v2920_v60  ;;  %v724_v41 = vadd.f32 %v723_v50, %v722_v0  ;;  %v753_v7 = vadd.f32 %v752_v21, %v751_v3  ;;  %v754_v10 = vsel %vm229_vm0, %v743_v5, 0.0  ;;  %v745_v0 = vmul.f32 %v2924_v27, %v2655_v55  ;;  %3977 = vst [vmem:[#allocation69_spill] sm:$0xff] %v2952_v31 }
 0x156   :  { %v756_v50 = vsel %vm229_vm0, %v744_v26, 0.0  ;;  %v746_v21 = vmul.f32 %v2932_v45, %v2558_v15  ;;  %v729_v5 = vsel %vm229_vm0, %v716_v12, 0.0  ;;  %v4012_v15 = vld [vmem:[#allocation16_spill] sm:$0xff] }
 0x157   :  { %v726_v9 = vadd.f32 %v725_v46, %v724_v41  ;;  %v755_v62 = vadd.f32 %v754_v10, %v753_v7  ;;  %v758_v7 = vsel %vm229_vm0, %v745_v0, 0.0  ;;  %v731_v10 = vsel %vm229_vm0, %v717_v48, 0.0  ;;  %v3982_v0 = vld [vmem:[#allocation27_spill] sm:$0xff] }
 0x158   :  { %v2939_v53 = vpop.permute.xlu1 %1494  ;;  %v2972_v48 = vmul.f32 %v3982_v0, %v3982_v0 }
 0x159   :  { %3976 = vst [vmem:[#allocation68_spill] sm:$0xff] %v2939_v53  ;;  %v728_v3 = vadd.f32 %v727_v38, %v726_v9  ;;  %v757_v41 = vadd.f32 %v756_v50, %v755_v62  ;;  %v760_v9 = vsel %vm229_vm0, %v746_v21, 0.0  ;;  %v3979_v38 = vld [vmem:[#allocation26_spill] sm:$0xff]  ;;  %v3981_v62 = vld [vmem:[#allocation25_spill] sm:$0xff] }
 0x15a   :  { %v174_v8 = vmul.f32 %v3979_v38, %v3979_v38  ;;  %v2966_v12 = vmul.f32 %v3981_v62, %v3981_v62  ;;  %v3987_v38 = vld [vmem:[#allocation35_spill] sm:$0xff] }
 0x15b   :  { %v730_v56 = vadd.f32 %v729_v5, %v728_v3  ;;  %v759_v25 = vadd.f32 %v758_v7, %v757_v41  ;;  %v2968_v3 = vpop.permute.xlu0 %317  ;;  %v3983_v41 = vld [vmem:[#allocation32_spill] sm:$0xff]  ;;  %v179_v62 = vmul.f32 %v3987_v38, %v3987_v38 }
 0x15c   :  { %v2955_v46 = vpop.permute.xlu1 %1499  ;;  %v2976_v21 = vmul.f32 %v3983_v41, %v3983_v41  ;;  %v3985_v5 = vld [vmem:[#allocation28_spill] sm:$0xff] }
 0x15d   :  { %3978 = vst [vmem:[#allocation70_spill] sm:$0xff] %v2955_v46  ;;  %v732_v52 = vadd.f32 %v731_v10, %v730_v56  ;;  %v761_v26 = vadd.f32 %v760_v9, %v759_v25  ;;  %v2980_v56 = vmul.f32 %v3985_v5, %v3985_v5  ;;  %v3986_v10 = vld [vmem:[#allocation30_spill] sm:$0xff]  ;;  %v484_v5 = vmul.f32 %v2738_v18, %v2738_v18 }
 0x15e   :  { %3984 = vst [vmem:[#allocation25_spill] sm:$0xff] %v2976_v21  ;;  %v177_v9 = vmul.f32 %v3986_v10, %v3986_v10  ;;  %v3989_v46 = vld [vmem:[#allocation34_spill] sm:$0xff]  ;;  %v489_v10 = vmul.f32 %v2775_v37, %v2775_v37  ;;  %v4011_v21 = vld [vmem:[#allocation17_spill] sm:$0xff] }
 0x15f   :  { %v733_v50 = vrot.slane %v732_v52, 4  ;;  %v762_v25 = vrot.slane %v761_v26, 4  ;;  %v2990_v41 = vmul.f32 %v3989_v46, %v3989_v46  ;;  %v3004_v46 = vmul.f32 %v2754_v61, %v2754_v61  ;;  %v3006_v53 = vpop.permute.xlu0 %329 }
 0x160   :  { %v2962_v49 = vpop.permute.xlu1 %1509  ;;  %v185_v18 = vsub.f32 1.0, %v177_v9  ;;  %v492_v51 = vsub.f32 1.0, %v484_v5  ;;  %v3017_v61 = vmul.f32 %v2746_v42, %v2746_v42  ;;  %v497_v60 = vsub.f32 1.0, %v489_v10 }
 0x161   :  { %3980 = vst [vmem:[#allocation26_spill] sm:$0xff] %v2962_v49  ;;  %v734_v7 = vadd.f32 %v733_v50, %v732_v52  ;;  %v763_v31 = vadd.f32 %v762_v25, %v761_v26  ;;  %v182_v49 = vsub.f32 1.0, %v174_v8  ;;  %3990 = vst [vmem:[#allocation32_spill] sm:$0xff] %v2990_v41  ;;  %v2999_v26 = vmul.f32 %v2736_v20, %v2736_v20  ;;  %v4009_v41 = vld [vmem:[#allocation11_spill] sm:$0xff] }
 0x162   :  { %v487_v50 = vmul.f32 %v2760_v1, %v2760_v1  ;;  %v348_v42 = vmul.f32 %v3006_v53, %v185_v18 }
 0x163   :  { %v735_v52 = vrot.slane %v734_v7, 2  ;;  %v764_v8 = vrot.slane %v763_v31, 2  ;;  %v345_v37 = vmul.f32 %v2968_v3, %v182_v49  ;;  %v3038_v49 = vmul.f32 %v2894_v35, %v2894_v35 }
 0x164   :  { %v2986_v0 = vpop.permute.xlu1 %1519 }
 0x165   :  { %3988 = vst [vmem:[#allocation27_spill] sm:$0xff] %v2986_v0  ;;  %v736_v38 = vadd.f32 %v735_v52, %v734_v7  ;;  %v187_v0 = vsub.f32 1.0, %v179_v62  ;;  %v765_v20 = vadd.f32 %v764_v8, %v763_v31  ;;  %v3021_v7 = vmul.f32 %v2785_v30, %v2785_v30 }
 0x166   :  { %v3027_v31 = vmul.f32 %v2766_v14, %v2766_v14  ;;  %v558_v52 = vmul.f32 %v492_v51, %v2968_v3  ;;  %v495_v8 = vsub.f32 1.0, %v487_v50  ;;  %v3034_v30 = vmul.f32 %v2882_v23, %v2882_v23  ;;  %v4003_v51 = vld [vmem:[#allocation13_spill] sm:$0xff] }
 0x167   :  { %v737_v25 = vrot.slane %v736_v38, 1  ;;  %3992 = vst [vmem:[#allocation30_spill] sm:$0xff] %v3021_v7  ;;  %v766_v9 = vrot.slane %v765_v20, 1  ;;  %v3047_v10 = vsel %vm229_vm0, %v345_v37, 0.0  ;;  %v695_v23 = vmul.f32 %v2884_v19, %v2884_v19 }
 0x168   :  { %3993 = vst [vmem:[#allocation35_spill] sm:$0xff] %v3027_v31  ;;  %v3056_v18 = vsel %vm229_vm0, %v558_v52, 0.0  ;;  %v3077_v52 = vmul.f32 %v2900_v24, %v2900_v24 }
 0x169   :  { %v3013_v28 = vpop.permute.xlu1 %1700  ;;  %v738_v5 = vadd.f32 %v737_v25, %v736_v38  ;;  %v767_v1 = vadd.f32 %v766_v9, %v765_v20  ;;  %v3059_v20 = vsel %vm229_vm0, %v348_v42, 0.0  ;;  %v3062_v9 = vmul.f32 %v495_v8, %v3006_v53  ;;  %v4002_v38 = vld [vmem:[#allocation12_spill] sm:$0xff] }
 0x16a   :  { %3991 = vst [vmem:[#allocation28_spill] sm:$0xff] %v3013_v28  ;;  %v3040_v28 = vpop.permute.xlu0 %337  ;;  %3996 = vst [vmem:[#allocation72_spill] sm:$0xff] %v3059_v20  ;;  %v3081_v42 = vmul.f32 %v2912_v29, %v2912_v29  ;;  %v703_v24 = vsub.f32 1.0, %v695_v23  ;;  %v3099_v29 = vmul.f32 %v2924_v27, %v2924_v27  ;;  %v4010_v27 = vld [vmem:[#allocation6_spill] sm:$0xff] }
 0x16b   :  { %v797_v14 = vmul.f32 1.1111112, %v738_v5  ;;  %v799_v50 = vmul.f32 1.1111112, %v767_v1  ;;  %v702_v1 = vsub.f32 1.0, %v3034_v30  ;;  %v3069_v19 = vmul.f32 %v3040_v28, %v187_v0 }
 0x16d   :  { %v3042_v62 = vpop.permute.xlu1 %1705  ;;  %v3053_v35 = vadd.f32 %v797_v14, %v2829_v32  ;;  %v3066_v37 = vadd.f32 %v799_v50, %v2832_v4  ;;  %v3072_v32 = vmul.f32 %v497_v60, %v3040_v28  ;;  %v3998_v4 = vld [vmem:[#allocation20_spill] sm:$0xff]  ;;  %v4000_v60 = vld [vmem:[#allocation21_spill] sm:$0xff]  ;;  %v3095_v14 = vmul.f32 %v2904_v33, %v2904_v33  ;;  %v4001_v50 = vld [vmem:[#allocation10_spill] sm:$0xff] }
 0x16e   :  { %3994 = vst [vmem:[#allocation34_spill] sm:$0xff] %v3042_v62  ;;  %v4004_v62 = vld [vmem:[#allocation14_spill] sm:$0xff]  ;;  %v4008_v33 = vld [vmem:[#allocation15_spill] sm:$0xff] }
 0x16f   :  { %3995 = vst [vmem:[#allocation71_spill] sm:$0xff] %v3053_v35  ;;  %3997 = vst [vmem:[#allocation73_spill] sm:$0xff] %v3066_v37  ;;  %v820_v0 = vrot.slane %v3053_v35, %v3998_v4  ;;  %v832_v30 = vrot.slane %v3066_v37, %v4000_v60  ;;  %v4006_v60 = vld [vmem:[#allocation7_spill] sm:$0xff] }
 0x170   :  { %806 = vst.msk [vmem:[#allocation2 + $0x8] sm:$0x1] %vm381_vm2, %v3053_v35 }
 0x171   :  { %v3087_v8 = vpop.permute.xlu1 %1715  ;;  %807 = vst.msk [vmem:[#allocation2 + $0x8] sm:$0x2] %vm383_vm1, %v3066_v37  ;;  %v821_v25 = vmul.f32 %v820_v0, %v4001_v50  ;;  %v822_v5 = vmul.f32 %v820_v0, %v4002_v38  ;;  %v824_v22 = vmul.f32 %v820_v0, %v4004_v62  ;;  %v833_v4 = vmul.f32 %v832_v30, %v4005_v63  ;;  %v4007_v37 = vld [vmem:[#allocation9_spill] sm:$0xff] }
 0x172   :  { %3999 = vst [vmem:[#allocation74_spill] sm:$0xff] %v3087_v8  ;;  %v823_v8 = vmul.f32 %v820_v0, %v4003_v51  ;;  %v834_v23 = vmul.f32 %v832_v30, %v4006_v60  ;;  %v835_v35 = vmul.f32 %v832_v30, %v4007_v37  ;;  %v825_v7 = vmul.f32 %v820_v0, %v4008_v33  ;;  %v4014_v37 = vld [vmem:[#allocation8_spill] sm:$0xff] }
 0x173   :  { %v836_v31 = vmul.f32 %v832_v30, %v4009_v41  ;;  %v837_v20 = vmul.f32 %v832_v30, %v4010_v27  ;;  %v826_v50 = vmul.f32 %v820_v0, %v4011_v21  ;;  %v827_v38 = vmul.f32 %v820_v0, %v4012_v15  ;;  %v4015_v41 = vld [vmem:[#allocation40_spill] sm:$0xff]  ;;  %v4016_v27 = vld [vmem:[#allocation47_spill] sm:$0xff]  ;;  %v4017_v21 = vld [vmem:[#allocation49_spill] sm:$0xff] }
 0x174   :  { %v841_v51 = vadd.f32 %v833_v4, %v821_v25  ;;  %v842_v62 = vadd.f32 %v834_v23, %v822_v5  ;;  %v843_v2 = vadd.f32 %v835_v35, %v823_v8  ;;  %v828_v63 = vmul.f32 %v820_v0, %v2493_v34 }
 0x175   :  { %v3113_v55 = vpop.permute.xlu1 %1725  ;;  %v844_v60 = vadd.f32 %v836_v31, %v824_v22  ;;  %v845_v17 = vadd.f32 %v837_v20, %v825_v7  ;;  %v838_v59 = vmul.f32 %v832_v30, %v4014_v37  ;;  %v839_v33 = vmul.f32 %v832_v30, %v2505_v39  ;;  %v4019_v22 = vld [vmem:[#allocation51_spill] sm:$0xff] }
 0x176   :  { %4013 = vst [vmem:[#allocation75_spill] sm:$0xff] %v3113_v55  ;;  %v889_v13 = vadd.f32 %v4015_v41, %v841_v51  ;;  %v890_v43 = vadd.f32 %v4016_v27, %v842_v62  ;;  %v891_v16 = vadd.f32 %v4017_v21, %v843_v2  ;;  %v840_v15 = vmul.f32 %v832_v30, %v2516_v44  ;;  %v4018_v55 = vld [vmem:[#allocation41_spill] sm:$0xff]  ;;  %v4020_v41 = vld [vmem:[#allocation42_spill] sm:$0xff] }
 0x177   :  { %v892_v25 = vadd.f32 %v4018_v55, %v844_v60  ;;  %v846_v5 = vadd.f32 %v838_v59, %v826_v50  ;;  %v847_v35 = vadd.f32 %v839_v33, %v827_v38  ;;  %v769_v4 = vmul.f32 %v703_v24, %v2968_v3  ;;  %v4022_v55 = vld [vmem:[#allocation52_spill] sm:$0xff] }
 0x178   :  { %2197 = vtanh.f32 %v889_v13  ;;  %v893_v7 = vadd.f32 %v4019_v22, %v845_v17  ;;  %v848_v31 = vadd.f32 %v840_v15, %v828_v63  ;;  %v706_v20 = vsub.f32 1.0, %v3095_v14  ;;  %v4024_v63 = vld [vmem:[#allocation43_spill] sm:$0xff] }
 0x179   :  { %2199 = vtanh.f32 %v890_v43  ;;  %v894_v62 = vadd.f32 %v4020_v41, %v846_v5  ;;  %v708_v2 = vsub.f32 1.0, %v3099_v29  ;;  %v4021_v21 = vsub.f32 1.0, %v2966_v12 }
 0x17a   :  { %v3126_v0 = vpop.permute.xlu1 %313  ;;  %2201 = vtanh.f32 %v891_v16  ;;  %v895_v51 = vadd.f32 %v4022_v55, %v847_v35  ;;  %v4023_v13 = vsub.f32 1.0, %v2999_v26  ;;  %v896_v43 = vadd.f32 %v4024_v63, %v848_v31 }
 0x17b   :  { %v344_v59 = vmul.f32 %v3126_v0, %v4021_v21  ;;  %v768_v17 = vmul.f32 %v702_v1, %v3126_v0  ;;  %2203 = vtanh.f32 %v892_v25  ;;  %v777_v38 = vsel %vm229_vm0, %v769_v4, 0.0 }
 0x17c   :  { %v557_v15 = vmul.f32 %v4023_v13, %v3126_v0  ;;  %2205 = vtanh.f32 %v893_v7  ;;  %v4025_v24 = vsub.f32 1.0, %v2972_v48  ;;  %v3152_v29 = vmul.f32 %v2932_v45, %v2932_v45 }
 0x17d   :  { %v352_v8 = vsel %vm229_vm0, %v344_v59, 0.0  ;;  %v776_v60 = vsel %vm229_vm0, %v768_v17, 0.0  ;;  %2207 = vtanh.f32 %v894_v62  ;;  %v4027_v23 = vsub.f32 1.0, %v3038_v49 }
 0x17e   :  { %v354_v12 = vadd.f32 %v3047_v10, %v352_v8  ;;  %v565_v16 = vsel %vm229_vm0, %v557_v15, 0.0  ;;  %v3144_v30 = vpop.permute.xlu1 %321  ;;  %v778_v1 = vadd.f32 %v777_v38, %v776_v60  ;;  %2209 = vtanh.f32 %v895_v51 }
 0x17f   :  { %v567_v26 = vadd.f32 %v3056_v18, %v565_v16  ;;  %v346_v14 = vmul.f32 %v3144_v30, %v4025_v24  ;;  %v4026_v10 = vsub.f32 1.0, %v3017_v61  ;;  %v770_v33 = vmul.f32 %v4027_v23, %v3144_v30 }
 0x180   :  { %2211 = vtanh.f32 %v896_v43  ;;  %v3162_v18 = vsel %vm229_vm0, %v3062_v9, 0.0  ;;  %v772_v48 = vmul.f32 %v706_v20, %v3006_v53  ;;  %v774_v45 = vmul.f32 %v708_v2, %v3040_v28 }
 0x181   :  { %v559_v50 = vmul.f32 %v4026_v10, %v3144_v30  ;;  %v355_v27 = vsel %vm229_vm0, %v346_v14, 0.0  ;;  %v779_v61 = vsel %vm229_vm0, %v770_v33, 0.0  ;;  %v3173_v49 = vsel %vm229_vm0, %v3069_v19, 0.0 }
 0x182   :  { %v356_v25 = vadd.f32 %v355_v27, %v354_v12  ;;  %v3169_v35 = vpop.permute.xlu1 %325  ;;  %v3177_v9 = vadd.f32 %v779_v61, %v778_v1  ;;  %v4028_v22 = vsub.f32 1.0, %v2980_v56  ;;  %v2198_v31 = vpop.eup %2197  ;;  %v705_v20 = vsub.f32 1.0, %v3077_v52 }
 0x183   :  { %v568_v5 = vsel %vm229_vm0, %v559_v50, 0.0  ;;  %v3187_v2 = vsel %vm229_vm0, %v3072_v32, 0.0  ;;  %v2200_v19 = vpop.eup %2199  ;;  %v921_v21 = vmul.f32 %v2198_v31, %v2520_v47  ;;  %v950_v59 = vmul.f32 %v2198_v31, %v2555_v11 }
 0x184   :  { %v3175_v4 = vadd.f32 %v568_v5, %v567_v26  ;;  %v347_v7 = vmul.f32 %v3169_v35, %v4028_v22  ;;  %v3192_v56 = vsel %vm229_vm0, %v772_v48, 0.0  ;;  %v2202_v51 = vpop.eup %2201  ;;  %v922_v52 = vmul.f32 %v2200_v19, %v2544_v57 }
 0x185   :  { %v951_v13 = vmul.f32 %v2200_v19, %v2507_v40  ;;  %v3198_v15 = vsel %vm229_vm0, %v774_v45, 0.0  ;;  %v3202_v17 = vpop.eup %2203  ;;  %v906_v63 = vmul.f32 %v2200_v19, %v2200_v19  ;;  %v929_v43 = vsel %vm229_vm0, %v921_v21, 0.0  ;;  %v4030_v19 = vld [vmem:[#allocation24_spill] sm:$0xff]  ;;  %v4031_v21 = vld [vmem:[#allocation19_spill] sm:$0xff] }
 0x186   :  { %v357_v55 = vsel %vm229_vm0, %v347_v7, 0.0  ;;  %v958_v38 = vsel %vm229_vm0, %v950_v59, 0.0  ;;  %v923_v8 = vmul.f32 %v2202_v51, %v2565_v58  ;;  %v2206_v12 = vpop.eup %2205  ;;  %v930_v16 = vsel %vm229_vm0, %v922_v52, 0.0 }
 0x187   :  { %v3200_v32 = vadd.f32 %v357_v55, %v356_v25  ;;  %v959_v60 = vsel %vm229_vm0, %v951_v13, 0.0  ;;  %v907_v26 = vmul.f32 %v2202_v51, %v2202_v51  ;;  %v952_v1 = vmul.f32 %v2202_v51, %v2574_v6  ;;  %v3210_v24 = vpop.eup %2207 }
 0x188   :  { %v931_v14 = vadd.f32 %v930_v16, %v929_v43  ;;  %v960_v10 = vadd.f32 %v959_v60, %v958_v38  ;;  %v905_v50 = vmul.f32 %v2198_v31, %v2198_v31  ;;  %v4029_v23 = vsub.f32 1.0, %v3004_v46  ;;  %v2210_v48 = vpop.eup %2209 }
 0x189   :  { %v932_v27 = vsel %vm229_vm0, %v923_v8, 0.0  ;;  %v961_v45 = vsel %vm229_vm0, %v952_v1, 0.0  ;;  %v924_v25 = vmul.f32 %v3202_v17, %v2537_v54  ;;  %v925_v5 = vmul.f32 %v2206_v12, %v2601_v36  ;;  %v4032_v8 = vld [vmem:[#allocation29_spill] sm:$0xff] }
 0x18a   :  { %v560_v33 = vmul.f32 %v4029_v23, %v3169_v35  ;;  %v3220_v61 = vpop.eup %2211  ;;  %v933_v22 = vadd.f32 %v932_v27, %v931_v14  ;;  %v962_v7 = vadd.f32 %v961_v45, %v960_v10  ;;  %v953_v31 = vmul.f32 %v3202_v17, %v4030_v19  ;;  %v4033_v14 = vld [vmem:[#allocation22_spill] sm:$0xff]  ;;  %v4035_v27 = vld [vmem:[#allocation33_spill] sm:$0xff] }
 0x18b   :  { %v954_v46 = vmul.f32 %v2206_v12, %v4031_v21  ;;  %v914_v59 = vsub.f32 1.0, %v906_v63  ;;  %v915_v55 = vsub.f32 1.0, %v907_v26  ;;  %v3225_v51 = vmul.f32 %v2206_v12, %v2206_v12  ;;  %v4034_v23 = vld [vmem:[#allocation38_spill] sm:$0xff] }
 0x18c   :  { %v934_v52 = vsel %vm229_vm0, %v924_v25, 0.0  ;;  %v936_v43 = vsel %vm229_vm0, %v925_v5, 0.0  ;;  %v963_v38 = vsel %vm229_vm0, %v953_v31, 0.0  ;;  %v926_v16 = vmul.f32 %v3210_v24, %v4032_v8  ;;  %v4036_v25 = vld [vmem:[#allocation37_spill] sm:$0xff] }
 0x18d   :  { %v935_v13 = vadd.f32 %v934_v52, %v933_v22  ;;  %v964_v60 = vadd.f32 %v963_v38, %v962_v7  ;;  %v3232_v1 = vmul.f32 %v2210_v48, %v2210_v48  ;;  %v927_v10 = vmul.f32 %v2210_v48, %v4033_v14  ;;  %v4037_v52 = vld [vmem:[#allocation23_spill] sm:$0xff] }
 0x18e   :  { %v928_v63 = vmul.f32 %v3220_v61, %v4034_v23  ;;  %v965_v26 = vsel %vm229_vm0, %v954_v46, 0.0  ;;  %v955_v45 = vmul.f32 %v3210_v24, %v4035_v27  ;;  %v956_v5 = vmul.f32 %v2210_v48, %v4036_v25  ;;  %v3253_v25 = vpop.permute.xlu1 %333 }
 0x18f   :  { %v937_v12 = vadd.f32 %v936_v43, %v935_v13  ;;  %v966_v22 = vadd.f32 %v965_v26, %v964_v60  ;;  %v938_v31 = vsel %vm229_vm0, %v926_v16, 0.0  ;;  %v957_v7 = vmul.f32 %v3220_v61, %v4037_v52 }
 0x190   :  { %v771_v38 = vmul.f32 %v705_v20, %v3169_v35  ;;  %v917_v62 = vsub.f32 1.0, %v3225_v51  ;;  %v967_v13 = vsel %vm229_vm0, %v955_v45, 0.0  ;;  %v980_v46 = vmul.f32 %v914_v59, %v2968_v3 }
 0x191   :  { %v939_v41 = vadd.f32 %v938_v31, %v937_v12  ;;  %v919_v43 = vsub.f32 1.0, %v3232_v1  ;;  %v940_v23 = vsel %vm229_vm0, %v927_v10, 0.0  ;;  %v942_v48 = vsel %vm229_vm0, %v928_v63, 0.0 }
 0x192   :  { %v968_v60 = vadd.f32 %v967_v13, %v966_v22  ;;  %v969_v26 = vsel %vm229_vm0, %v956_v5, 0.0  ;;  %v913_v52 = vsub.f32 1.0, %v905_v50  ;;  %v981_v20 = vmul.f32 %v915_v55, %v3144_v30  ;;  %v4038_v5 = vld [vmem:[#allocation25_spill] sm:$0xff] }
 0x193   :  { %v941_v16 = vadd.f32 %v940_v23, %v939_v41  ;;  %v971_v12 = vsel %vm229_vm0, %v957_v7, 0.0  ;;  %v988_v59 = vsel %vm229_vm0, %v980_v46, 0.0  ;;  %v570_v1 = vsel %vm229_vm0, %v560_v33, 0.0 }
 0x194   :  { %v970_v51 = vadd.f32 %v969_v26, %v968_v60  ;;  %v979_v10 = vmul.f32 %v913_v52, %v3126_v0  ;;  %v990_v63 = vsel %vm229_vm0, %v981_v20, 0.0  ;;  %v571_v41 = vadd.f32 %v570_v1, %v3175_v4  ;;  %v4040_v52 = vld [vmem:[#allocation72_spill] sm:$0xff] }
 0x195   :  { %v943_v45 = vadd.f32 %v942_v48, %v941_v16  ;;  %v781_v50 = vsel %vm229_vm0, %v771_v38, 0.0  ;;  %v908_v55 = vmul.f32 %v3202_v17, %v3202_v17  ;;  %v4039_v22 = vsub.f32 1.0, %v4038_v5  ;;  %v4041_v17 = vld [vmem:[#allocation35_spill] sm:$0xff] }
 0x196   :  { %v972_v23 = vadd.f32 %v971_v12, %v970_v51  ;;  %v987_v33 = vsel %vm229_vm0, %v979_v10, 0.0  ;;  %v782_v13 = vadd.f32 %v781_v50, %v3177_v9  ;;  %v360_v46 = vadd.f32 %v4040_v52, %v3200_v32 }
 0x197   :  { %v349_v31 = vmul.f32 %v3253_v25, %v4039_v22  ;;  %v944_v7 = vrot.slane %v943_v45, 4  ;;  %v989_v4 = vadd.f32 %v988_v59, %v987_v33  ;;  %v916_v60 = vsub.f32 1.0, %v908_v55  ;;  %v3284_v22 = vpop.permute.xlu1 %341 }
 0x198   :  { %v973_v48 = vrot.slane %v972_v23, 4  ;;  %v4042_v20 = vsub.f32 1.0, %v4041_v17  ;;  %v573_v12 = vadd.f32 %v3162_v18, %v571_v41  ;;  %v4043_v32 = vsub.f32 1.0, %v3081_v42  ;;  %4044 = vst [vmem:[#allocation40_spill] sm:$0xff] %v3284_v22 }
 0x199   :  { %v361_v38 = vsel %vm229_vm0, %v349_v31, 0.0  ;;  %v945_v16 = vadd.f32 %v944_v7, %v943_v45  ;;  %v991_v10 = vadd.f32 %v990_v63, %v989_v4  ;;  %v982_v9 = vmul.f32 %v916_v60, %v3169_v35 }
 0x19a   :  { %v362_v26 = vadd.f32 %v361_v38, %v360_v46  ;;  %v562_v51 = vmul.f32 %v4042_v20, %v3253_v25  ;;  %v974_v1 = vadd.f32 %v973_v48, %v972_v23  ;;  %v773_v50 = vmul.f32 %v4043_v32, %v3253_v25  ;;  %v4045_v46 = vld [vmem:[#allocation32_spill] sm:$0xff]  ;;  %v4047_v48 = vld [vmem:[#allocation30_spill] sm:$0xff] }
 0x19b   :  { %v946_v59 = vrot.slane %v945_v16, 2  ;;  %v784_v45 = vadd.f32 %v3192_v56, %v782_v13  ;;  %v910_v5 = vmul.f32 %v3210_v24, %v3210_v24  ;;  %v983_v18 = vmul.f32 %v917_v62, %v3006_v53 }
 0x19c   :  { %v574_v55 = vsel %vm229_vm0, %v562_v51, 0.0  ;;  %v975_v31 = vrot.slane %v974_v1, 2  ;;  %v785_v41 = vsel %vm229_vm0, %v773_v50, 0.0  ;;  %v985_v42 = vmul.f32 %v919_v43, %v3040_v28 }
 0x19d   :  { %v575_v63 = vadd.f32 %v574_v55, %v573_v12  ;;  %v947_v23 = vadd.f32 %v946_v59, %v945_v16  ;;  %v992_v7 = vsel %vm229_vm0, %v982_v9, 0.0  ;;  %v786_v33 = vadd.f32 %v785_v41, %v784_v45 }
 0x19e   :  { %v976_v52 = vadd.f32 %v975_v31, %v974_v1  ;;  %v4046_v56 = vsub.f32 1.0, %v4045_v46  ;;  %v364_v24 = vadd.f32 %v3173_v49, %v362_v26  ;;  %v4048_v4 = vsub.f32 1.0, %v4047_v48  ;;  %v4051_v46 = vld [vmem:[#allocation73_spill] sm:$0xff] }
 0x19f   :  { %v948_v60 = vrot.slane %v947_v23, 1  ;;  %v993_v38 = vadd.f32 %v992_v7, %v991_v10  ;;  %v918_v17 = vsub.f32 1.0, %v910_v5  ;;  %v577_v16 = vadd.f32 %v3187_v2, %v575_v63 }
 0x1a0   :  { %v351_v13 = vmul.f32 %v3284_v22, %v4046_v56  ;;  %v564_v62 = vmul.f32 %v4048_v4, %v3284_v22  ;;  %v977_v43 = vrot.slane %v976_v52, 1  ;;  %v4049_v12 = vsub.f32 1.0, %v3152_v29  ;;  %v1865_v29 = vld [vmem:[%s3823_s1 + $0x8] sm:$0xff] }
 0x1a1   :  { %v949_v9 = vadd.f32 %v948_v60, %v947_v23  ;;  %v994_v49 = vsel %vm229_vm0, %v983_v18, 0.0  ;;  %v984_v10 = vmul.f32 %v918_v17, %v3253_v25  ;;  %v788_v59 = vadd.f32 %v3198_v15, %v786_v33  ;;  %v1864_v18 = vld [vmem:[%s3823_s1] sm:$0xff]  ;;  %v4050_v15 = vld [vmem:[#allocation71_spill] sm:$0xff] }
 0x1a2   :  { %v365_v20 = vsel %vm229_vm0, %v351_v13, 0.0  ;;  %v578_v51 = vsel %vm229_vm0, %v564_v62, 0.0  ;;  %v775_v1 = vmul.f32 %v4049_v12, %v3284_v22  ;;  %v978_v50 = vadd.f32 %v977_v43, %v976_v52  ;;  %v1866_v60 = vld [vmem:[%s3823_s1 + $0x10] sm:$0xff] }
 0x1a3   :  { %v366_v26 = vadd.f32 %v365_v20, %v364_v24  ;;  %v579_v32 = vadd.f32 %v578_v51, %v577_v16  ;;  %v1008_v55 = vmul.f32 1.1111112, %v949_v9  ;;  %v995_v45 = vadd.f32 %v994_v49, %v993_v38  ;;  %v4053_v24 = vld [vmem:[#allocation20_spill] sm:$0xff]  ;;  %v4054_v38 = vld [vmem:[#allocation21_spill] sm:$0xff]  ;;  %v4057_v49 = vld [vmem:[#allocation15_spill] sm:$0xff] }
 0x1a4   :  { %v789_v2 = vsel %vm229_vm0, %v775_v1, 0.0  ;;  %v1010_v63 = vmul.f32 1.1111112, %v978_v50  ;;  %v912_v23 = vmul.f32 %v3220_v61, %v3220_v61  ;;  %v2331_v52 = vmov 13   ;;  %v1867_v51 = vld [vmem:[%s3823_s1 + $0x18] sm:$0xff]  ;;  %v4056_v1 = vld [vmem:[#allocation10_spill] sm:$0xff] }
 0x1a5   :  { %v367_v5 = vrot.slane %v366_v26, 4  ;;  %v580_v31 = vrot.slane %v579_v32, 4  ;;  %v790_v41 = vadd.f32 %v789_v2, %v788_v59  ;;  %v3316_v7 = vadd.f32 %v1008_v55, %v4050_v15  ;;  %2148 = vset.pattern.permute.xlu1 %v2331_v52  ;;  %2147 = vset.pattern.permute.xlu0 %v2331_v52  ;;  %v4060_v2 = vld [vmem:[#allocation5_spill] sm:$0xff]  ;;  %v4065_v52 = vld [vmem:[#allocation11_spill] sm:$0xff] }
 0x1a6   :  { %v3319_v56 = vadd.f32 %v1010_v63, %v4051_v46  ;;  %v996_v13 = vsel %vm229_vm0, %v984_v10, 0.0  ;;  %1911 = vperm.xlu1 %2148, %v1865_v29   ;;  %1906 = vperm.xlu0 %2147, %v1864_v18   ;;  %v998_v48 = vsel %vm229_vm0, %v985_v42, 0.0  ;;  %v920_v20 = vsub.f32 1.0, %v912_v23  ;;  %v4055_v42 = vld [vmem:[#allocation12_spill] sm:$0xff]  ;;  %v4059_v10 = vld [vmem:[#allocation7_spill] sm:$0xff]  ;;  %v4064_v23 = vld [vmem:[#allocation14_spill] sm:$0xff] }
 0x1a7   :  { %v368_v33 = vadd.f32 %v367_v5, %v366_v26  ;;  %1017 = vst.msk [vmem:[#allocation2 + $0xc] sm:$0x1] %vm381_vm2, %v3316_v7  ;;  %v1031_v61 = vrot.slane %v3316_v7, %v4053_v24  ;;  %v997_v4 = vadd.f32 %v996_v13, %v995_v45  ;;  %v581_v62 = vadd.f32 %v580_v31, %v579_v32  ;;  %v4058_v32 = vld [vmem:[#allocation13_spill] sm:$0xff]  ;;  %v4061_v45 = vld [vmem:[#allocation6_spill] sm:$0xff]  ;;  %v4063_v18 = vld [vmem:[#allocation16_spill] sm:$0xff] }
 0x1a8   :  { %4052 = vst [vmem:[#allocation47_spill] sm:$0xff] %v3319_v56  ;;  %1018 = vst.msk [vmem:[#allocation2 + $0xc] sm:$0x2] %vm383_vm1, %v3319_v56  ;;  %v1043_v17 = vrot.slane %v3319_v56, %v4054_v38  ;;  %v791_v43 = vrot.slane %v790_v41, 4  ;;  %v4062_v31 = vld [vmem:[#allocation9_spill] sm:$0xff]  ;;  %v4068_v38 = vld [vmem:[#allocation54_spill] sm:$0xff] }
 0x1a9   :  { %v369_v16 = vrot.slane %v368_v33, 2  ;;  %v1033_v12 = vmul.f32 %v1031_v61, %v4055_v42  ;;  %v1032_v9 = vmul.f32 %v1031_v61, %v4056_v1  ;;  %v1036_v26 = vmul.f32 %v1031_v61, %v4057_v49  ;;  %v1868_v49 = vld [vmem:[%s3823_s1 + $0x20] sm:$0xff] }
 0x1aa   :  { %v1034_v50 = vmul.f32 %v1031_v61, %v4058_v32  ;;  %v1045_v59 = vmul.f32 %v1043_v17, %v4059_v10  ;;  %v1044_v55 = vmul.f32 %v1043_v17, %v4060_v2  ;;  %v1048_v5 = vmul.f32 %v1043_v17, %v4061_v45  ;;  %1916 = vperm.xlu1 %2148, %v1866_v60   ;;  %v1869_v60 = vld [vmem:[%s3823_s1 + $0x28] sm:$0xff] }
 0x1ab   :  { %v1046_v29 = vmul.f32 %v1043_v17, %v4062_v31  ;;  %v1038_v63 = vmul.f32 %v1031_v61, %v4063_v18  ;;  %v1035_v15 = vmul.f32 %v1031_v61, %v4064_v23  ;;  %v1047_v46 = vmul.f32 %v1043_v17, %v4065_v52  ;;  %1921 = vperm.xlu0 %2147, %v1867_v51   ;;  %v4066_v31 = vld [vmem:[#allocation17_spill] sm:$0xff]  ;;  %v4067_v51 = vld [vmem:[#allocation44_spill] sm:$0xff] }
 0x1ac   :  { %v582_v13 = vrot.slane %v581_v62, 2  ;;  %v1053_v10 = vadd.f32 %v1045_v59, %v1033_v12  ;;  %v1052_v32 = vadd.f32 %v1044_v55, %v1032_v9  ;;  %v1056_v2 = vadd.f32 %v1048_v5, %v1036_v26  ;;  %v4069_v56 = vld [vmem:[#allocation45_spill] sm:$0xff]  ;;  %v4070_v26 = vld [vmem:[#allocation56_spill] sm:$0xff] }
 0x1ad   :  { %v1054_v42 = vadd.f32 %v1046_v29, %v1034_v50  ;;  %v1050_v18 = vmul.f32 %v1043_v17, %v2505_v39  ;;  %v1055_v45 = vadd.f32 %v1047_v46, %v1035_v15  ;;  %v1037_v23 = vmul.f32 %v1031_v61, %v4066_v31  ;;  %v1870_v29 = vld [vmem:[%s3823_s1 + $0x30] sm:$0xff] }
 0x1ae   :  { %v1049_v52 = vmul.f32 %v1043_v17, %v4014_v37  ;;  %v1101_v1 = vadd.f32 %v4067_v51, %v1053_v10  ;;  %v1100_v24 = vadd.f32 %v4068_v38, %v1052_v32  ;;  %v1104_v12 = vadd.f32 %v4069_v56, %v1056_v2  ;;  %1926 = vperm.xlu1 %2148, %v1868_v49   ;;  %v1871_v56 = vld [vmem:[%s3823_s1 + $0x38] sm:$0xff]  ;;  %v4073_v2 = vld [vmem:[#allocation46_spill] sm:$0xff] }
 0x1af   :  { %v986_v9 = vmul.f32 %v920_v20, %v3284_v22  ;;  %v1102_v50 = vadd.f32 %v4070_v26, %v1054_v42  ;;  %v792_v55 = vadd.f32 %v791_v43, %v790_v41  ;;  %v999_v5 = vadd.f32 %v998_v48, %v997_v4  ;;  %1931 = vperm.xlu0 %2147, %v1869_v60   ;;  %v4071_v42 = vld [vmem:[#allocation57_spill] sm:$0xff] }
 0x1b0   :  { %v1057_v59 = vadd.f32 %v1049_v52, %v1037_v23  ;;  %2213 = vtanh.f32 %v1101_v1  ;;  %v1039_v10 = vmul.f32 %v1031_v61, %v2493_v34  ;;  %v1051_v38 = vmul.f32 %v1043_v17, %v2516_v44  ;;  %v4072_v1 = vld [vmem:[#allocation59_spill] sm:$0xff]  ;;  %v2293_v52 = vld [vmem:[%s3822_s0] sm:$0x7]  ;;  %s2332_s0 = smov [#allocation2]  }
 0x1b1   :  { %v370_v32 = vadd.f32 %v369_v16, %v368_v33  ;;  %2215 = vtanh.f32 %v1100_v24  ;;  %v1058_v20 = vadd.f32 %v1050_v18, %v1038_v63  ;;  %v1103_v41 = vadd.f32 %v4071_v42, %v1055_v45  ;;  %s2080_s16 = sshll.u32 %s2332_s0, 4  ;;  %s2081_s16 = int_to_ptr.vmem [resolvable:$true] %s2080_s16 }
 0x1b2   :  { %2217 = vtanh.f32 %v1104_v12  ;;  %v583_v4 = vadd.f32 %v582_v13, %v581_v62  ;;  %v1000_v43 = vsel %vm229_vm0, %v986_v9, 0.0  ;;  %1936 = vperm.xlu1 %2148, %v1870_v29   ;;  %v1105_v61 = vadd.f32 %v4072_v1, %v1057_v59  ;;  %v4074_v62 = vld [vmem:[#allocation61_spill] sm:$0xff]  ;;  %s2294_s17 = scalar_lea.vmem %s2081_s16, 576  ;;  %p2299_p1 = scmp.lt.s32.totalorder %s2081_s16, %s2081_s16 }
 0x1b3   :  { %v371_v48 = vrot.slane %v370_v32, 1  ;;  %2219 = vtanh.f32 %v1102_v50  ;;  %v793_v49 = vrot.slane %v792_v55, 2  ;;  %v1001_v17 = vadd.f32 %v1000_v43, %v999_v5  ;;  %1941 = vperm.xlu0 %2147, %v1871_v56   ;;  %p2295_p0 = scmp.ne.s32.totalorder %s2081_s16, %s2294_s17  ;;  %p2300_p2 = scmp.lt.s32.totalorder %s2294_s17, %s2294_s17 }
 0x1b4   :  { %v1059_v33 = vadd.f32 %v1051_v38, %v1039_v10  ;;  %v1106_v23 = vadd.f32 %v4073_v2, %v1058_v20  ;;  %2221 = vtanh.f32 %v1103_v41  ;;  %v584_v45 = vrot.slane %v583_v4, 1 }
 0x1b5   :  { %v372_v16 = vadd.f32 %v371_v48, %v370_v32  ;;  %v1002_v24 = vrot.slane %v1001_v17, 4  ;;  %2223 = vtanh.f32 %v1105_v61  ;;  %v794_v63 = vadd.f32 %v793_v49, %v792_v55  ;;  %p2301_p3 = por %p2300_p2, %p2299_p1 }
 0x1b6   :  { %v1107_v15 = vadd.f32 %v4074_v62, %v1059_v33  ;;  %2225 = vtanh.f32 %v1106_v23  ;;  %v3378_v12 = vadd.f32 %v584_v45, %v583_v4 }
 0x1b7   :  { %v377_v18 = vsub.f32 0.0, %v372_v16  ;;  %v1003_v13 = vadd.f32 %v1002_v24, %v1001_v17  ;;  %v795_v55 = vrot.slane %v794_v63, 1  ;;  %p2302_p4 = pnand %p2301_p3, %p2295_p0 }
 0x1b8   :  { %2227 = vtanh.f32 %v1107_v15  ;;  %v590_v2 = vsub.f32 0.0, %v3378_v12 }
 0x1b9   :  { %v378_v46 = vmul.f32 %v2293_v52, %v377_v18  ;;  %v1004_v41 = vrot.slane %v1003_v13, 2  ;;  %v3396_v45 = vadd.f32 %v795_v55, %v794_v63 }
 0x1ba   :  { %v2214_v60 = vpop.eup %2213 }
 0x1bb   :  { %v379_v51 = vmul.f32 1.1111112, %v378_v46  ;;  %v2216_v9 = vpop.eup %2215  ;;  %v1117_v26 = vmul.f32 %v2214_v60, %v2214_v60  ;;  %v1133_v50 = vmul.f32 %v2214_v60, %v2544_v57  ;;  %v1162_v59 = vmul.f32 %v2214_v60, %v2507_v40 }
 0x1bc   :  { %v2218_v5 = vpop.eup %2217  ;;  %v1132_v29 = vmul.f32 %v2216_v9, %v2520_v47  ;;  %v1161_v10 = vmul.f32 %v2216_v9, %v2555_v11  ;;  %v1116_v56 = vmul.f32 %v2216_v9, %v2216_v9  ;;  %v3398_v62 = vadd.f32 %v1004_v41, %v1003_v13 }
 0x1bd   :  { %v3384_v38 = vadd.f32 %v2293_v52, %v379_v51  ;;  %v2220_v32 = vpop.eup %2219  ;;  %v1141_v20 = vsel %vm229_vm0, %v1133_v50, 0.0  ;;  %v1170_v42 = vsel %vm229_vm0, %v1162_v59, 0.0  ;;  %v1125_v1 = vsub.f32 1.0, %v1117_v26 }
 0x1be   :  { %v1140_v48 = vsel %vm229_vm0, %v1132_v29, 0.0  ;;  %v1169_v4 = vsel %vm229_vm0, %v1161_v10, 0.0  ;;  %v2222_v43 = vpop.eup %2221  ;;  %v1120_v17 = vmul.f32 %v2218_v5, %v2218_v5  ;;  %v1134_v33 = vmul.f32 %v2220_v32, %v2565_v58 }
 0x1bf   :  { %386 = vst.msk [vmem:[#allocation2] sm:$0x4] %vm385_vm3, %v3384_v38  ;;  %v1142_v61 = vadd.f32 %v1141_v20, %v1140_v48  ;;  %v1171_v49 = vadd.f32 %v1170_v42, %v1169_v4  ;;  %v1163_v16 = vmul.f32 %v2220_v32, %v2574_v6  ;;  %v2224_v23 = vpop.eup %2223  ;;  %v1124_v24 = vsub.f32 1.0, %v1116_v56 }
 0x1c0   :  { %v1135_v18 = vmul.f32 %v2222_v43, %v2537_v54  ;;  %v1118_v15 = vmul.f32 %v2220_v32, %v2220_v32  ;;  %v1143_v52 = vsel %vm229_vm0, %v1134_v33, 0.0  ;;  %v1164_v60 = vmul.f32 %v2222_v43, %v4030_v19  ;;  %v2226_v51 = vpop.eup %2225 }
 0x1c1   :  { %v1172_v46 = vsel %vm229_vm0, %v1163_v16, 0.0  ;;  %v1191_v9 = vmul.f32 %v1125_v1, %v2968_v3  ;;  %v1128_v26 = vsub.f32 1.0, %v1120_v17  ;;  %v1144_v12 = vadd.f32 %v1143_v52, %v1142_v61 }
 0x1c2   :  { %v1173_v50 = vadd.f32 %v1172_v46, %v1171_v49  ;;  %v1119_v59 = vmul.f32 %v2222_v43, %v2222_v43  ;;  %v1145_v29 = vsel %vm229_vm0, %v1135_v18, 0.0  ;;  %v1174_v63 = vsel %vm229_vm0, %v1164_v60, 0.0  ;;  %v2228_v20 = vpop.eup %2227  ;;  %v4075_v46 = vld [vmem:[#allocation38_spill] sm:$0xff]  ;;  %v4076_v60 = vld [vmem:[#allocation37_spill] sm:$0xff] }
 0x1c3   :  { %v1121_v13 = vmul.f32 %v2224_v23, %v2224_v23  ;;  %v1146_v55 = vadd.f32 %v1145_v29, %v1144_v12  ;;  %v1136_v32 = vmul.f32 %v2218_v5, %v2601_v36  ;;  %v1137_v56 = vmul.f32 %v2224_v23, %v4032_v8 }
 0x1c4   :  { %v1175_v10 = vadd.f32 %v1174_v63, %v1173_v50  ;;  %v1126_v42 = vsub.f32 1.0, %v1118_v15  ;;  %v1122_v41 = vmul.f32 %v2226_v51, %v2226_v51  ;;  %v1165_v48 = vmul.f32 %v2218_v5, %v4031_v21 }
 0x1c5   :  { %v1166_v4 = vmul.f32 %v2224_v23, %v4035_v27  ;;  %v1199_v43 = vsel %vm229_vm0, %v1191_v9, 0.0  ;;  %v1194_v1 = vmul.f32 %v1128_v26, %v3006_v53  ;;  %v1147_v61 = vsel %vm229_vm0, %v1136_v32, 0.0  ;;  %v4077_v26 = vld [vmem:[#allocation23_spill] sm:$0xff] }
 0x1c6   :  { %v1138_v49 = vmul.f32 %v2226_v51, %v4033_v14  ;;  %v1127_v17 = vsub.f32 1.0, %v1119_v59  ;;  %v1129_v33 = vsub.f32 1.0, %v1121_v13  ;;  %v1148_v16 = vadd.f32 %v1147_v61, %v1146_v55 }
 0x1c7   :  { %v1176_v18 = vsel %vm229_vm0, %v1165_v48, 0.0  ;;  %v1149_v15 = vsel %vm229_vm0, %v1137_v56, 0.0  ;;  %v1139_v5 = vmul.f32 %v2228_v20, %v4075_v46  ;;  %v1167_v23 = vmul.f32 %v2226_v51, %v4076_v60 }
 0x1c8   :  { %v1177_v52 = vadd.f32 %v1176_v18, %v1175_v10  ;;  %v1150_v12 = vadd.f32 %v1149_v15, %v1148_v16  ;;  %v1178_v9 = vsel %vm229_vm0, %v1166_v4, 0.0  ;;  %v1168_v50 = vmul.f32 %v2228_v20, %v4077_v26 }
 0x1c9   :  { %v1190_v29 = vmul.f32 %v1124_v24, %v3126_v0  ;;  %v1123_v59 = vmul.f32 %v2228_v20, %v2228_v20  ;;  %v1151_v13 = vsel %vm229_vm0, %v1138_v49, 0.0  ;;  %v1192_v55 = vmul.f32 %v1126_v42, %v3144_v30 }
 0x1ca   :  { %v1179_v63 = vadd.f32 %v1178_v9, %v1177_v52  ;;  %v1152_v32 = vadd.f32 %v1151_v13, %v1150_v12  ;;  %v1180_v10 = vsel %vm229_vm0, %v1167_v23, 0.0  ;;  %v1193_v51 = vmul.f32 %v1127_v17, %v3169_v35 }
 0x1cb   :  { %v1198_v56 = vsel %vm229_vm0, %v1190_v29, 0.0  ;;  %v1130_v48 = vsub.f32 1.0, %v1122_v41  ;;  %v1153_v4 = vsel %vm229_vm0, %v1139_v5, 0.0  ;;  %v1182_v24 = vsel %vm229_vm0, %v1168_v50, 0.0 }
 0x1cc   :  { %v1181_v61 = vadd.f32 %v1180_v10, %v1179_v63  ;;  %v1200_v16 = vadd.f32 %v1199_v43, %v1198_v56  ;;  %v1154_v18 = vadd.f32 %v1153_v4, %v1152_v32  ;;  %v1201_v20 = vsel %vm229_vm0, %v1192_v55, 0.0 }
 0x1cd   :  { %v591_v49 = vmul.f32 %v590_v2, %v3384_v38  ;;  %v1131_v42 = vsub.f32 1.0, %v1123_v59  ;;  %v1195_v23 = vmul.f32 %v1129_v33, %v3253_v25  ;;  %v1203_v17 = vsel %vm229_vm0, %v1193_v51, 0.0 }
 0x1ce   :  { %v1183_v15 = vadd.f32 %v1182_v24, %v1181_v61  ;;  %v1202_v52 = vadd.f32 %v1201_v20, %v1200_v16  ;;  %v1155_v12 = vrot.slane %v1154_v18, 4  ;;  %v1006_v5 = vrot.slane %v3398_v62, 1 }
 0x1cf   :  { %v592_v41 = vmul.f32 1.1111112, %v591_v49  ;;  %v801_v29 = vsub.f32 0.0, %v3396_v45  ;;  %v1205_v50 = vsel %vm229_vm0, %v1194_v1, 0.0  ;;  %v1196_v63 = vmul.f32 %v1130_v48, %v3040_v28 }
 0x1d0   :  { %v1184_v9 = vrot.slane %v1183_v15, 4  ;;  %v1204_v43 = vadd.f32 %v1203_v17, %v1202_v52  ;;  %v1156_v2 = vadd.f32 %v1155_v12, %v1154_v18  ;;  %v1207_v33 = vsel %vm229_vm0, %v1195_v23, 0.0 }
 0x1d1   :  { %v593_v59 = vadd.f32 %v592_v41, %v3384_v38  ;;  %v1007_v56 = vadd.f32 %v1006_v5, %v3398_v62  ;;  %v1197_v51 = vmul.f32 %v1131_v42, %v3284_v22  ;;  %v1209_v1 = vsel %vm229_vm0, %v1196_v63, 0.0 }
 0x1d2   :  { %v1185_v13 = vadd.f32 %v1184_v9, %v1183_v15  ;;  %v1206_v55 = vadd.f32 %v1205_v50, %v1204_v43  ;;  %v1157_v32 = vrot.slane %v1156_v2, 2  ;;  %v4078_v50 = vld [vmem:[#allocation47_spill] sm:$0xff] }
 0x1d3   :  { %597 = vst.msk [vmem:[#allocation2 + $0x4] sm:$0x4] %vm385_vm3, %v593_v59  ;;  %v802_v10 = vmul.f32 %v801_v29, %v593_v59  ;;  %v1012_v20 = vsub.f32 0.0, %v1007_v56  ;;  %v1211_v49 = vsel %vm229_vm0, %v1197_v51, 0.0  ;;  %v4082_v56 = vld [vmem:[#allocation12_spill] sm:$0xff] }
 0x1d4   :  { %v1186_v45 = vrot.slane %v1185_v13, 2  ;;  %v1208_v4 = vadd.f32 %v1207_v33, %v1206_v55  ;;  %v1158_v48 = vadd.f32 %v1157_v32, %v1156_v2  ;;  %v4080_v55 = vld [vmem:[#allocation21_spill] sm:$0xff]  ;;  %v4081_v32 = vld [vmem:[#allocation10_spill] sm:$0xff] }
 0x1d5   :  { %v803_v61 = vmul.f32 1.1111112, %v802_v10 }
 0x1d6   :  { %v1187_v16 = vadd.f32 %v1186_v45, %v1185_v13  ;;  %v1210_v38 = vadd.f32 %v1209_v1, %v1208_v4  ;;  %v1159_v18 = vrot.slane %v1158_v48, 1  ;;  %v4083_v45 = vld [vmem:[#allocation13_spill] sm:$0xff]  ;;  %v4084_v1 = vld [vmem:[#allocation14_spill] sm:$0xff] }
 0x1d7   :  { %v804_v24 = vadd.f32 %v803_v61, %v593_v59  ;;  %v4079_v59 = vld [vmem:[#allocation20_spill] sm:$0xff]  ;;  %v4085_v61 = vld [vmem:[#allocation5_spill] sm:$0xff] }
 0x1d8   :  { %v1188_v15 = vrot.slane %v1187_v16, 1  ;;  %v1212_v52 = vadd.f32 %v1211_v49, %v1210_v38  ;;  %v1160_v23 = vadd.f32 %v1159_v18, %v1158_v48  ;;  %v4086_v38 = vld [vmem:[#allocation7_spill] sm:$0xff] }
 0x1d9   :  { %808 = vst.msk [vmem:[#allocation2 + $0x8] sm:$0x4] %vm385_vm3, %v804_v24  ;;  %v1013_v62 = vmul.f32 %v1012_v20, %v804_v24  ;;  %v4088_v49 = vld [vmem:[#allocation15_spill] sm:$0xff] }
 0x1da   :  { %v1189_v42 = vadd.f32 %v1188_v15, %v1187_v16  ;;  %v1213_v12 = vrot.slane %v1212_v52, 4  ;;  %v1219_v17 = vmul.f32 1.1111112, %v1160_v23 }
 0x1db   :  { %v1014_v41 = vmul.f32 1.1111112, %v1013_v62  ;;  %v4090_v62 = vld [vmem:[#allocation6_spill] sm:$0xff] }
 0x1dc   :  { %v1221_v5 = vmul.f32 1.1111112, %v1189_v42  ;;  %v1214_v9 = vadd.f32 %v1213_v12, %v1212_v52  ;;  %v3445_v43 = vadd.f32 %v1219_v17, %v3316_v7  ;;  %v4089_v52 = vld [vmem:[#allocation11_spill] sm:$0xff]  ;;  %v4091_v17 = vld [vmem:[#allocation16_spill] sm:$0xff] }
 0x1dd   :  { %v1015_v29 = vadd.f32 %v1014_v41, %v804_v24  ;;  %v4087_v24 = vld [vmem:[#allocation9_spill] sm:$0xff] }
 0x1de   :  { %v3448_v63 = vadd.f32 %v1221_v5, %v4078_v50  ;;  %v1215_v2 = vrot.slane %v1214_v9, 2  ;;  %1228 = vst.msk [vmem:[#allocation2 + $0x10] sm:$0x1] %vm381_vm2, %v3445_v43  ;;  %v1242_v13 = vrot.slane %v3445_v43, %v4079_v59 }
 0x1df   :  { %1019 = vst.msk [vmem:[#allocation2 + $0xc] sm:$0x4] %vm385_vm3, %v1015_v29 }
 0x1e0   :  { %1229 = vst.msk [vmem:[#allocation2 + $0x10] sm:$0x2] %vm383_vm1, %v3448_v63  ;;  %v1254_v7 = vrot.slane %v3448_v63, %v4080_v55  ;;  %v1216_v33 = vadd.f32 %v1215_v2, %v1214_v9  ;;  %v1243_v10 = vmul.f32 %v1242_v13, %v4081_v32  ;;  %v1244_v51 = vmul.f32 %v1242_v13, %v4082_v56 }
 0x1e1   :  { %v1245_v4 = vmul.f32 %v1242_v13, %v4083_v45  ;;  %v1246_v48 = vmul.f32 %v1242_v13, %v4084_v1  ;;  %v1247_v15 = vmul.f32 %v1242_v13, %v4088_v49  ;;  %v1248_v12 = vmul.f32 %v1242_v13, %v4066_v31  ;;  %v4092_v49 = vld [vmem:[#allocation48_spill] sm:$0xff] }
 0x1e2   :  { %v1255_v16 = vmul.f32 %v1254_v7, %v4085_v61  ;;  %v1256_v18 = vmul.f32 %v1254_v7, %v4086_v38  ;;  %v1257_v20 = vmul.f32 %v1254_v7, %v4087_v24  ;;  %v1258_v23 = vmul.f32 %v1254_v7, %v4089_v52  ;;  %v4093_v52 = vld [vmem:[#allocation62_spill] sm:$0xff] }
 0x1e3   :  { %v1259_v42 = vmul.f32 %v1254_v7, %v4090_v62  ;;  %v1249_v41 = vmul.f32 %v1242_v13, %v4091_v17  ;;  %v1250_v2 = vmul.f32 %v1242_v13, %v2493_v34  ;;  %v1260_v38 = vmul.f32 %v1254_v7, %v4014_v37  ;;  %v4094_v62 = vld [vmem:[#allocation36_spill] sm:$0xff]  ;;  %v4095_v17 = vld [vmem:[#allocation50_spill] sm:$0xff]  ;;  %v4096_v13 = vld [vmem:[#allocation63_spill] sm:$0xff] }
 0x1e4   :  { %v1263_v5 = vadd.f32 %v1255_v16, %v1243_v10  ;;  %v1264_v9 = vadd.f32 %v1256_v18, %v1244_v51  ;;  %v1265_v50 = vadd.f32 %v1257_v20, %v1245_v4  ;;  %v1266_v61 = vadd.f32 %v1258_v23, %v1246_v48  ;;  %v4097_v20 = vld [vmem:[#allocation53_spill] sm:$0xff] }
 0x1e5   :  { %v1267_v1 = vadd.f32 %v1259_v42, %v1247_v15  ;;  %v1261_v24 = vmul.f32 %v1254_v7, %v2505_v39  ;;  %v1262_v31 = vmul.f32 %v1254_v7, %v2516_v44  ;;  %v1268_v51 = vadd.f32 %v1260_v38, %v1248_v12 }
 0x1e6   :  { %v1311_v45 = vadd.f32 %v4092_v49, %v1263_v5  ;;  %v1312_v55 = vadd.f32 %v4093_v52, %v1264_v9  ;;  %v1313_v56 = vadd.f32 %v4094_v62, %v1265_v50  ;;  %v1314_v10 = vadd.f32 %v4095_v17, %v1266_v61  ;;  %v4098_v52 = vld [vmem:[#allocation65_spill] sm:$0xff]  ;;  %v4099_v62 = vld [vmem:[#allocation55_spill] sm:$0xff] }
 0x1e7   :  { %v1269_v4 = vadd.f32 %v1261_v24, %v1249_v41  ;;  %v1315_v48 = vadd.f32 %v4096_v13, %v1267_v1  ;;  %v1270_v16 = vadd.f32 %v1262_v31, %v1250_v2  ;;  %v1217_v18 = vrot.slane %v1216_v33, 1 }
 0x1e8   :  { %2229 = vtanh.f32 %v1311_v45  ;;  %v1316_v15 = vadd.f32 %v4097_v20, %v1268_v51 }
 0x1e9   :  { %2231 = vtanh.f32 %v1312_v55  ;;  %v1218_v49 = vadd.f32 %v1217_v18, %v1216_v33  ;;  %v1317_v23 = vadd.f32 %v4098_v52, %v1269_v4  ;;  %v1318_v7 = vadd.f32 %v4099_v62, %v1270_v16 }
 0x1ea   :  { %2233 = vtanh.f32 %v1313_v56 }
 0x1eb   :  { %2235 = vtanh.f32 %v1314_v10  ;;  %v1223_v42 = vsub.f32 0.0, %v1218_v49 }
 0x1ec   :  { %2237 = vtanh.f32 %v1315_v48 }
 0x1ed   :  { %2239 = vtanh.f32 %v1316_v15  ;;  %v1224_v61 = vmul.f32 %v1223_v42, %v1015_v29 }
 0x1ee   :  { %2241 = vtanh.f32 %v1317_v23 }
 0x1ef   :  { %2243 = vtanh.f32 %v1318_v7  ;;  %v1225_v45 = vmul.f32 1.1111112, %v1224_v61 }
 0x1f1   :  { %v3483_v31 = vadd.f32 %v1225_v45, %v1015_v29 }
 0x1f2   :  { %v2230_v1 = vpop.eup %2229 }
 0x1f3   :  { %v2232_v55 = vpop.eup %2231  ;;  %v1343_v56 = vmul.f32 %v2230_v1, %v2520_v47  ;;  %v1372_v33 = vmul.f32 %v2230_v1, %v2555_v11  ;;  %1230 = vst.msk [vmem:[#allocation2 + $0x10] sm:$0x4] %vm385_vm3, %v3483_v31 }
 0x1f4   :  { %v2234_v38 = vpop.eup %2233  ;;  %v1328_v24 = vmul.f32 %v2232_v55, %v2232_v55  ;;  %v1344_v12 = vmul.f32 %v2232_v55, %v2544_v57  ;;  %v1373_v17 = vmul.f32 %v2232_v55, %v2507_v40 }
 0x1f5   :  { %v2236_v41 = vpop.eup %2235  ;;  %v1351_v5 = vsel %vm229_vm0, %v1343_v56, 0.0  ;;  %v1380_v29 = vsel %vm229_vm0, %v1372_v33, 0.0  ;;  %v1345_v9 = vmul.f32 %v2234_v38, %v2565_v58  ;;  %v1374_v51 = vmul.f32 %v2234_v38, %v2574_v6 }
 0x1f6   :  { %v2238_v50 = vpop.eup %2237  ;;  %v1352_v2 = vsel %vm229_vm0, %v1344_v12, 0.0  ;;  %v1381_v10 = vsel %vm229_vm0, %v1373_v17, 0.0  ;;  %v1329_v48 = vmul.f32 %v2234_v38, %v2234_v38  ;;  %v1336_v18 = vsub.f32 1.0, %v1328_v24 }
 0x1f7   :  { %v1353_v4 = vadd.f32 %v1352_v2, %v1351_v5  ;;  %v1382_v13 = vadd.f32 %v1381_v10, %v1380_v29  ;;  %v2240_v16 = vpop.eup %2239  ;;  %v1354_v20 = vsel %vm229_vm0, %v1345_v9, 0.0  ;;  %v1383_v15 = vsel %vm229_vm0, %v1374_v51, 0.0 }
 0x1f8   :  { %v1346_v49 = vmul.f32 %v2236_v41, %v2537_v54  ;;  %v2242_v52 = vpop.eup %2241  ;;  %v1347_v7 = vmul.f32 %v2238_v50, %v2601_v36  ;;  %v1375_v42 = vmul.f32 %v2236_v41, %v4030_v19  ;;  %v1376_v55 = vmul.f32 %v2238_v50, %v4031_v21 }
 0x1f9   :  { %v1355_v23 = vadd.f32 %v1354_v20, %v1353_v4  ;;  %v1384_v62 = vadd.f32 %v1383_v15, %v1382_v13  ;;  %v2244_v61 = vpop.eup %2243  ;;  %v1327_v56 = vmul.f32 %v2230_v1, %v2230_v1  ;;  %v1331_v33 = vmul.f32 %v2238_v50, %v2238_v50 }
 0x1fa   :  { %v1356_v45 = vsel %vm229_vm0, %v1346_v49, 0.0  ;;  %v1385_v24 = vsel %vm229_vm0, %v1375_v42, 0.0  ;;  %v1348_v12 = vmul.f32 %v2240_v16, %v4032_v8  ;;  %v1402_v17 = vmul.f32 %v1336_v18, %v2968_v3 }
 0x1fb   :  { %v1357_v38 = vadd.f32 %v1356_v45, %v1355_v23  ;;  %v1337_v5 = vsub.f32 1.0, %v1329_v48  ;;  %v1358_v29 = vsel %vm229_vm0, %v1347_v7, 0.0  ;;  %v1386_v9 = vadd.f32 %v1385_v24, %v1384_v62 }
 0x1fc   :  { %v1387_v10 = vsel %vm229_vm0, %v1376_v55, 0.0  ;;  %v1349_v51 = vmul.f32 %v2242_v52, %v4033_v14  ;;  %v1350_v4 = vmul.f32 %v2244_v61, %v4075_v46  ;;  %v1360_v50 = vsel %vm229_vm0, %v1348_v12, 0.0 }
 0x1fd   :  { %v1359_v2 = vadd.f32 %v1358_v29, %v1357_v38  ;;  %v1388_v1 = vadd.f32 %v1387_v10, %v1386_v9  ;;  %v1377_v13 = vmul.f32 %v2240_v16, %v4035_v27  ;;  %v1378_v20 = vmul.f32 %v2242_v52, %v4076_v60 }
 0x1fe   :  { %v1339_v15 = vsub.f32 1.0, %v1331_v33  ;;  %v1333_v18 = vmul.f32 %v2242_v52, %v2242_v52  ;;  %v1362_v49 = vsel %vm229_vm0, %v1349_v51, 0.0  ;;  %v1379_v23 = vmul.f32 %v2244_v61, %v4077_v26 }
 0x1ff   :  { %v1361_v48 = vadd.f32 %v1360_v50, %v1359_v2  ;;  %v1389_v62 = vsel %vm229_vm0, %v1377_v13, 0.0  ;;  %v1335_v7 = vsub.f32 1.0, %v1327_v56  ;;  %v1364_v45 = vsel %vm229_vm0, %v1350_v4, 0.0 }
 0x200   :  { %v1390_v55 = vadd.f32 %v1389_v62, %v1388_v1  ;;  %v1391_v38 = vsel %vm229_vm0, %v1378_v20, 0.0  ;;  %v1410_v12 = vsel %vm229_vm0, %v1402_v17, 0.0  ;;  %v1403_v52 = vmul.f32 %v1337_v5, %v3144_v30 }
 0x201   :  { %v1363_v42 = vadd.f32 %v1362_v49, %v1361_v48  ;;  %v1401_v24 = vmul.f32 %v1335_v7, %v3126_v0  ;;  %v1330_v33 = vmul.f32 %v2236_v41, %v2236_v41  ;;  %v1332_v2 = vmul.f32 %v2240_v16, %v2240_v16 }
 0x202   :  { %v1392_v9 = vadd.f32 %v1391_v38, %v1390_v55  ;;  %v1393_v10 = vsel %vm229_vm0, %v1379_v23, 0.0  ;;  %v1334_v50 = vmul.f32 %v2244_v61, %v2244_v61  ;;  %v1405_v48 = vmul.f32 %v1339_v15, %v3006_v53 }
 0x203   :  { %v1365_v29 = vadd.f32 %v1364_v45, %v1363_v42  ;;  %v1409_v56 = vsel %vm229_vm0, %v1401_v24, 0.0  ;;  %v1338_v51 = vsub.f32 1.0, %v1330_v33  ;;  %v1340_v20 = vsub.f32 1.0, %v1332_v2 }
 0x204   :  { %v1394_v1 = vadd.f32 %v1393_v10, %v1392_v9  ;;  %v1411_v13 = vadd.f32 %v1410_v12, %v1409_v56  ;;  %v1341_v49 = vsub.f32 1.0, %v1333_v18  ;;  %v1412_v17 = vsel %vm229_vm0, %v1403_v52, 0.0 }
 0x205   :  { %v1366_v4 = vrot.slane %v1365_v29, 4  ;;  %v1404_v41 = vmul.f32 %v1338_v51, %v3169_v35  ;;  %v1406_v7 = vmul.f32 %v1340_v20, %v3253_v25  ;;  %v1342_v42 = vsub.f32 1.0, %v1334_v50 }
 0x206   :  { %v1395_v62 = vrot.slane %v1394_v1, 4  ;;  %v1413_v16 = vadd.f32 %v1412_v17, %v1411_v13  ;;  %v1416_v38 = vsel %vm229_vm0, %v1405_v48, 0.0  ;;  %v1407_v15 = vmul.f32 %v1341_v49, %v3040_v28 }
 0x207   :  { %v1367_v5 = vadd.f32 %v1366_v4, %v1365_v29  ;;  %v1414_v23 = vsel %vm229_vm0, %v1404_v41, 0.0  ;;  %v1418_v52 = vsel %vm229_vm0, %v1406_v7, 0.0  ;;  %v1408_v33 = vmul.f32 %v1342_v42, %v3284_v22  ;;  %v4101_v7 = vld [vmem:[#allocation21_spill] sm:$0xff] }
 0x208   :  { %v1396_v45 = vadd.f32 %v1395_v62, %v1394_v1  ;;  %v1415_v55 = vadd.f32 %v1414_v23, %v1413_v16  ;;  %v1420_v10 = vsel %vm229_vm0, %v1407_v15, 0.0  ;;  %v4100_v23 = vld [vmem:[#allocation12_spill] sm:$0xff] }
 0x209   :  { %v1368_v61 = vrot.slane %v1367_v5, 2  ;;  %v1422_v4 = vsel %vm229_vm0, %v1408_v33, 0.0  ;;  %v4107_v33 = vld [vmem:[#allocation5_spill] sm:$0xff] }
 0x20a   :  { %v1397_v24 = vrot.slane %v1396_v45, 2  ;;  %v1417_v12 = vadd.f32 %v1416_v38, %v1415_v55  ;;  %v4104_v38 = vld [vmem:[#allocation15_spill] sm:$0xff] }
 0x20b   :  { %v1369_v18 = vadd.f32 %v1368_v61, %v1367_v5  ;;  %v4102_v61 = vld [vmem:[#allocation13_spill] sm:$0xff] }
 0x20c   :  { %v1398_v9 = vadd.f32 %v1397_v24, %v1396_v45  ;;  %v1419_v2 = vadd.f32 %v1418_v52, %v1417_v12  ;;  %v4103_v45 = vld [vmem:[#allocation14_spill] sm:$0xff]  ;;  %v4106_v12 = vld [vmem:[#allocation16_spill] sm:$0xff] }
 0x20d   :  { %v1370_v29 = vrot.slane %v1369_v18, 1 }
 0x20e   :  { %v1399_v51 = vrot.slane %v1398_v9, 1  ;;  %v1421_v50 = vadd.f32 %v1420_v10, %v1419_v2  ;;  %v4109_v10 = vld [vmem:[#allocation9_spill] sm:$0xff] }
 0x20f   :  { %v1371_v56 = vadd.f32 %v1370_v29, %v1369_v18  ;;  %v4105_v18 = vld [vmem:[#allocation17_spill] sm:$0xff] }
 0x210   :  { %v1400_v1 = vadd.f32 %v1399_v51, %v1398_v9  ;;  %v1423_v20 = vadd.f32 %v1422_v4, %v1421_v50  ;;  %v4108_v9 = vld [vmem:[#allocation7_spill] sm:$0xff]  ;;  %v4111_v4 = vld [vmem:[#allocation6_spill] sm:$0xff] }
 0x211   :  { %v1430_v13 = vmul.f32 1.1111112, %v1371_v56  ;;  %v4110_v51 = vld [vmem:[#allocation11_spill] sm:$0xff] }
 0x212   :  { %v1432_v49 = vmul.f32 1.1111112, %v1400_v1  ;;  %v1424_v17 = vrot.slane %v1423_v20, 4 }
 0x213   :  { %v3536_v48 = vadd.f32 %v1430_v13, %v3445_v43 }
 0x214   :  { %v3539_v41 = vadd.f32 %v1432_v49, %v3448_v63  ;;  %v1425_v62 = vadd.f32 %v1424_v17, %v1423_v20 }
 0x215   :  { %1439 = vst.msk [vmem:[#allocation2 + $0x14] sm:$0x1] %vm381_vm2, %v3536_v48  ;;  %v1453_v5 = vrot.slane %v3536_v48, %v4079_v59 }
 0x216   :  { %1440 = vst.msk [vmem:[#allocation2 + $0x14] sm:$0x2] %vm383_vm1, %v3539_v41  ;;  %v1465_v42 = vrot.slane %v3539_v41, %v4101_v7  ;;  %v4115_v7 = vld [vmem:[#allocation70_spill] sm:$0xff] }
 0x217   :  { %v1454_v16 = vmul.f32 %v1453_v5, %v4081_v32  ;;  %v1455_v43 = vmul.f32 %v1453_v5, %v4100_v23  ;;  %v1456_v63 = vmul.f32 %v1453_v5, %v4102_v61  ;;  %v1457_v55 = vmul.f32 %v1453_v5, %v4103_v45  ;;  %v4112_v61 = vld [vmem:[#allocation66_spill] sm:$0xff]  ;;  %v4114_v32 = vld [vmem:[#allocation68_spill] sm:$0xff] }
 0x218   :  { %v1458_v15 = vmul.f32 %v1453_v5, %v4104_v38  ;;  %v1459_v24 = vmul.f32 %v1453_v5, %v4105_v18  ;;  %v1460_v52 = vmul.f32 %v1453_v5, %v4106_v12  ;;  %v1466_v29 = vmul.f32 %v1465_v42, %v4107_v33  ;;  %v4113_v23 = vld [vmem:[#allocation58_spill] sm:$0xff] }
 0x219   :  { %v1467_v2 = vmul.f32 %v1465_v42, %v4108_v9  ;;  %v1468_v56 = vmul.f32 %v1465_v42, %v4109_v10  ;;  %v1469_v50 = vmul.f32 %v1465_v42, %v4110_v51  ;;  %v1470_v1 = vmul.f32 %v1465_v42, %v4111_v4 }
 0x21a   :  { %v1471_v13 = vmul.f32 %v1465_v42, %v4014_v37  ;;  %v1461_v20 = vmul.f32 %v1453_v5, %v2493_v34  ;;  %v1472_v49 = vmul.f32 %v1465_v42, %v2505_v39  ;;  %v1474_v17 = vadd.f32 %v1466_v29, %v1454_v16  ;;  %v4116_v5 = vld [vmem:[#allocation60_spill] sm:$0xff] }
 0x21b   :  { %v1475_v18 = vadd.f32 %v1467_v2, %v1455_v43  ;;  %v1476_v38 = vadd.f32 %v1468_v56, %v1456_v63  ;;  %v1477_v12 = vadd.f32 %v1469_v50, %v1457_v55  ;;  %v1478_v45 = vadd.f32 %v1470_v1, %v1458_v15  ;;  %v4117_v63 = vld [vmem:[#allocation26_spill] sm:$0xff] }
 0x21c   :  { %v1479_v33 = vadd.f32 %v1471_v13, %v1459_v24  ;;  %v1473_v9 = vmul.f32 %v1465_v42, %v2516_v44  ;;  %v1522_v10 = vadd.f32 %v4112_v61, %v1474_v17  ;;  %v1480_v59 = vadd.f32 %v1472_v49, %v1460_v52  ;;  %v4118_v42 = vld [vmem:[#allocation31_spill] sm:$0xff] }
 0x21d   :  { %v1523_v51 = vadd.f32 %v4113_v23, %v1475_v18  ;;  %v1524_v4 = vadd.f32 %v4114_v32, %v1476_v38  ;;  %v1525_v37 = vadd.f32 %v4115_v7, %v1477_v12  ;;  %v1526_v39 = vadd.f32 %v4116_v5, %v1478_v45  ;;  %v4119_v23 = vld [vmem:[#allocation27_spill] sm:$0xff] }
 0x21e   :  { %2245 = vtanh.f32 %v1522_v10  ;;  %v1481_v16 = vadd.f32 %v1473_v9, %v1461_v20  ;;  %v1426_v43 = vrot.slane %v1425_v62, 2  ;;  %v1527_v55 = vadd.f32 %v4117_v63, %v1479_v33 }
 0x21f   :  { %2247 = vtanh.f32 %v1523_v51  ;;  %v1528_v61 = vadd.f32 %v4118_v42, %v1480_v59 }
 0x220   :  { %2249 = vtanh.f32 %v1524_v4  ;;  %v1427_v15 = vadd.f32 %v1426_v43, %v1425_v62  ;;  %v1529_v18 = vadd.f32 %v4119_v23, %v1481_v16 }
 0x221   :  { %2251 = vtanh.f32 %v1525_v37 }
 0x222   :  { %2253 = vtanh.f32 %v1526_v39  ;;  %v1428_v32 = vrot.slane %v1427_v15, 1 }
 0x223   :  { %2255 = vtanh.f32 %v1527_v55 }
 0x224   :  { %v1429_v7 = vadd.f32 %v1428_v32, %v1427_v15  ;;  %2257 = vtanh.f32 %v1528_v61 }
 0x225   :  { %2259 = vtanh.f32 %v1529_v18 }
 0x226   :  { %v1434_v38 = vsub.f32 0.0, %v1429_v7 }
 0x228   :  { %v2246_v45 = vpop.eup %2245  ;;  %v1435_v2 = vmul.f32 %v1434_v38, %v3483_v31 }
 0x229   :  { %v2248_v24 = vpop.eup %2247  ;;  %v1554_v12 = vmul.f32 %v2246_v45, %v2520_v47  ;;  %v1583_v52 = vmul.f32 %v2246_v45, %v2555_v11  ;;  %v1538_v62 = vmul.f32 %v2246_v45, %v2246_v45 }
 0x22a   :  { %v2250_v33 = vpop.eup %2249  ;;  %v1555_v37 = vmul.f32 %v2248_v24, %v2544_v57  ;;  %v1584_v59 = vmul.f32 %v2248_v24, %v2507_v40  ;;  %v1539_v17 = vmul.f32 %v2248_v24, %v2248_v24  ;;  %v1436_v23 = vmul.f32 1.1111112, %v1435_v2 }
 0x22b   :  { %v2252_v39 = vpop.eup %2251  ;;  %v1562_v29 = vsel %vm229_vm0, %v1554_v12, 0.0  ;;  %v1591_v9 = vsel %vm229_vm0, %v1583_v52, 0.0  ;;  %v1556_v50 = vmul.f32 %v2250_v33, %v2565_v58  ;;  %v1585_v4 = vmul.f32 %v2250_v33, %v2574_v6 }
 0x22c   :  { %v2254_v10 = vpop.eup %2253  ;;  %v1563_v56 = vsel %vm229_vm0, %v1555_v37, 0.0  ;;  %v1592_v51 = vsel %vm229_vm0, %v1584_v59, 0.0  ;;  %v1540_v49 = vmul.f32 %v2250_v33, %v2250_v33  ;;  %v1557_v43 = vmul.f32 %v2252_v39, %v2537_v54 }
 0x22d   :  { %v2256_v1 = vpop.eup %2255  ;;  %v1564_v13 = vadd.f32 %v1563_v56, %v1562_v29  ;;  %v1593_v20 = vadd.f32 %v1592_v51, %v1591_v9  ;;  %v1565_v5 = vsel %vm229_vm0, %v1556_v50, 0.0  ;;  %v1594_v16 = vsel %vm229_vm0, %v1585_v4, 0.0 }
 0x22e   :  { %v1586_v63 = vmul.f32 %v2252_v39, %v4030_v19  ;;  %v2258_v55 = vpop.eup %2257  ;;  %v1541_v61 = vmul.f32 %v2252_v39, %v2252_v39  ;;  %v1567_v32 = vsel %vm229_vm0, %v1557_v43, 0.0  ;;  %v1558_v38 = vmul.f32 %v2254_v10, %v2601_v36 }
 0x22f   :  { %v1566_v15 = vadd.f32 %v1565_v5, %v1564_v13  ;;  %v1595_v42 = vadd.f32 %v1594_v16, %v1593_v20  ;;  %v2260_v18 = vpop.eup %2259  ;;  %v1559_v45 = vmul.f32 %v2256_v1, %v4032_v8  ;;  %v1543_v52 = vmul.f32 %v2256_v1, %v2256_v1 }
 0x230   :  { %v1596_v7 = vsel %vm229_vm0, %v1586_v63, 0.0  ;;  %v1587_v33 = vmul.f32 %v2254_v10, %v4031_v21  ;;  %v1546_v37 = vsub.f32 1.0, %v1538_v62  ;;  %v1548_v59 = vsub.f32 1.0, %v1540_v49 }
 0x231   :  { %v1568_v24 = vadd.f32 %v1567_v32, %v1566_v15  ;;  %v1597_v12 = vadd.f32 %v1596_v7, %v1595_v42  ;;  %v1569_v29 = vsel %vm229_vm0, %v1558_v38, 0.0  ;;  %v1588_v39 = vmul.f32 %v2256_v1, %v4035_v27 }
 0x232   :  { %v1598_v2 = vsel %vm229_vm0, %v1587_v33, 0.0  ;;  %v1560_v56 = vmul.f32 %v2258_v55, %v4033_v14  ;;  %v1561_v51 = vmul.f32 %v2260_v18, %v4075_v46  ;;  %v1549_v50 = vsub.f32 1.0, %v1541_v61 }
 0x233   :  { %v1570_v9 = vadd.f32 %v1569_v29, %v1568_v24  ;;  %v1571_v4 = vsel %vm229_vm0, %v1559_v45, 0.0  ;;  %v1599_v13 = vadd.f32 %v1598_v2, %v1597_v12  ;;  %v1589_v20 = vmul.f32 %v2258_v55, %v4076_v60 }
 0x234   :  { %v1551_v5 = vsub.f32 1.0, %v1543_v52  ;;  %v1600_v49 = vsel %vm229_vm0, %v1588_v39, 0.0  ;;  %v1590_v16 = vmul.f32 %v2260_v18, %v4077_v26  ;;  %v1573_v43 = vsel %vm229_vm0, %v1560_v56, 0.0 }
 0x235   :  { %v1572_v62 = vadd.f32 %v1571_v4, %v1570_v9  ;;  %v1601_v1 = vadd.f32 %v1600_v49, %v1599_v13  ;;  %v1547_v63 = vsub.f32 1.0, %v1539_v17  ;;  %v1612_v15 = vmul.f32 %v1546_v37, %v3126_v0 }
 0x236   :  { %v1575_v61 = vsel %vm229_vm0, %v1561_v51, 0.0  ;;  %v1602_v32 = vsel %vm229_vm0, %v1589_v20, 0.0  ;;  %v1614_v7 = vmul.f32 %v1548_v59, %v3144_v30  ;;  %v1542_v12 = vmul.f32 %v2254_v10, %v2254_v10 }
 0x237   :  { %v1574_v42 = vadd.f32 %v1573_v43, %v1572_v62  ;;  %v1603_v38 = vadd.f32 %v1602_v32, %v1601_v1  ;;  %v1613_v45 = vmul.f32 %v1547_v63, %v2968_v3  ;;  %v1620_v24 = vsel %vm229_vm0, %v1612_v15, 0.0 }
 0x238   :  { %v1545_v52 = vmul.f32 %v2260_v18, %v2260_v18  ;;  %v1604_v29 = vsel %vm229_vm0, %v1590_v16, 0.0  ;;  %v1615_v17 = vmul.f32 %v1549_v50, %v3169_v35  ;;  %v1550_v9 = vsub.f32 1.0, %v1542_v12 }
 0x239   :  { %v1576_v33 = vadd.f32 %v1575_v61, %v1574_v42  ;;  %v1605_v37 = vadd.f32 %v1604_v29, %v1603_v38  ;;  %v1621_v39 = vsel %vm229_vm0, %v1613_v45, 0.0  ;;  %v3613_v2 = vadd.f32 %v1436_v23, %v3483_v31 }
 0x23a   :  { %v1622_v56 = vadd.f32 %v1621_v39, %v1620_v24  ;;  %v1544_v51 = vmul.f32 %v2258_v55, %v2258_v55  ;;  %v1623_v13 = vsel %vm229_vm0, %v1614_v7, 0.0  ;;  %v1616_v10 = vmul.f32 %v1550_v9, %v3006_v53 }
 0x23b   :  { %v1577_v59 = vrot.slane %v1576_v33, 4  ;;  %v1606_v4 = vrot.slane %v1605_v37, 4  ;;  %1441 = vst.msk [vmem:[#allocation2 + $0x14] sm:$0x4] %vm385_vm3, %v3613_v2  ;;  %v1553_v62 = vsub.f32 1.0, %v1545_v52  ;;  %v1625_v16 = vsel %vm229_vm0, %v1615_v17, 0.0 }
 0x23c   :  { %v1624_v50 = vadd.f32 %v1623_v13, %v1622_v56  ;;  %v1552_v20 = vsub.f32 1.0, %v1544_v51  ;;  %v1617_v31 = vmul.f32 %v1551_v5, %v3253_v25  ;;  %v1627_v43 = vsel %vm229_vm0, %v1616_v10, 0.0  ;;  %v4120_v51 = vld [vmem:[#allocation20_spill] sm:$0xff]  ;;  %v4121_v13 = vld [vmem:[#allocation21_spill] sm:$0xff] }
 0x23d   :  { %v1578_v18 = vadd.f32 %v1577_v59, %v1576_v33  ;;  %v1607_v49 = vadd.f32 %v1606_v4, %v1605_v37  ;;  %v1619_v7 = vmul.f32 %v1553_v62, %v3284_v22 }
 0x23e   :  { %v1626_v1 = vadd.f32 %v1625_v16, %v1624_v50  ;;  %v1618_v63 = vmul.f32 %v1552_v20, %v3040_v28  ;;  %v1629_v32 = vsel %vm229_vm0, %v1617_v31, 0.0  ;;  %v4122_v50 = vld [vmem:[#allocation10_spill] sm:$0xff]  ;;  %v4123_v20 = vld [vmem:[#allocation12_spill] sm:$0xff] }
 0x23f   :  { %v1579_v23 = vrot.slane %v1578_v18, 2  ;;  %v1608_v55 = vrot.slane %v1607_v49, 2  ;;  %v1633_v29 = vsel %vm229_vm0, %v1619_v7, 0.0  ;;  %v4125_v16 = vld [vmem:[#allocation14_spill] sm:$0xff] }
 0x240   :  { %v1628_v42 = vadd.f32 %v1627_v43, %v1626_v1  ;;  %v1631_v12 = vsel %vm229_vm0, %v1618_v63, 0.0  ;;  %v4128_v63 = vld [vmem:[#allocation9_spill] sm:$0xff] }
 0x241   :  { %v1580_v15 = vadd.f32 %v1579_v23, %v1578_v18  ;;  %v1609_v61 = vadd.f32 %v1608_v55, %v1607_v49  ;;  %v4124_v49 = vld [vmem:[#allocation13_spill] sm:$0xff]  ;;  %v4127_v55 = vld [vmem:[#allocation7_spill] sm:$0xff] }
 0x242   :  { %v1630_v45 = vadd.f32 %v1629_v32, %v1628_v42  ;;  %v4126_v23 = vld [vmem:[#allocation5_spill] sm:$0xff]  ;;  %v4129_v42 = vld [vmem:[#allocation15_spill] sm:$0xff] }
 0x243   :  { %v1581_v38 = vrot.slane %v1580_v15, 1  ;;  %v1610_v24 = vrot.slane %v1609_v61, 1  ;;  %v4130_v32 = vld [vmem:[#allocation11_spill] sm:$0xff] }
 0x244   :  { %v1632_v52 = vadd.f32 %v1631_v12, %v1630_v45 }
 0x245   :  { %v1582_v5 = vadd.f32 %v1581_v38, %v1580_v15  ;;  %v1611_v33 = vadd.f32 %v1610_v24, %v1609_v61  ;;  %v4131_v38 = vld [vmem:[#allocation6_spill] sm:$0xff]  ;;  %v4132_v24 = vld [vmem:[#allocation17_spill] sm:$0xff] }
 0x246   :  { %v1634_v37 = vadd.f32 %v1633_v29, %v1632_v52 }
 0x247   :  { %v1641_v17 = vmul.f32 1.1111112, %v1582_v5  ;;  %v1643_v39 = vmul.f32 1.1111112, %v1611_v33  ;;  %v4133_v5 = vld [vmem:[#allocation16_spill] sm:$0xff] }
 0x248   :  { %v1635_v59 = vrot.slane %v1634_v37, 4 }
 0x249   :  { %v3628_v9 = vadd.f32 %v1641_v17, %v3536_v48  ;;  %v3631_v56 = vadd.f32 %v1643_v39, %v3539_v41 }
 0x24a   :  { %v1636_v18 = vadd.f32 %v1635_v59, %v1634_v37 }
 0x24b   :  { %1650 = vst.msk [vmem:[#allocation2 + $0x18] sm:$0x1] %vm381_vm2, %v3628_v9  ;;  %v1664_v4 = vrot.slane %v3628_v9, %v4120_v51  ;;  %v1676_v10 = vrot.slane %v3631_v56, %v4121_v13 }
 0x24c   :  { %1651 = vst.msk [vmem:[#allocation2 + $0x18] sm:$0x2] %vm383_vm1, %v3631_v56 }
 0x24d   :  { %v1665_v48 = vmul.f32 %v1664_v4, %v4122_v50  ;;  %v1666_v62 = vmul.f32 %v1664_v4, %v4123_v20  ;;  %v1667_v41 = vmul.f32 %v1664_v4, %v4124_v49  ;;  %v1668_v31 = vmul.f32 %v1664_v4, %v4125_v16 }
 0x24e   :  { %v1677_v1 = vmul.f32 %v1676_v10, %v4126_v23  ;;  %v1678_v43 = vmul.f32 %v1676_v10, %v4127_v55  ;;  %v1679_v15 = vmul.f32 %v1676_v10, %v4128_v63  ;;  %v1669_v61 = vmul.f32 %v1664_v4, %v4129_v42  ;;  %v4134_v23 = vld [vmem:[#allocation8_spill] sm:$0xff]  ;;  %v4135_v63 = vld [vmem:[#allocation18_spill] sm:$0xff]  ;;  %v4136_v42 = vld [vmem:[#allocation39_spill] sm:$0xff] }
 0x24f   :  { %v1680_v7 = vmul.f32 %v1676_v10, %v4130_v32  ;;  %v1681_v45 = vmul.f32 %v1676_v10, %v4131_v38  ;;  %v1670_v12 = vmul.f32 %v1664_v4, %v4132_v24  ;;  %v1671_v52 = vmul.f32 %v1664_v4, %v4133_v5  ;;  %v4137_v32 = vld [vmem:[#allocation28_spill] sm:$0xff]  ;;  %v4138_v38 = vld [vmem:[#allocation34_spill] sm:$0xff] }
 0x250   :  { %v1685_v33 = vadd.f32 %v1677_v1, %v1665_v48  ;;  %v1686_v29 = vadd.f32 %v1678_v43, %v1666_v62  ;;  %v1687_v17 = vadd.f32 %v1679_v15, %v1667_v41  ;;  %v1672_v37 = vmul.f32 %v1664_v4, %v2493_v34  ;;  %v4139_v5 = vld [vmem:[#allocation64_spill] sm:$0xff]  ;;  %v4140_v4 = vld [vmem:[#allocation74_spill] sm:$0xff]  ;;  %v4141_v15 = vld [vmem:[#allocation67_spill] sm:$0xff] }
 0x251   :  { %v1688_v39 = vadd.f32 %v1680_v7, %v1668_v31  ;;  %v1689_v59 = vadd.f32 %v1681_v45, %v1669_v61  ;;  %v1682_v55 = vmul.f32 %v1676_v10, %v4134_v23  ;;  %v1683_v16 = vmul.f32 %v1676_v10, %v4135_v63 }
 0x252   :  { %v1733_v49 = vadd.f32 %v4136_v42, %v1685_v33  ;;  %v1734_v50 = vadd.f32 %v4137_v32, %v1686_v29  ;;  %v1735_v13 = vadd.f32 %v4138_v38, %v1687_v17  ;;  %v1684_v24 = vmul.f32 %v1676_v10, %v2516_v44  ;;  %v4142_v32 = vld [vmem:[#allocation75_spill] sm:$0xff]  ;;  %v4143_v38 = vld [vmem:[#allocation69_spill] sm:$0xff] }
 0x253   :  { %v1736_v48 = vadd.f32 %v4139_v5, %v1688_v39  ;;  %v1690_v62 = vadd.f32 %v1682_v55, %v1670_v12  ;;  %v1691_v41 = vadd.f32 %v1683_v16, %v1671_v52  ;;  %v1737_v31 = vadd.f32 %v4140_v4, %v1689_v59 }
 0x254   :  { %2261 = vtanh.f32 %v1733_v49  ;;  %v1692_v1 = vadd.f32 %v1684_v24, %v1672_v37  ;;  %v1637_v43 = vrot.slane %v1636_v18, 2 }
 0x255   :  { %2263 = vtanh.f32 %v1734_v50  ;;  %v1738_v61 = vadd.f32 %v4141_v15, %v1690_v62  ;;  %v1739_v7 = vadd.f32 %v4142_v32, %v1691_v41 }
 0x256   :  { %2265 = vtanh.f32 %v1735_v13  ;;  %v1638_v42 = vadd.f32 %v1637_v43, %v1636_v18  ;;  %v1740_v10 = vadd.f32 %v4143_v38, %v1692_v1 }
 0x257   :  { %2267 = vtanh.f32 %v1736_v48 }
 0x258   :  { %2269 = vtanh.f32 %v1737_v31  ;;  %v1639_v45 = vrot.slane %v1638_v42, 1 }
 0x259   :  { %2271 = vtanh.f32 %v1738_v61 }
 0x25a   :  { %2273 = vtanh.f32 %v1739_v7  ;;  %v1640_v16 = vadd.f32 %v1639_v45, %v1638_v42 }
 0x25b   :  { %2275 = vtanh.f32 %v1740_v10 }
 0x25c   :  { %v1645_v62 = vsub.f32 0.0, %v1640_v16 }
 0x25e   :  { %v2262_v49 = vpop.eup %2261 }
 0x25f   :  { %v2264_v55 = vpop.eup %2263  ;;  %v1765_v24 = vmul.f32 %v2262_v49, %v2520_v47  ;;  %v1794_v13 = vmul.f32 %v2262_v49, %v2555_v11 }
 0x260   :  { %v2266_v50 = vpop.eup %2265  ;;  %v1750_v12 = vmul.f32 %v2264_v55, %v2264_v55  ;;  %v1766_v18 = vmul.f32 %v2264_v55, %v2544_v57  ;;  %v1795_v5 = vmul.f32 %v2264_v55, %v2507_v40 }
 0x261   :  { %v2268_v52 = vpop.eup %2267  ;;  %v1773_v33 = vsel %vm229_vm0, %v1765_v24, 0.0  ;;  %v1802_v29 = vsel %vm229_vm0, %v1794_v13, 0.0  ;;  %v1767_v17 = vmul.f32 %v2266_v50, %v2565_v58  ;;  %v1796_v48 = vmul.f32 %v2266_v50, %v2574_v6 }
 0x262   :  { %v2270_v37 = vpop.eup %2269  ;;  %v1774_v39 = vsel %vm229_vm0, %v1766_v18, 0.0  ;;  %v1803_v59 = vsel %vm229_vm0, %v1795_v5, 0.0  ;;  %v1751_v31 = vmul.f32 %v2266_v50, %v2266_v50  ;;  %v1758_v43 = vsub.f32 1.0, %v1750_v12 }
 0x263   :  { %v1775_v41 = vadd.f32 %v1774_v39, %v1773_v33  ;;  %v1804_v4 = vadd.f32 %v1803_v59, %v1802_v29  ;;  %v2272_v1 = vpop.eup %2271  ;;  %v1776_v15 = vsel %vm229_vm0, %v1767_v17, 0.0  ;;  %v1805_v61 = vsel %vm229_vm0, %v1796_v48, 0.0 }
 0x264   :  { %v1768_v42 = vmul.f32 %v2268_v52, %v2537_v54  ;;  %v2274_v32 = vpop.eup %2273  ;;  %v1769_v10 = vmul.f32 %v2270_v37, %v2601_v36  ;;  %v1797_v45 = vmul.f32 %v2268_v52, %v4030_v19  ;;  %v1798_v24 = vmul.f32 %v2270_v37, %v4031_v21 }
 0x265   :  { %v1777_v7 = vadd.f32 %v1776_v15, %v1775_v41  ;;  %v1806_v38 = vadd.f32 %v1805_v61, %v1804_v4  ;;  %v2276_v55 = vpop.eup %2275  ;;  %v1749_v13 = vmul.f32 %v2262_v49, %v2262_v49  ;;  %v1646_v50 = vmul.f32 %v1645_v62, %v3613_v2 }
 0x266   :  { %v1778_v16 = vsel %vm229_vm0, %v1768_v42, 0.0  ;;  %v1753_v12 = vmul.f32 %v2270_v37, %v2270_v37  ;;  %v1807_v5 = vsel %vm229_vm0, %v1797_v45, 0.0  ;;  %v1770_v33 = vmul.f32 %v2272_v1, %v4032_v8 }
 0x267   :  { %v1779_v18 = vadd.f32 %v1778_v16, %v1777_v7  ;;  %v1824_v29 = vmul.f32 %v1758_v43, %v2968_v3  ;;  %v1759_v17 = vsub.f32 1.0, %v1751_v31  ;;  %v1780_v39 = vsel %vm229_vm0, %v1769_v10, 0.0 }
 0x268   :  { %v1808_v59 = vadd.f32 %v1807_v5, %v1806_v38  ;;  %v1809_v41 = vsel %vm229_vm0, %v1798_v24, 0.0  ;;  %v1771_v4 = vmul.f32 %v2274_v32, %v4033_v14  ;;  %v1772_v49 = vmul.f32 %v2276_v55, %v4075_v46 }
 0x269   :  { %v1781_v48 = vadd.f32 %v1780_v39, %v1779_v18  ;;  %v1782_v37 = vsel %vm229_vm0, %v1770_v33, 0.0  ;;  %v1799_v15 = vmul.f32 %v2272_v1, %v4035_v27  ;;  %v1800_v61 = vmul.f32 %v2274_v32, %v4076_v60 }
 0x26a   :  { %v1810_v62 = vadd.f32 %v1809_v41, %v1808_v59  ;;  %v1761_v42 = vsub.f32 1.0, %v1753_v12  ;;  %v1755_v43 = vmul.f32 %v2274_v32, %v2274_v32  ;;  %v1647_v7 = vmul.f32 1.1111112, %v1646_v50 }
 0x26b   :  { %v1783_v31 = vadd.f32 %v1782_v37, %v1781_v48  ;;  %v1784_v38 = vsel %vm229_vm0, %v1771_v4, 0.0  ;;  %v1801_v10 = vmul.f32 %v2276_v55, %v4077_v26  ;;  %v1811_v45 = vsel %vm229_vm0, %v1799_v15, 0.0 }
 0x26c   :  { %v1757_v16 = vsub.f32 1.0, %v1749_v13  ;;  %v1786_v18 = vsel %vm229_vm0, %v1772_v49, 0.0  ;;  %v1812_v5 = vadd.f32 %v1811_v45, %v1810_v62  ;;  %v1813_v33 = vsel %vm229_vm0, %v1800_v61, 0.0 }
 0x26d   :  { %v1785_v24 = vadd.f32 %v1784_v38, %v1783_v31  ;;  %v1832_v12 = vsel %vm229_vm0, %v1824_v29, 0.0  ;;  %v1825_v32 = vmul.f32 %v1759_v17, %v3144_v30  ;;  %v1752_v50 = vmul.f32 %v2268_v52, %v2268_v52 }
 0x26e   :  { %v1823_v39 = vmul.f32 %v1757_v16, %v3126_v0  ;;  %v1814_v48 = vadd.f32 %v1813_v33, %v1812_v5  ;;  %v1754_v41 = vmul.f32 %v2272_v1, %v2272_v1  ;;  %v3702_v4 = vadd.f32 %v1647_v7, %v3613_v2 }
 0x26f   :  { %v1787_v59 = vadd.f32 %v1786_v18, %v1785_v24  ;;  %v1815_v13 = vsel %vm229_vm0, %v1801_v10, 0.0  ;;  %v1760_v62 = vsub.f32 1.0, %v1752_v50  ;;  %v1756_v37 = vmul.f32 %v2276_v55, %v2276_v55 }
 0x270   :  { %v1831_v49 = vsel %vm229_vm0, %v1823_v39, 0.0  ;;  %v1816_v61 = vadd.f32 %v1815_v13, %v1814_v48  ;;  %v1762_v38 = vsub.f32 1.0, %v1754_v41  ;;  %1652 = vst.msk [vmem:[#allocation2 + $0x18] sm:$0x4] %vm385_vm3, %v3702_v4  ;;  %v1827_v52 = vmul.f32 %v1761_v42, %v3006_v53 }
 0x271   :  { %v1788_v15 = vrot.slane %v1787_v59, 4  ;;  %v1833_v31 = vadd.f32 %v1832_v12, %v1831_v49  ;;  %v1763_v29 = vsub.f32 1.0, %v1755_v43  ;;  %v1834_v1 = vsel %vm229_vm0, %v1825_v32, 0.0 }
 0x272   :  { %v1826_v2 = vmul.f32 %v1760_v62, %v3169_v35  ;;  %v1817_v7 = vrot.slane %v1816_v61, 4  ;;  %v1828_v55 = vmul.f32 %v1762_v38, %v3253_v25  ;;  %v1764_v16 = vsub.f32 1.0, %v1756_v37 }
 0x273   :  { %v1789_v17 = vadd.f32 %v1788_v15, %v1787_v59  ;;  %v1835_v10 = vadd.f32 %v1834_v1, %v1833_v31  ;;  %v1838_v33 = vsel %vm229_vm0, %v1827_v52, 0.0  ;;  %v1829_v42 = vmul.f32 %v1763_v29, %v3040_v28  ;;  %v1907_v52 = vpop.permute.xlu0 %1906 }
 0x274   :  { %v1836_v45 = vsel %vm229_vm0, %v1826_v2, 0.0  ;;  %v1818_v18 = vadd.f32 %v1817_v7, %v1816_v61  ;;  %v1840_v32 = vsel %vm229_vm0, %v1828_v55, 0.0  ;;  %v1830_v50 = vmul.f32 %v1764_v16, %v3284_v22  ;;  %v4146_v16 = vld [vmem:[#allocation21_spill] sm:$0xff] }
 0x275   :  { %v1790_v24 = vrot.slane %v1789_v17, 2  ;;  %v1837_v5 = vadd.f32 %v1836_v45, %v1835_v10  ;;  %v1842_v13 = vsel %vm229_vm0, %v1829_v42, 0.0 }
 0x276   :  { %v1819_v39 = vrot.slane %v1818_v18, 2  ;;  %v1844_v15 = vsel %vm229_vm0, %v1830_v50, 0.0 }
 0x277   :  { %v1791_v43 = vadd.f32 %v1790_v24, %v1789_v17  ;;  %v1839_v12 = vadd.f32 %v1838_v33, %v1837_v5  ;;  %v1912_v17 = vpop.permute.xlu1 %1911  ;;  %v1922_v42 = vpop.permute.xlu0 %1921 }
 0x278   :  { %v1820_v48 = vadd.f32 %v1819_v39, %v1818_v18  ;;  %v4147_v18 = vld [vmem:[#allocation10_spill] sm:$0xff] }
 0x279   :  { %v1792_v59 = vrot.slane %v1791_v43, 1  ;;  %v1841_v41 = vadd.f32 %v1840_v32, %v1839_v12  ;;  %v4150_v32 = vld [vmem:[#allocation7_spill] sm:$0xff] }
 0x27a   :  { %v1821_v62 = vrot.slane %v1820_v48, 1 }
 0x27b   :  { %v1793_v49 = vadd.f32 %v1792_v59, %v1791_v43  ;;  %v1843_v37 = vadd.f32 %v1842_v13, %v1841_v41  ;;  %v4149_v43 = vld [vmem:[#allocation14_spill] sm:$0xff]  ;;  %v4152_v41 = vld [vmem:[#allocation9_spill] sm:$0xff] }
 0x27c   :  { %v1822_v61 = vadd.f32 %v1821_v62, %v1820_v48  ;;  %v1917_v48 = vpop.permute.xlu1 %1916  ;;  %v4154_v62 = vld [vmem:[#allocation15_spill] sm:$0xff] }
 0x27d   :  { %v1852_v31 = vmul.f32 1.1111112, %v1793_v49  ;;  %v1845_v38 = vadd.f32 %v1844_v15, %v1843_v37  ;;  %v4153_v49 = vld [vmem:[#allocation11_spill] sm:$0xff]  ;;  %v4155_v15 = vld [vmem:[#allocation6_spill] sm:$0xff] }
 0x27e   :  { %v1854_v1 = vmul.f32 1.1111112, %v1822_v61 }
 0x27f   :  { %v3720_v29 = vadd.f32 %v1852_v31, %v3628_v9  ;;  %v1846_v2 = vrot.slane %v1845_v38, 4 }
 0x280   :  { %v3723_v7 = vadd.f32 %v1854_v1, %v3631_v56  ;;  %v4148_v56 = vld [vmem:[#allocation13_spill] sm:$0xff] }
 0x281   :  { %4144 = vst [vmem:[#allocation49_spill] sm:$0xff] %v3720_v29  ;;  %1861 = vst.msk [vmem:[#allocation2 + $0x1c] sm:$0x1] %vm381_vm2, %v3720_v29  ;;  %v1847_v10 = vadd.f32 %v1846_v2, %v1845_v38  ;;  %v1875_v45 = vrot.slane %v3720_v29, %v4120_v51  ;;  %v4151_v51 = vld [vmem:[#allocation5_spill] sm:$0xff]  ;;  %v4157_v29 = vld [vmem:[#allocation16_spill] sm:$0xff] }
 0x282   :  { %4145 = vst [vmem:[#allocation41_spill] sm:$0xff] %v3723_v7  ;;  %1862 = vst.msk [vmem:[#allocation2 + $0x1c] sm:$0x2] %vm383_vm1, %v3723_v7  ;;  %v1887_v24 = vrot.slane %v3723_v7, %v4146_v16 }
 0x283   :  { %v1848_v55 = vrot.slane %v1847_v10, 2  ;;  %v1877_v9 = vmul.f32 %v1875_v45, %v4123_v20  ;;  %v1876_v5 = vmul.f32 %v1875_v45, %v4147_v18  ;;  %v1878_v33 = vmul.f32 %v1875_v45, %v4148_v56  ;;  %v4156_v18 = vld [vmem:[#allocation17_spill] sm:$0xff] }
 0x284   :  { %v1879_v39 = vmul.f32 %v1875_v45, %v4149_v43  ;;  %v1889_v50 = vmul.f32 %v1887_v24, %v4150_v32  ;;  %v1888_v59 = vmul.f32 %v1887_v24, %v4151_v51  ;;  %v1890_v13 = vmul.f32 %v1887_v24, %v4152_v41 }
 0x285   :  { %v1849_v12 = vadd.f32 %v1848_v55, %v1847_v10  ;;  %v1891_v20 = vmul.f32 %v1887_v24, %v4153_v49  ;;  %v1880_v37 = vmul.f32 %v1875_v45, %v4154_v62  ;;  %v1892_v61 = vmul.f32 %v1887_v24, %v4155_v15  ;;  %v1932_v49 = vpop.permute.xlu0 %1931 }
 0x286   :  { %v1897_v38 = vadd.f32 %v1889_v50, %v1877_v9  ;;  %v1896_v1 = vadd.f32 %v1888_v59, %v1876_v5  ;;  %v1898_v2 = vadd.f32 %v1890_v13, %v1878_v33  ;;  %v1881_v10 = vmul.f32 %v1875_v45, %v4156_v18  ;;  %v1927_v9 = vpop.permute.xlu1 %1926 }
 0x287   :  { %v1850_v31 = vrot.slane %v1849_v12, 1  ;;  %v1899_v16 = vadd.f32 %v1891_v20, %v1879_v39  ;;  %v1893_v55 = vmul.f32 %v1887_v24, %v4134_v23  ;;  %v1900_v7 = vadd.f32 %v1892_v61, %v1880_v37 }
 0x288   :  { %v1945_v43 = vadd.f32 %v1912_v17, %v1897_v38  ;;  %v1944_v32 = vadd.f32 %v1907_v52, %v1896_v1  ;;  %v1946_v51 = vadd.f32 %v1917_v48, %v1898_v2  ;;  %v1882_v62 = vmul.f32 %v1875_v45, %v4157_v29 }
 0x289   :  { %v1851_v56 = vadd.f32 %v1850_v31, %v1849_v12  ;;  %v1947_v41 = vadd.f32 %v1922_v42, %v1899_v16  ;;  %v1894_v15 = vmul.f32 %v1887_v24, %v4135_v63  ;;  %v1883_v5 = vmul.f32 %v1875_v45, %v2493_v34  ;;  %v1942_v50 = vpop.permute.xlu0 %1941 }
 0x28a   :  { %2277 = vtanh.f32 %v1945_v43  ;;  %v1895_v33 = vmul.f32 %v1887_v24, %v2516_v44  ;;  %v1901_v23 = vadd.f32 %v1893_v55, %v1881_v10  ;;  %v1948_v52 = vadd.f32 %v1927_v9, %v1900_v7  ;;  %v1937_v59 = vpop.permute.xlu1 %1936 }
 0x28b   :  { %v1856_v22 = vsub.f32 0.0, %v1851_v56  ;;  %2279 = vtanh.f32 %v1944_v32  ;;  %v1902_v42 = vadd.f32 %v1894_v15, %v1882_v62 }
 0x28c   :  { %2281 = vtanh.f32 %v1946_v51  ;;  %v1903_v12 = vadd.f32 %v1895_v33, %v1883_v5  ;;  %v1949_v29 = vadd.f32 %v1932_v49, %v1901_v23 }
 0x28d   :  { %v1857_v17 = vmul.f32 %v1856_v22, %v3702_v4  ;;  %2283 = vtanh.f32 %v1947_v41  ;;  %v1950_v34 = vadd.f32 %v1937_v59, %v1902_v42 }
 0x28e   :  { %2285 = vtanh.f32 %v1948_v52  ;;  %v1951_v44 = vadd.f32 %v1942_v50, %v1903_v12 }
 0x28f   :  { %v1858_v39 = vmul.f32 1.1111112, %v1857_v17  ;;  %2287 = vtanh.f32 %v1949_v29 }
 0x290   :  { %2289 = vtanh.f32 %v1950_v34 }
 0x291   :  { %v3751_v63 = vadd.f32 %v1858_v39, %v3702_v4  ;;  %2291 = vtanh.f32 %v1951_v44 }
 0x293   :  { %1863 = vst.msk [vmem:[#allocation2 + $0x1c] sm:$0x4] %vm385_vm3, %v3751_v63 }
 0x294   :  { %v2278_v22 = vpop.eup %2277 }
 0x295   :  { %v2280_v45 = vpop.eup %2279  ;;  %v1961_v24 = vmul.f32 %v2278_v22, %v2278_v22  ;;  %v1977_v7 = vmul.f32 %v2278_v22, %v2544_v57  ;;  %v2006_v48 = vmul.f32 %v2278_v22, %v2507_v40 }
 0x296   :  { %v2282_v13 = vpop.eup %2281  ;;  %v1960_v20 = vmul.f32 %v2280_v45, %v2280_v45  ;;  %v1976_v4 = vmul.f32 %v2280_v45, %v2520_v47  ;;  %v2005_v37 = vmul.f32 %v2280_v45, %v2555_v11 }
 0x297   :  { %v2284_v61 = vpop.eup %2283  ;;  %v1969_v31 = vsub.f32 1.0, %v1961_v24  ;;  %v1985_v38 = vsel %vm229_vm0, %v1977_v7, 0.0  ;;  %v2014_v1 = vsel %vm229_vm0, %v2006_v48, 0.0  ;;  %v1962_v2 = vmul.f32 %v2282_v13, %v2282_v13 }
 0x298   :  { %v1968_v16 = vsub.f32 1.0, %v1960_v20  ;;  %v1984_v57 = vsel %vm229_vm0, %v1976_v4, 0.0  ;;  %v2013_v40 = vsel %vm229_vm0, %v2005_v37, 0.0  ;;  %v1978_v18 = vmul.f32 %v2282_v13, %v2565_v58  ;;  %v2286_v41 = vpop.eup %2285 }
 0x299   :  { %v2035_v10 = vmul.f32 %v1969_v31, %v2968_v3  ;;  %v1986_v47 = vadd.f32 %v1985_v38, %v1984_v57  ;;  %v2015_v55 = vadd.f32 %v2014_v1, %v2013_v40  ;;  %v1970_v11 = vsub.f32 1.0, %v1962_v2  ;;  %v2288_v33 = vpop.eup %2287 }
 0x29a   :  { %v2034_v56 = vmul.f32 %v1968_v16, %v3126_v0  ;;  %v1987_v43 = vsel %vm229_vm0, %v1978_v18, 0.0  ;;  %v2007_v32 = vmul.f32 %v2282_v13, %v2574_v6  ;;  %v1963_v51 = vmul.f32 %v2284_v61, %v2284_v61  ;;  %v2290_v12 = vpop.eup %2289 }
 0x29b   :  { %v2043_v49 = vsel %vm229_vm0, %v2035_v10, 0.0  ;;  %v1988_v62 = vadd.f32 %v1987_v43, %v1986_v47  ;;  %v2036_v15 = vmul.f32 %v1970_v11, %v3144_v30  ;;  %v1979_v58 = vmul.f32 %v2284_v61, %v2537_v54  ;;  %v2292_v34 = vpop.eup %2291 }
 0x29c   :  { %v2042_v3 = vsel %vm229_vm0, %v2034_v56, 0.0  ;;  %v2016_v9 = vsel %vm229_vm0, %v2007_v32, 0.0  ;;  %v1971_v5 = vsub.f32 1.0, %v1963_v51  ;;  %v2008_v0 = vmul.f32 %v2284_v61, %v4030_v19 }
 0x29d   :  { %v2044_v23 = vadd.f32 %v2043_v49, %v2042_v3  ;;  %v2017_v17 = vadd.f32 %v2016_v9, %v2015_v55  ;;  %v2045_v6 = vsel %vm229_vm0, %v2036_v15, 0.0  ;;  %v1989_v52 = vsel %vm229_vm0, %v1979_v58, 0.0  ;;  %v4158_v58 = vld [vmem:[#allocation40_spill] sm:$0xff] }
 0x29e   :  { %v1990_v42 = vadd.f32 %v1989_v52, %v1988_v62  ;;  %v2018_v39 = vsel %vm229_vm0, %v2008_v0, 0.0  ;;  %v2037_v30 = vmul.f32 %v1971_v5, %v3169_v35  ;;  %v1964_v54 = vmul.f32 %v2286_v41, %v2286_v41 }
 0x29f   :  { %v2046_v29 = vadd.f32 %v2045_v6, %v2044_v23  ;;  %v2019_v50 = vadd.f32 %v2018_v39, %v2017_v17  ;;  %v1980_v59 = vmul.f32 %v2286_v41, %v2601_v36  ;;  %v2009_v19 = vmul.f32 %v2286_v41, %v4031_v21 }
 0x2a0   :  { %v2047_v44 = vsel %vm229_vm0, %v2037_v30, 0.0  ;;  %v1972_v22 = vsub.f32 1.0, %v1964_v54  ;;  %v1965_v45 = vmul.f32 %v2288_v33, %v2288_v33  ;;  %v1981_v24 = vmul.f32 %v2288_v33, %v4032_v8 }
 0x2a1   :  { %v2048_v7 = vadd.f32 %v2047_v44, %v2046_v29  ;;  %v1991_v48 = vsel %vm229_vm0, %v1980_v59, 0.0  ;;  %v2020_v35 = vsel %vm229_vm0, %v2009_v19, 0.0  ;;  %v2010_v13 = vmul.f32 %v2288_v33, %v4035_v27 }
 0x2a2   :  { %v1992_v20 = vadd.f32 %v1991_v48, %v1990_v42  ;;  %v2021_v4 = vadd.f32 %v2020_v35, %v2019_v50  ;;  %v2038_v36 = vmul.f32 %v1972_v22, %v3006_v53  ;;  %v1973_v37 = vsub.f32 1.0, %v1965_v45  ;;  %v4159_v22 = vld [vmem:[#allocation49_spill] sm:$0xff] }
 0x2a3   :  { %v1993_v21 = vsel %vm229_vm0, %v1981_v24, 0.0  ;;  %v2022_v61 = vsel %vm229_vm0, %v2010_v13, 0.0  ;;  %v1966_v31 = vmul.f32 %v2290_v12, %v2290_v12  ;;  %v1982_v38 = vmul.f32 %v2290_v12, %v4033_v14  ;;  %v4160_v24 = vld [vmem:[#allocation41_spill] sm:$0xff] }
 0x2a4   :  { %v2049_v8 = vsel %vm229_vm0, %v2038_v36, 0.0  ;;  %v1994_v1 = vadd.f32 %v1993_v21, %v1992_v20  ;;  %v2023_v2 = vadd.f32 %v2022_v61, %v2021_v4  ;;  %v2039_v16 = vmul.f32 %v1973_v37, %v3253_v25 }
 0x2a5   :  { %v2050_v57 = vadd.f32 %v2049_v8, %v2048_v7  ;;  %v1974_v27 = vsub.f32 1.0, %v1966_v31  ;;  %v1995_v40 = vsel %vm229_vm0, %v1982_v38, 0.0  ;;  %v2011_v53 = vmul.f32 %v2290_v12, %v4076_v60 }
 0x2a6   :  { %v2051_v18 = vsel %vm229_vm0, %v2039_v16, 0.0  ;;  %v1996_v10 = vadd.f32 %v1995_v40, %v1994_v1  ;;  %v1967_v47 = vmul.f32 %v2292_v34, %v2292_v34  ;;  %v1983_v55 = vmul.f32 %v2292_v34, %v4075_v46 }
 0x2a7   :  { %v2052_v11 = vadd.f32 %v2051_v18, %v2050_v57  ;;  %v2024_v14 = vsel %vm229_vm0, %v2011_v53, 0.0  ;;  %v2040_v56 = vmul.f32 %v1974_v27, %v3040_v28  ;;  %v2012_v43 = vmul.f32 %v2292_v34, %v4077_v26 }
 0x2a8   :  { %v2025_v25 = vadd.f32 %v2024_v14, %v2023_v2  ;;  %v1975_v32 = vsub.f32 1.0, %v1967_v47  ;;  %v1997_v51 = vsel %vm229_vm0, %v1983_v55, 0.0 }
 0x2a9   :  { %v2053_v41 = vsel %vm229_vm0, %v2040_v56, 0.0  ;;  %v1998_v60 = vadd.f32 %v1997_v51, %v1996_v10  ;;  %v2026_v49 = vsel %vm229_vm0, %v2012_v43, 0.0 }
 0x2aa   :  { %v2054_v62 = vadd.f32 %v2053_v41, %v2052_v11  ;;  %v2027_v15 = vadd.f32 %v2026_v49, %v2025_v25  ;;  %v2041_v46 = vmul.f32 %v1975_v32, %v4158_v58 }
 0x2ab   :  { %v1999_v3 = vrot.slane %v1998_v60, 4 }
 0x2ac   :  { %v2028_v9 = vrot.slane %v2027_v15, 4  ;;  %v2055_v5 = vsel %vm229_vm0, %v2041_v46, 0.0 }
 0x2ad   :  { %v2000_v28 = vadd.f32 %v1999_v3, %v1998_v60  ;;  %v2056_v0 = vadd.f32 %v2055_v5, %v2054_v62 }
 0x2ae   :  { %v2029_v26 = vadd.f32 %v2028_v9, %v2027_v15 }
 0x2af   :  { %v2001_v33 = vrot.slane %v2000_v28, 2  ;;  %v2057_v23 = vrot.slane %v2056_v0, 4 }
 0x2b0   :  { %v2030_v17 = vrot.slane %v2029_v26, 2 }
 0x2b1   :  { %v2002_v6 = vadd.f32 %v2001_v33, %v2000_v28  ;;  %v2058_v52 = vadd.f32 %v2057_v23, %v2056_v0 }
 0x2b2   :  { %v2031_v42 = vadd.f32 %v2030_v17, %v2029_v26 }
 0x2b3   :  { %v2003_v39 = vrot.slane %v2002_v6, 1  ;;  %v2059_v30 = vrot.slane %v2058_v52, 2 }
 0x2b4   :  { %v2032_v54 = vrot.slane %v2031_v42, 1 }
 0x2b5   :  { %v2004_v12 = vadd.f32 %v2003_v39, %v2002_v6  ;;  %v2060_v29 = vadd.f32 %v2059_v30, %v2058_v52 }
 0x2b6   :  { %v2033_v50 = vadd.f32 %v2032_v54, %v2031_v42 }
 0x2b7   :  { %v2061_v59 = vrot.slane %v2060_v29, 1  ;;  %v2063_v19 = vmul.f32 1.1111112, %v2004_v12 }
 0x2b8   :  { %v2065_v34 = vmul.f32 1.1111112, %v2033_v50 }
 0x2b9   :  { %v2062_v44 = vadd.f32 %v2061_v59, %v2060_v29  ;;  %v2064_v45 = vadd.f32 %v2063_v19, %v4159_v22 }
 0x2ba   :  { %v2066_v7 = vadd.f32 %v2065_v34, %v4160_v24 }
 0x2bb   :  { %v2067_v48 = vsub.f32 0.0, %v2062_v44  ;;  %2072 = vst.msk [vmem:[#allocation2 + $0x20] sm:$0x1] %vm381_vm2, %v2064_v45 }
 0x2bc   :  { %2073 = vst.msk [vmem:[#allocation2 + $0x20] sm:$0x2] %vm383_vm1, %v2066_v7 }
 0x2bd   :  { %v2068_v35 = vmul.f32 %v2067_v48, %v3751_v63 }
 0x2bf   :  { %v2069_v13 = vmul.f32 1.1111112, %v2068_v35 }
 0x2c1   :  { %v2070_v20 = vadd.f32 %v2069_v13, %v3751_v63 }
 0x2c3   :  { %2074 = vst.msk [vmem:[#allocation2 + $0x20] sm:$0x4] %vm385_vm3, %v2070_v20 }
 0x2c4   :  { %2305 = shalt.err (!%p2302_p4)
}
 0x2c5   :  { %s2306_s20 = scalar_lea.hbm %s3824_s2, 576 }
 0x2c6   :  { %p2307_p5 = scmp.ne.s32.totalorder %s3824_s2, %s2306_s20  ;;  %p2310_p6 = scmp.lt.u32.totalorder %s2306_s20, %s3824_s2 }
 0x2c8   :  { %p2312_p7 = pnand %p2310_p6, %p2307_p5 }
 0x2ca   :  { %2315 = shalt.err (!%p2312_p7)
}
 0x2cb   :  { %s2333_s25 = smov 64   ;;  %s2334_s26 = smov 4  }
 0x2cc   :  { %2086 = dma.vmem_to_hbm [thread:$0]  %s2081_s16, 576, %s3824_s2, [#allocation3], %s2333_s25, %s2333_s25, %s2334_s26  }
 0x2cd   :  { %2316 = dma.done.wait [#allocation3], 576  }
 0x2ce   :  { %2317 = vsyncadd [#allocation3], 4294966720 }
 0x2cf   :  { %2090 = vsyncpa [#allocation3], 1 }

</bundles_post_ra>
